<compile_context>
chip_gen: v5e
topology: v5e:2x2
jax: 0.10.0
libtpu: 0.0.40
codegen_flags: <defaults>
</compile_context>

<pallas_src>
import functools

import numpy as np
import jax
import jax.numpy as jnp
from jax.experimental import pallas as pl
from jax.experimental.pallas import tpu as pltpu


# ----------------------------------------------------------------------------
# Fused GroupNorm -> activation -> conv kernel
# ----------------------------------------------------------------------------

def _gn_act_conv_kernel(x_ref, gamma_ref, beta_ref, gsel_ref, cmask_ref,
                        w_ref, b_ref, o_ref, *, num_groups, W, k, act, eps):
    Nb, C, HW = x_ref.shape
    n_grp = float((C // num_groups) * HW)
    p = k // 2
    P = p * (W + 1)                                 # zero-pad along flattened HW

    # Small resident operands, loaded once per grid step (hoisted out of loops).
    A = gsel_ref[...]                               # (C, C) f32 same-group selector
    gamma = gamma_ref[...]                          # (C, 1) f32
    beta = beta_ref[...]                            # (C, 1) f32
    w2 = w_ref[...]                                 # (Cout, k*k*C) bf16, tap-major
    bias = b_ref[...]                               # (Cout, 1) f32
    cm = cmask_ref[...]                             # (k, 1, HW) bf16 column masks

    for i in range(Nb):                             # Nb is a small static constant
        x = x_ref[i]                                # (C, HW) f32, HW on lanes

        # ---- GroupNorm: lane (XLU) reductions + tiny (C,C)@(C,1) matmuls ----
        s_c = jnp.sum(x, axis=1, keepdims=True)                       # (C, 1)
        mean_c = jnp.dot(A, s_c, preferred_element_type=jnp.float32) / n_grp
        xc = x - mean_c
        ss_c = jnp.sum(xc * xc, axis=1, keepdims=True)                # (C, 1)
        var_c = jnp.dot(A, ss_c, preferred_element_type=jnp.float32) / n_grp
        h = xc * (jax.lax.rsqrt(var_c + eps) * gamma) + beta

        # ---- activation (f32 VPU / EUP) ----
        if act == 'ELU':
            h = jnp.where(h > 0.0, h, jnp.exp(jnp.minimum(h, 0.0)) - 1.0)
        else:  # 'ReLU'
            h = jnp.maximum(h, 0.0)

        # ---- k x k, stride-1, "same" conv as ONE large-K bf16 matmul ----
        hb = h.astype(jnp.bfloat16)                 # MXU operand cast
        if P > 0:
            z = jnp.zeros((C, P), jnp.bfloat16)
            hp = jnp.concatenate([z, hb, z], axis=1)    # (C, HW + 2P)
        else:
            hp = hb

        taps = []
        for dy in range(k):
            for dx in range(k):
                off = (dy - p) * W + (dx - p)
                s = hp[:, P + off: P + off + HW]        # (C, HW) shifted tap
                if dx != p:
                    s = s * cm[dx]                      # kill row-wrap columns
                taps.append(s)
        S = taps[0] if len(taps) == 1 else jnp.concatenate(taps, axis=0)

        acc = jnp.dot(w2, S, preferred_element_type=jnp.float32)   # (Cout, HW)
        o_ref[i] = acc + bias                          # lane-dense unmasked store


# ----------------------------------------------------------------------------
# myConv forward wrapper (GN -> act -> conv), one pallas_call
# ----------------------------------------------------------------------------

def my_conv_forward(x, params, *, kSize, num_groups, act='ELU', eps=1e-5):
    """x: (N, C, H, W) f32; params: gamma/beta (C,), w (Cout, C, k, k), b (Cout,)."""
    assert act in ('ELU', 'ReLU')
    N, C, H, W = x.shape
    w = params['w']
    Cout, Cin, kh, kw = w.shape
    assert Cin == C and kh == kSize and kw == kSize
    assert kSize % 2 == 1, "only odd kSize with 'same' padding is supported"
    assert C % num_groups == 0
    HW = H * W
    Cg = C // num_groups
    p = kSize // 2

    # Free reshapes only (no transposes): keep NCHW-flat with HW on lanes.
    x_flat = x.reshape(N, C, HW)
    gamma = params['gamma'].astype(jnp.float32).reshape(C, 1)
    beta = params['beta'].astype(jnp.float32).reshape(C, 1)
    bias = params['b'].astype(jnp.float32).reshape(Cout, 1)
    # Tap-major fused conv weights (Cout, k*k*C) bf16: row order of the im2col
    # slab is (dy, dx) taps outer, channel inner.
    w2 = (jnp.transpose(w, (0, 2, 3, 1))
          .reshape(Cout, kSize * kSize * C).astype(jnp.bfloat16))

    # Constant host-side helpers: same-group selector and per-dx column masks.
    gsel = jnp.asarray(np.kron(np.eye(num_groups, dtype=np.float32),
                               np.ones((Cg, Cg), dtype=np.float32)))   # (C, C)
    pos = np.arange(HW, dtype=np.int64) % W
    cmask_np = np.stack(
        [((pos + (dx - p) >= 0) & (pos + (dx - p) < W)).astype(np.float32)
         for dx in range(kSize)], axis=0).reshape(kSize, 1, HW)
    cmask = jnp.asarray(cmask_np).astype(jnp.bfloat16)       # exact {0,1} mask

    # Batch images per grid step (amortize per-step overhead) while keeping
    # >= 2 grid steps when possible so both v7x TensorCores get work.
    Nb = 1
    for cand in range(min(N, 8), 0, -1):
        if N % cand == 0 and N // cand >= 2:
            Nb = cand
            break
    G = N // Nb

    kernel = functools.partial(_gn_act_conv_kernel, num_groups=num_groups,
                               W=W, k=kSize, act=act, eps=eps)

    out = pl.pallas_call(
        kernel,
        out_shape=jax.ShapeDtypeStruct((N, Cout, HW), jnp.float32),
        grid=(G,),
        in_specs=[
            pl.BlockSpec((Nb, C, HW), lambda n: (n, 0, 0)),
            pl.BlockSpec((C, 1), lambda n: (0, 0)),
            pl.BlockSpec((C, 1), lambda n: (0, 0)),
            pl.BlockSpec((C, C), lambda n: (0, 0)),
            pl.BlockSpec((kSize, 1, HW), lambda n: (0, 0, 0)),
            pl.BlockSpec((Cout, kSize * kSize * C), lambda n: (0, 0)),
            pl.BlockSpec((Cout, 1), lambda n: (0, 0)),
        ],
        out_specs=pl.BlockSpec((Nb, Cout, HW), lambda n: (n, 0, 0)),
        compiler_params=pltpu.CompilerParams(
            dimension_semantics=("parallel",)),
    )(x_flat, gamma, beta, gsel, cmask, w2, bias)

    return out.reshape(N, Cout, H, W)


# ----------------------------------------------------------------------------
# Pure-JAX reference (mirrors the kernel's bf16 MXU operand cast)
# ----------------------------------------------------------------------------

def ref_forward(x, params, *, kSize, num_groups, act='ELU', eps=1e-5):
    N, C, H, W = x.shape
    xg = x.reshape(N, num_groups, -1)
    mean = jnp.mean(xg, axis=2, keepdims=True)
    var = jnp.mean((xg - mean) ** 2, axis=2, keepdims=True)
    xn = ((xg - mean) * jax.lax.rsqrt(var + eps)).reshape(N, C, H, W)
    h = (xn * params['gamma'][None, :, None, None]
         + params['beta'][None, :, None, None])
    if act == 'ELU':
        h = jnp.where(h > 0.0, h, jnp.exp(jnp.minimum(h, 0.0)) - 1.0)
    else:
        h = jnp.maximum(h, 0.0)
    hb = h.astype(jnp.bfloat16).astype(jnp.float32)
    wb = params['w'].astype(jnp.bfloat16).astype(jnp.float32)
    p = kSize // 2
    out = jax.lax.conv_general_dilated(
        hb, wb, window_strides=(1, 1), padding=[(p, p), (p, p)],
        dimension_numbers=('NCHW', 'OIHW', 'NCHW'),
        precision=jax.lax.Precision.HIGHEST)
    return out + params['b'][None, :, None, None]


# ----------------------------------------------------------------------------

if __name__ == "__main__":
    N, C_in, H, W = 4, 64, 16, 16
    C_out, kSize, num_groups = 32, 3, 32

    key = jax.random.PRNGKey(0)
    k0, k1, k2, k3, k4, k5 = jax.random.split(key, 6)
    x = jax.random.normal(k0, (N, C_in, H, W), jnp.float32)
    params = dict(
        gamma=1.0 + 0.1 * jax.random.normal(k1, (C_in,), jnp.float32),
        beta=0.1 * jax.random.normal(k2, (C_in,), jnp.float32),
        w=jax.random.normal(k3, (C_out, C_in, kSize, kSize), jnp.float32)
          / np.sqrt(C_in * kSize * kSize),
        b=0.1 * jax.random.normal(k4, (C_out,), jnp.float32),
    )

    # 3x3 "same" conv, ELU (module defaults: norm='GN', act='ELU', bias=True)
    out = jax.block_until_ready(
        my_conv_forward(x, params, kSize=kSize, num_groups=num_groups,
                        act='ELU'))
    assert out.shape == (N, C_out, H, W)
    assert bool(jnp.all(jnp.isfinite(out)))

    ref = ref_forward(x, params, kSize=kSize, num_groups=num_groups, act='ELU')
    err = float(jnp.max(jnp.abs(out - ref)))
    tol = 5e-2 + 5e-2 * float(jnp.max(jnp.abs(ref)))
    assert err <= tol, ("3x3 mismatch", err, tol)

    # pointwise (kSize=1, padding=0) configuration with ReLU activation
    params1 = dict(
        gamma=params['gamma'], beta=params['beta'],
        w=jax.random.normal(k5, (16, C_in, 1, 1), jnp.float32) / np.sqrt(C_in),
        b=jnp.zeros((16,), jnp.float32),
    )
    out1 = jax.block_until_ready(
        my_conv_forward(x, params1, kSize=1, num_groups=num_groups,
                        act='ReLU'))
    assert out1.shape == (N, 16, H, W)
    ref1 = ref_forward(x, params1, kSize=1, num_groups=num_groups, act='ReLU')
    err1 = float(jnp.max(jnp.abs(out1 - ref1)))
    tol1 = 5e-2 + 5e-2 * float(jnp.max(jnp.abs(ref1)))
    assert err1 <= tol1, ("1x1 mismatch", err1, tol1)

    print("KERNEL_OK")
</pallas_src>

<mosaic_0001>
module attributes {stable_mosaic.version = 11 : i64} {
  func.func @_gn_act_conv_kernel(%arg0: i32, %arg1: memref<2x64x256xf32, #tpu.memory_space<vmem>>, %arg2: memref<64x1xf32, #tpu.memory_space<vmem>>, %arg3: memref<64x1xf32, #tpu.memory_space<vmem>>, %arg4: memref<64x64xf32, #tpu.memory_space<vmem>>, %arg5: memref<3x1x256xbf16, #tpu.memory_space<vmem>>, %arg6: memref<32x576xbf16, #tpu.memory_space<vmem>>, %arg7: memref<32x1xf32, #tpu.memory_space<vmem>>, %arg8: memref<2x32x256xf32, #tpu.memory_space<vmem>>) attributes {dimension_semantics = [#tpu.dimension_semantics<parallel>], iteration_bounds = array<i64: 2>, scalar_prefetch = 0 : i64, scratch_operands = 0 : i64, tpu.core_type = #tpu.core_type<tc>, window_params = [{transform_indices = @transform_0, window_bounds = array<i64: 2, 64, 256>}, {pipeline_mode = #tpu.pipeline_mode<synchronous>, transform_indices = @transform_1, window_bounds = array<i64: 64, 1>}, {pipeline_mode = #tpu.pipeline_mode<synchronous>, transform_indices = @transform_2, window_bounds = array<i64: 64, 1>}, {pipeline_mode = #tpu.pipeline_mode<synchronous>, transform_indices = @transform_3, window_bounds = array<i64: 64, 64>}, {pipeline_mode = #tpu.pipeline_mode<synchronous>, transform_indices = @transform_4, window_bounds = array<i64: 3, 1, 256>}, {pipeline_mode = #tpu.pipeline_mode<synchronous>, transform_indices = @transform_5, window_bounds = array<i64: 32, 576>}, {pipeline_mode = #tpu.pipeline_mode<synchronous>, transform_indices = @transform_6, window_bounds = array<i64: 32, 1>}, {transform_indices = @transform_7, window_bounds = array<i64: 2, 32, 256>}]} {
    %c0 = arith.constant 0 : index
    %c0_0 = arith.constant 0 : index
    %0 = vector.load %arg4[%c0, %c0_0] : memref<64x64xf32, #tpu.memory_space<vmem>>, vector<64x64xf32>
    %c0_1 = arith.constant 0 : index
    %c0_2 = arith.constant 0 : index
    %1 = vector.load %arg2[%c0_1, %c0_2] : memref<64x1xf32, #tpu.memory_space<vmem>>, vector<64x1xf32>
    %c0_3 = arith.constant 0 : index
    %c0_4 = arith.constant 0 : index
    %2 = vector.load %arg3[%c0_3, %c0_4] : memref<64x1xf32, #tpu.memory_space<vmem>>, vector<64x1xf32>
    %c0_5 = arith.constant 0 : index
    %c0_6 = arith.constant 0 : index
    %3 = vector.load %arg6[%c0_5, %c0_6] : memref<32x576xbf16, #tpu.memory_space<vmem>>, vector<32x576xbf16>
    %c0_7 = arith.constant 0 : index
    %c0_8 = arith.constant 0 : index
    %4 = vector.load %arg7[%c0_7, %c0_8] : memref<32x1xf32, #tpu.memory_space<vmem>>, vector<32x1xf32>
    %c0_9 = arith.constant 0 : index
    %c0_10 = arith.constant 0 : index
    %c0_11 = arith.constant 0 : index
    %5 = vector.load %arg5[%c0_9, %c0_10, %c0_11] : memref<3x1x256xbf16, #tpu.memory_space<vmem>>, vector<3x1x256xbf16>
    %c0_12 = arith.constant 0 : index
    %c0_13 = arith.constant 0 : index
    %c0_14 = arith.constant 0 : index
    %6 = vector.load %arg1[%c0_12, %c0_13, %c0_14] : memref<2x64x256xf32, #tpu.memory_space<vmem>>, vector<1x64x256xf32>
    %7 = vector.shape_cast %6 : vector<1x64x256xf32> to vector<64x256xf32>
    %cst = arith.constant dense<0.000000e+00> : vector<64xf32>
    %8 = vector.multi_reduction <add>, %7, %cst [1] : vector<64x256xf32> to vector<64xf32>
    %9 = vector.shape_cast %8 : vector<64xf32> to vector<64x1xf32>
    %cst_15 = arith.constant dense<0.000000e+00> : vector<64x1xf32>
    %10 = tpu.matmul %0, %9, %cst_15 {dimension_numbers = #tpu.dot_dimension_numbers<[1], [0], [0], [1], [0, 0, 1, 1], [], []>} : vector<64x64xf32>, vector<64x1xf32>, vector<64x1xf32> -> vector<64x1xf32>
    %cst_16 = arith.constant 5.120000e+02 : f32
    %11 = vector.broadcast %cst_16 : f32 to vector<64x1xf32>
    %12 = arith.divf %10, %11 : vector<64x1xf32>
    %13 = vector.broadcast %12 : vector<64x1xf32> to vector<64x256xf32>
    %14 = arith.subf %7, %13 : vector<64x256xf32>
    %15 = arith.mulf %14, %14 : vector<64x256xf32>
    %cst_17 = arith.constant dense<0.000000e+00> : vector<64xf32>
    %16 = vector.multi_reduction <add>, %15, %cst_17 [1] : vector<64x256xf32> to vector<64xf32>
    %17 = vector.shape_cast %16 : vector<64xf32> to vector<64x1xf32>
    %cst_18 = arith.constant dense<0.000000e+00> : vector<64x1xf32>
    %18 = tpu.matmul %0, %17, %cst_18 {dimension_numbers = #tpu.dot_dimension_numbers<[1], [0], [0], [1], [0, 0, 1, 1], [], []>} : vector<64x64xf32>, vector<64x1xf32>, vector<64x1xf32> -> vector<64x1xf32>
    %cst_19 = arith.constant 5.120000e+02 : f32
    %19 = vector.broadcast %cst_19 : f32 to vector<64x1xf32>
    %20 = arith.divf %18, %19 : vector<64x1xf32>
    %cst_20 = arith.constant 9.99999974E-6 : f32
    %21 = vector.broadcast %cst_20 : f32 to vector<64x1xf32>
    %22 = arith.addf %20, %21 : vector<64x1xf32>
    %23 = math.rsqrt %22 : vector<64x1xf32>
    %24 = arith.mulf %23, %1 : vector<64x1xf32>
    %25 = vector.broadcast %24 : vector<64x1xf32> to vector<64x256xf32>
    %26 = arith.mulf %14, %25 : vector<64x256xf32>
    %27 = vector.broadcast %2 : vector<64x1xf32> to vector<64x256xf32>
    %28 = arith.addf %26, %27 : vector<64x256xf32>
    %cst_21 = arith.constant 0.000000e+00 : f32
    %29 = vector.broadcast %cst_21 : f32 to vector<64x256xf32>
    %30 = arith.cmpf ogt, %28, %29 : vector<64x256xf32>
    %cst_22 = arith.constant 0.000000e+00 : f32
    %31 = vector.broadcast %cst_22 : f32 to vector<64x256xf32>
    %32 = arith.minimumf %28, %31 : vector<64x256xf32>
    %33 = math.exp %32 : vector<64x256xf32>
    %cst_23 = arith.constant 1.000000e+00 : f32
    %34 = vector.broadcast %cst_23 : f32 to vector<64x256xf32>
    %35 = arith.subf %33, %34 : vector<64x256xf32>
    %36 = arith.select %30, %28, %35 : vector<64x256xi1>, vector<64x256xf32>
    %37 = arith.truncf %36 : vector<64x256xf32> to vector<64x256xbf16>
    %cst_24 = arith.constant 0.000000e+00 : bf16
    %38 = vector.broadcast %cst_24 : bf16 to vector<64x17xbf16>
    %39 = tpu.concatenate %38, %37, %38 in 1 : vector<64x17xbf16>, vector<64x256xbf16>, vector<64x17xbf16> -> vector<64x290xbf16>
    %40 = vector.extract_strided_slice %39 {offsets = [0, 0], sizes = [64, 256], strides = [1, 1]} : vector<64x290xbf16> to vector<64x256xbf16>
    %41 = vector.extract_strided_slice %5 {offsets = [0, 0, 0], sizes = [1, 1, 256], strides = [1, 1, 1]} : vector<3x1x256xbf16> to vector<1x1x256xbf16>
    %42 = vector.shape_cast %41 : vector<1x1x256xbf16> to vector<1x256xbf16>
    %43 = vector.broadcast %42 : vector<1x256xbf16> to vector<64x256xbf16>
    %44 = arith.mulf %40, %43 : vector<64x256xbf16>
    %45 = vector.extract_strided_slice %39 {offsets = [0, 1], sizes = [64, 256], strides = [1, 1]} : vector<64x290xbf16> to vector<64x256xbf16>
    %46 = vector.extract_strided_slice %39 {offsets = [0, 2], sizes = [64, 256], strides = [1, 1]} : vector<64x290xbf16> to vector<64x256xbf16>
    %47 = vector.extract_strided_slice %5 {offsets = [2, 0, 0], sizes = [1, 1, 256], strides = [1, 1, 1]} : vector<3x1x256xbf16> to vector<1x1x256xbf16>
    %48 = vector.shape_cast %47 : vector<1x1x256xbf16> to vector<1x256xbf16>
    %49 = vector.broadcast %48 : vector<1x256xbf16> to vector<64x256xbf16>
    %50 = arith.mulf %46, %49 : vector<64x256xbf16>
    %51 = vector.extract_strided_slice %39 {offsets = [0, 16], sizes = [64, 256], strides = [1, 1]} : vector<64x290xbf16> to vector<64x256xbf16>
    %52 = vector.extract_strided_slice %5 {offsets = [0, 0, 0], sizes = [1, 1, 256], strides = [1, 1, 1]} : vector<3x1x256xbf16> to vector<1x1x256xbf16>
    %53 = vector.shape_cast %52 : vector<1x1x256xbf16> to vector<1x256xbf16>
    %54 = vector.broadcast %53 : vector<1x256xbf16> to vector<64x256xbf16>
    %55 = arith.mulf %51, %54 : vector<64x256xbf16>
    %56 = vector.extract_strided_slice %39 {offsets = [0, 17], sizes = [64, 256], strides = [1, 1]} : vector<64x290xbf16> to vector<64x256xbf16>
    %57 = vector.extract_strided_slice %39 {offsets = [0, 18], sizes = [64, 256], strides = [1, 1]} : vector<64x290xbf16> to vector<64x256xbf16>
    %58 = vector.extract_strided_slice %5 {offsets = [2, 0, 0], sizes = [1, 1, 256], strides = [1, 1, 1]} : vector<3x1x256xbf16> to vector<1x1x256xbf16>
    %59 = vector.shape_cast %58 : vector<1x1x256xbf16> to vector<1x256xbf16>
    %60 = vector.broadcast %59 : vector<1x256xbf16> to vector<64x256xbf16>
    %61 = arith.mulf %57, %60 : vector<64x256xbf16>
    %62 = vector.extract_strided_slice %39 {offsets = [0, 32], sizes = [64, 256], strides = [1, 1]} : vector<64x290xbf16> to vector<64x256xbf16>
    %63 = vector.extract_strided_slice %5 {offsets = [0, 0, 0], sizes = [1, 1, 256], strides = [1, 1, 1]} : vector<3x1x256xbf16> to vector<1x1x256xbf16>
    %64 = vector.shape_cast %63 : vector<1x1x256xbf16> to vector<1x256xbf16>
    %65 = vector.broadcast %64 : vector<1x256xbf16> to vector<64x256xbf16>
    %66 = arith.mulf %62, %65 : vector<64x256xbf16>
    %67 = vector.extract_strided_slice %39 {offsets = [0, 33], sizes = [64, 256], strides = [1, 1]} : vector<64x290xbf16> to vector<64x256xbf16>
    %68 = vector.extract_strided_slice %39 {offsets = [0, 34], sizes = [64, 256], strides = [1, 1]} : vector<64x290xbf16> to vector<64x256xbf16>
    %69 = vector.extract_strided_slice %5 {offsets = [2, 0, 0], sizes = [1, 1, 256], strides = [1, 1, 1]} : vector<3x1x256xbf16> to vector<1x1x256xbf16>
    %70 = vector.shape_cast %69 : vector<1x1x256xbf16> to vector<1x256xbf16>
    %71 = vector.broadcast %70 : vector<1x256xbf16> to vector<64x256xbf16>
    %72 = arith.mulf %68, %71 : vector<64x256xbf16>
    %73 = tpu.concatenate %44, %45, %50, %55, %56, %61, %66, %67, %72 in 0 : vector<64x256xbf16>, vector<64x256xbf16>, vector<64x256xbf16>, vector<64x256xbf16>, vector<64x256xbf16>, vector<64x256xbf16>, vector<64x256xbf16>, vector<64x256xbf16>, vector<64x256xbf16> -> vector<576x256xbf16>
    %cst_25 = arith.constant dense<0.000000e+00> : vector<32x256xf32>
    %74 = tpu.matmul %3, %73, %cst_25 {dimension_numbers = #tpu.dot_dimension_numbers<[1], [0], [0], [1], [0, 0, 1, 1], [], []>} : vector<32x576xbf16>, vector<576x256xbf16>, vector<32x256xf32> -> vector<32x256xf32>
    %75 = vector.broadcast %4 : vector<32x1xf32> to vector<32x256xf32>
    %76 = arith.addf %74, %75 : vector<32x256xf32>
    %c0_26 = arith.constant 0 : index
    %c0_27 = arith.constant 0 : index
    %c0_28 = arith.constant 0 : index
    %77 = vector.load %arg8[%c0_26, %c0_27, %c0_28] : memref<2x32x256xf32, #tpu.memory_space<vmem>>, vector<1x32x256xf32>
    %78 = vector.shape_cast %77 : vector<1x32x256xf32> to vector<32x256xf32>
    %79 = vector.shape_cast %76 : vector<32x256xf32> to vector<1x32x256xf32>
    tpu.vector_store %arg8[%c0_26, %c0_27, %c0_28], %79 {strides = array<i32>} : memref<2x32x256xf32, #tpu.memory_space<vmem>>, vector<1x32x256xf32>,
    %c1 = arith.constant 1 : index
    %c0_29 = arith.constant 0 : index
    %c0_30 = arith.constant 0 : index
    %80 = vector.load %arg1[%c1, %c0_29, %c0_30] : memref<2x64x256xf32, #tpu.memory_space<vmem>>, vector<1x64x256xf32>
    %81 = vector.shape_cast %80 : vector<1x64x256xf32> to vector<64x256xf32>
    %cst_31 = arith.constant dense<0.000000e+00> : vector<64xf32>
    %82 = vector.multi_reduction <add>, %81, %cst_31 [1] : vector<64x256xf32> to vector<64xf32>
    %83 = vector.shape_cast %82 : vector<64xf32> to vector<64x1xf32>
    %cst_32 = arith.constant dense<0.000000e+00> : vector<64x1xf32>
    %84 = tpu.matmul %0, %83, %cst_32 {dimension_numbers = #tpu.dot_dimension_numbers<[1], [0], [0], [1], [0, 0, 1, 1], [], []>} : vector<64x64xf32>, vector<64x1xf32>, vector<64x1xf32> -> vector<64x1xf32>
    %cst_33 = arith.constant 5.120000e+02 : f32
    %85 = vector.broadcast %cst_33 : f32 to vector<64x1xf32>
    %86 = arith.divf %84, %85 : vector<64x1xf32>
    %87 = vector.broadcast %86 : vector<64x1xf32> to vector<64x256xf32>
    %88 = arith.subf %81, %87 : vector<64x256xf32>
    %89 = arith.mulf %88, %88 : vector<64x256xf32>
    %cst_34 = arith.constant dense<0.000000e+00> : vector<64xf32>
    %90 = vector.multi_reduction <add>, %89, %cst_34 [1] : vector<64x256xf32> to vector<64xf32>
    %91 = vector.shape_cast %90 : vector<64xf32> to vector<64x1xf32>
    %cst_35 = arith.constant dense<0.000000e+00> : vector<64x1xf32>
    %92 = tpu.matmul %0, %91, %cst_35 {dimension_numbers = #tpu.dot_dimension_numbers<[1], [0], [0], [1], [0, 0, 1, 1], [], []>} : vector<64x64xf32>, vector<64x1xf32>, vector<64x1xf32> -> vector<64x1xf32>
    %cst_36 = arith.constant 5.120000e+02 : f32
    %93 = vector.broadcast %cst_36 : f32 to vector<64x1xf32>
    %94 = arith.divf %92, %93 : vector<64x1xf32>
    %cst_37 = arith.constant 9.99999974E-6 : f32
    %95 = vector.broadcast %cst_37 : f32 to vector<64x1xf32>
    %96 = arith.addf %94, %95 : vector<64x1xf32>
    %97 = math.rsqrt %96 : vector<64x1xf32>
    %98 = arith.mulf %97, %1 : vector<64x1xf32>
    %99 = vector.broadcast %98 : vector<64x1xf32> to vector<64x256xf32>
    %100 = arith.mulf %88, %99 : vector<64x256xf32>
    %101 = vector.broadcast %2 : vector<64x1xf32> to vector<64x256xf32>
    %102 = arith.addf %100, %101 : vector<64x256xf32>
    %cst_38 = arith.constant 0.000000e+00 : f32
    %103 = vector.broadcast %cst_38 : f32 to vector<64x256xf32>
    %104 = arith.cmpf ogt, %102, %103 : vector<64x256xf32>
    %cst_39 = arith.constant 0.000000e+00 : f32
    %105 = vector.broadcast %cst_39 : f32 to vector<64x256xf32>
    %106 = arith.minimumf %102, %105 : vector<64x256xf32>
    %107 = math.exp %106 : vector<64x256xf32>
    %cst_40 = arith.constant 1.000000e+00 : f32
    %108 = vector.broadcast %cst_40 : f32 to vector<64x256xf32>
    %109 = arith.subf %107, %108 : vector<64x256xf32>
    %110 = arith.select %104, %102, %109 : vector<64x256xi1>, vector<64x256xf32>
    %111 = arith.truncf %110 : vector<64x256xf32> to vector<64x256xbf16>
    %cst_41 = arith.constant 0.000000e+00 : bf16
    %112 = vector.broadcast %cst_41 : bf16 to vector<64x17xbf16>
    %113 = tpu.concatenate %112, %111, %112 in 1 : vector<64x17xbf16>, vector<64x256xbf16>, vector<64x17xbf16> -> vector<64x290xbf16>
    %114 = vector.extract_strided_slice %113 {offsets = [0, 0], sizes = [64, 256], strides = [1, 1]} : vector<64x290xbf16> to vector<64x256xbf16>
    %115 = vector.extract_strided_slice %5 {offsets = [0, 0, 0], sizes = [1, 1, 256], strides = [1, 1, 1]} : vector<3x1x256xbf16> to vector<1x1x256xbf16>
    %116 = vector.shape_cast %115 : vector<1x1x256xbf16> to vector<1x256xbf16>
    %117 = vector.broadcast %116 : vector<1x256xbf16> to vector<64x256xbf16>
    %118 = arith.mulf %114, %117 : vector<64x256xbf16>
    %119 = vector.extract_strided_slice %113 {offsets = [0, 1], sizes = [64, 256], strides = [1, 1]} : vector<64x290xbf16> to vector<64x256xbf16>
    %120 = vector.extract_strided_slice %113 {offsets = [0, 2], sizes = [64, 256], strides = [1, 1]} : vector<64x290xbf16> to vector<64x256xbf16>
    %121 = vector.extract_strided_slice %5 {offsets = [2, 0, 0], sizes = [1, 1, 256], strides = [1, 1, 1]} : vector<3x1x256xbf16> to vector<1x1x256xbf16>
    %122 = vector.shape_cast %121 : vector<1x1x256xbf16> to vector<1x256xbf16>
    %123 = vector.broadcast %122 : vector<1x256xbf16> to vector<64x256xbf16>
    %124 = arith.mulf %120, %123 : vector<64x256xbf16>
    %125 = vector.extract_strided_slice %113 {offsets = [0, 16], sizes = [64, 256], strides = [1, 1]} : vector<64x290xbf16> to vector<64x256xbf16>
    %126 = vector.extract_strided_slice %5 {offsets = [0, 0, 0], sizes = [1, 1, 256], strides = [1, 1, 1]} : vector<3x1x256xbf16> to vector<1x1x256xbf16>
    %127 = vector.shape_cast %126 : vector<1x1x256xbf16> to vector<1x256xbf16>
    %128 = vector.broadcast %127 : vector<1x256xbf16> to vector<64x256xbf16>
    %129 = arith.mulf %125, %128 : vector<64x256xbf16>
    %130 = vector.extract_strided_slice %113 {offsets = [0, 17], sizes = [64, 256], strides = [1, 1]} : vector<64x290xbf16> to vector<64x256xbf16>
    %131 = vector.extract_strided_slice %113 {offsets = [0, 18], sizes = [64, 256], strides = [1, 1]} : vector<64x290xbf16> to vector<64x256xbf16>
    %132 = vector.extract_strided_slice %5 {offsets = [2, 0, 0], sizes = [1, 1, 256], strides = [1, 1, 1]} : vector<3x1x256xbf16> to vector<1x1x256xbf16>
    %133 = vector.shape_cast %132 : vector<1x1x256xbf16> to vector<1x256xbf16>
    %134 = vector.broadcast %133 : vector<1x256xbf16> to vector<64x256xbf16>
    %135 = arith.mulf %131, %134 : vector<64x256xbf16>
    %136 = vector.extract_strided_slice %113 {offsets = [0, 32], sizes = [64, 256], strides = [1, 1]} : vector<64x290xbf16> to vector<64x256xbf16>
    %137 = vector.extract_strided_slice %5 {offsets = [0, 0, 0], sizes = [1, 1, 256], strides = [1, 1, 1]} : vector<3x1x256xbf16> to vector<1x1x256xbf16>
    %138 = vector.shape_cast %137 : vector<1x1x256xbf16> to vector<1x256xbf16>
    %139 = vector.broadcast %138 : vector<1x256xbf16> to vector<64x256xbf16>
    %140 = arith.mulf %136, %139 : vector<64x256xbf16>
    %141 = vector.extract_strided_slice %113 {offsets = [0, 33], sizes = [64, 256], strides = [1, 1]} : vector<64x290xbf16> to vector<64x256xbf16>
    %142 = vector.extract_strided_slice %113 {offsets = [0, 34], sizes = [64, 256], strides = [1, 1]} : vector<64x290xbf16> to vector<64x256xbf16>
    %143 = vector.extract_strided_slice %5 {offsets = [2, 0, 0], sizes = [1, 1, 256], strides = [1, 1, 1]} : vector<3x1x256xbf16> to vector<1x1x256xbf16>
    %144 = vector.shape_cast %143 : vector<1x1x256xbf16> to vector<1x256xbf16>
    %145 = vector.broadcast %144 : vector<1x256xbf16> to vector<64x256xbf16>
    %146 = arith.mulf %142, %145 : vector<64x256xbf16>
    %147 = tpu.concatenate %118, %119, %124, %129, %130, %135, %140, %141, %146 in 0 : vector<64x256xbf16>, vector<64x256xbf16>, vector<64x256xbf16>, vector<64x256xbf16>, vector<64x256xbf16>, vector<64x256xbf16>, vector<64x256xbf16>, vector<64x256xbf16>, vector<64x256xbf16> -> vector<576x256xbf16>
    %cst_42 = arith.constant dense<0.000000e+00> : vector<32x256xf32>
    %148 = tpu.matmul %3, %147, %cst_42 {dimension_numbers = #tpu.dot_dimension_numbers<[1], [0], [0], [1], [0, 0, 1, 1], [], []>} : vector<32x576xbf16>, vector<576x256xbf16>, vector<32x256xf32> -> vector<32x256xf32>
    %149 = vector.broadcast %4 : vector<32x1xf32> to vector<32x256xf32>
    %150 = arith.addf %148, %149 : vector<32x256xf32>
    %c1_43 = arith.constant 1 : index
    %c0_44 = arith.constant 0 : index
    %c0_45 = arith.constant 0 : index
    %151 = vector.load %arg8[%c1_43, %c0_44, %c0_45] : memref<2x32x256xf32, #tpu.memory_space<vmem>>, vector<1x32x256xf32>
    %152 = vector.shape_cast %151 : vector<1x32x256xf32> to vector<32x256xf32>
    %153 = vector.shape_cast %150 : vector<32x256xf32> to vector<1x32x256xf32>
    tpu.vector_store %arg8[%c1_43, %c0_44, %c0_45], %153 {strides = array<i32>} : memref<2x32x256xf32, #tpu.memory_space<vmem>>, vector<1x32x256xf32>,
    return
  }
  func.func @transform_0(%arg0: i32) -> (i32, i32, i32) {
    %c0_i32 = arith.constant 0 : i32
    %c0_i32_0 = arith.constant 0 : i32
    %c0_i32_1 = arith.constant 0 : i32
    return %arg0, %c0_i32, %c0_i32_0 : i32, i32, i32
  }
  func.func @transform_1(%arg0: i32) -> (i32, i32) {
    %c0_i32 = arith.constant 0 : i32
    %c0_i32_0 = arith.constant 0 : i32
    %c0_i32_1 = arith.constant 0 : i32
    return %c0_i32, %c0_i32_0 : i32, i32
  }
  func.func @transform_2(%arg0: i32) -> (i32, i32) {
    %c0_i32 = arith.constant 0 : i32
    %c0_i32_0 = arith.constant 0 : i32
    %c0_i32_1 = arith.constant 0 : i32
    return %c0_i32, %c0_i32_0 : i32, i32
  }
  func.func @transform_3(%arg0: i32) -> (i32, i32) {
    %c0_i32 = arith.constant 0 : i32
    %c0_i32_0 = arith.constant 0 : i32
    %c0_i32_1 = arith.constant 0 : i32
    return %c0_i32, %c0_i32_0 : i32, i32
  }
  func.func @transform_4(%arg0: i32) -> (i32, i32, i32) {
    %c0_i32 = arith.constant 0 : i32
    %c0_i32_0 = arith.constant 0 : i32
    %c0_i32_1 = arith.constant 0 : i32
    %c0_i32_2 = arith.constant 0 : i32
    return %c0_i32, %c0_i32_0, %c0_i32_1 : i32, i32, i32
  }
  func.func @transform_5(%arg0: i32) -> (i32, i32) {
    %c0_i32 = arith.constant 0 : i32
    %c0_i32_0 = arith.constant 0 : i32
    %c0_i32_1 = arith.constant 0 : i32
    return %c0_i32, %c0_i32_0 : i32, i32
  }
  func.func @transform_6(%arg0: i32) -> (i32, i32) {
    %c0_i32 = arith.constant 0 : i32
    %c0_i32_0 = arith.constant 0 : i32
    %c0_i32_1 = arith.constant 0 : i32
    return %c0_i32, %c0_i32_0 : i32, i32
  }
  func.func @transform_7(%arg0: i32) -> (i32, i32, i32) {
    %c0_i32 = arith.constant 0 : i32
    %c0_i32_0 = arith.constant 0 : i32
    %c0_i32_1 = arith.constant 0 : i32
    return %arg0, %c0_i32, %c0_i32_0 : i32, i32, i32
  }
}

</mosaic_0001>

<bundles_post_ra>
// kernel: tpu_custom_call.1
= control target key start
LH: loop header
LB: loop body
LE: loop exit
PB: predicated region body
PF: predicated region fallthrough
CT: control target
= control target key end

     0   :  { %12 = vsyncpa [#allocation3], 0  ;;  %s7504_s0 = inlined_call_operand.hbm [shape: f32[4,64,256], index: 0, kind: input, shape index: {}]   ;;  %s7505_s1 = inlined_call_operand.vmem [shape: f32[64,1], index: 1, kind: input, shape index: {}]   ;;  %s7506_s2 = inlined_call_operand.vmem [shape: f32[64,1], index: 2, kind: input, shape index: {}]   ;;  %s7507_s3 = inlined_call_operand.vmem [shape: f32[64,64], index: 3, kind: input, shape index: {}]   ;;  %s7508_s4 = inlined_call_operand.vmem [shape: bf16[3,1,256], index: 4, kind: input, shape index: {}]   ;;  %s7509_s5 = inlined_call_operand.vmem [shape: bf16[32,576], index: 5, kind: input, shape index: {}]   ;;  %s7510_s6 = inlined_call_operand.vmem [shape: f32[32,1], index: 6, kind: input, shape index: {}]   ;;  %s7511_s7 = inlined_call_operand.hbm [shape: f32[4,32,256], index: 7, kind: output, shape index: {}]  }
   0x1   :  { %14 = vsyncpa [#allocation3 + $0x1], 0 }
   0x2   :  { %15 = vsyncpa [#allocation4], 0 }
   0x3   :  { %17 = vsyncpa [#allocation4 + $0x1], 0  ;;  %s4519_s24 = smov 0   ;;  %s4521_s25 = smov 0  }
   0x4   :  { %s4523_s26 = smov 0   ;;  %s4525_s27 = smov 0  }
   0x5 LB: > { %s4540_s28 = sadd.s32 4294967295, %s4458_s27   ;;  %s3989_s29 = sadd.s32 4294967294, %s4458_s27   ;;  %s4458_s27 = sphi %s4525_s27, %s7998_s27   ;;  %s4454_s26 = sphi %s4523_s26, %s7997_s26   ;;  %s4450_s25 = sphi %s4521_s25, %s7996_s25   ;;  %s4446_s24 = sphi %s4519_s24, %s7995_s24  }
   0x6   : > { %s4544_s30 = sadd.s32 1, %s4458_s27   ;;  %s30_s8 = sadd.s32 1, %s4454_s26 }
   0x7   : > { %s27_s9 = ssub.s32 %s4458_s27, %s4544_s30  ;;  %p37_p0 = scmp.ne.s32.totalorder %s4454_s26, %s4450_s25 }
   0x8   : > { %p28_p1 = scmp.eq.s32.totalorder %s27_s9, 0  ;;  %p38_p2 = scmp.eq.s32.totalorder %s4458_s27, 0 }
   0x9   : > { %p43_p3 = scmp.ne.s32.totalorder %s4450_s25, %s4446_s24  ;;  %p44_p4 = scmp.eq.s32.totalorder %s4540_s28, 0 }
   0xa   : > { %s4556_s10 = scalar_select %p28_p1, %s4454_s26, %s30_s8  }
   0xb   : > { %p4558_p5 = por %p38_p2, %p37_p0  ;;  %p4562_p6 = por %p44_p4, %p43_p3 }
   0xc   : > { %7685 = sst [smem:[#allocation8_spill]] %s4556_s10  ;;  %p193_p7 = scmp.eq.s32.totalorder %s4540_s28, 1 }
   0xd   : > { %p199_p8 = scmp.eq.s32.totalorder %s3989_s29, 1  ;;  %p4167_p10 = scmp.lt.s32.totalorder %s4458_s27, 2 }
   0xe   : > { %p4569_p11 = por %p193_p7, %p37_p0  ;;  %s237_s15 = sand.u32 1, %s4454_s26  }
   0xf   : > { %p4573_p12 = por %p199_p8, %p43_p3  ;;  %s4142_s16 = sshll.u32 %s4458_s27, 8 }
  0x10   : > { %s3992_s17 = sshll.u32 %s237_s15, 8  ;;  %s247_s20 = scalar_lea.hbm %s7504_s0, %s4142_s16 }
  0x11   : > { %s248_s21 = sshll.u32 %s247_s20, 4  ;;  %s241_s22 = scalar_lea.vmem [#allocation2], %s3992_s17  ;;  %s249_s21 = int_to_ptr.hbm [resolvable:$true] %s248_s21 }
  0x12   : > { %s250_s23 = sshll.u32 %s241_s22, 4  ;;  %p4584_p13 = pnand %p4167_p10, %p4558_p5  ;;  %s251_s23 = int_to_ptr.vmem [resolvable:$true] %s250_s23 }
  0x13   : > { %p3996_p0 = scmp.ge.s32.totalorder %s4458_s27, 1  ;;  %p258_p1 = scmp.lt.s32.totalorder %s4458_s27, 3 }
  0x14   : > { %s238_s8 = scalar_lea.sflag [#allocation3], %s237_s15  ;;  %s4362_s9 = sshra.s32 %s249_s21, 4  ;;  %s4363_s9 = int_to_ptr.hbm [resolvable:$true] %s4362_s9 }
  0x15   : > { %s4364_s10 = scalar_lea.hbm %s4363_s9, 256  ;;  %p4366_p3 = pneg %p4584_p13 }
  0x16   : > { %p4365_p2 = scmp.ne.s32.totalorder %s4363_s9, %s4364_s10  ;;  %s4369_s11 = scalar_lea.hbm %s7504_s0, 512 }
  0x17   : > { %p4370_p5 = scmp.lt.s32.totalorder %s4363_s9, %s7504_s0  ;;  %p4371_p8 = scmp.lt.s32.totalorder %s4369_s11, %s4364_s10 }
  0x18   : > { %p4367_p4 = pnand %p4366_p3, %p4365_p2 }
  0x19   : > { %p4372_p10 = por %p4371_p8, %p4370_p5 }
  0x1a   : > { %p4368_p7 = pneg %p4367_p4 }
  0x1c   : > { %p4373_p9 = pnand %p4372_p10, %p4368_p7 }
  0x1e   : > { %4376 = shalt.err (!%p4373_p9)
}
  0x1f   : > { %s4460_s15 = smov 256   ;;  %s4461_s20 = smov 16  }
  0x20   : > { %4162 = dma.hbm_to_vmem [thread:$0]  (!%p4584_p13), %s249_s21, 4096, %s251_s23, %s238_s8, %s4460_s15, %s4460_s15, %s4461_s20  }
  0x21   : > { %p259_p2 = pnand %p3996_p0, %p258_p1 }
  0x23   : > { %262 = sbr.rel (%p259_p2) target bundleno = 2811 (0xafb), region = 48 }
  0x28   : > { %s4605_s22 = sand.u32 1, %s4450_s25  }
  0x29   : > { %s3997_s10 = sshll.u32 %s4605_s22, 8  ;;  %s265_s9 = scalar_lea.sflag [#allocation3], %s4605_s22 }
  0x2a   : > { %s4609_s16 = scalar_lea.vmem [#allocation2], %s3997_s10 }
  0x2b   : > { %4437 = dma.done.wait (%p4562_p6), %s265_s9, 4096  }
  0x2c   : > { %4439 = vsyncadd (%p4562_p6), %s265_s9, 4294963200  ;;  %v4616_v0 = vld [vmem:[%s4609_s16 + $0x70] sm:$0xff]  ;;  %v4619_v1 = vld [vmem:[%s4609_s16 + $0x78] sm:$0xff]  ;;  %vm385_vm0 = vcmask 523264   ;;  %v4462_v41 = vmov 0   ;;  %v4463_v42 = vmov 512.0  }
  0x2d   : > { %v4622_v2 = vld [vmem:[%s4609_s16 + $0x50] sm:$0xff]  ;;  %v382_v3 = vadd.f32 %v4619_v1, %v4616_v0  ;;  %v4627_v4 = vld [vmem:[%s4609_s16 + $0x58] sm:$0xff]  ;;  %v4640_v9 = vld [vmem:[%s4609_s16 + $0x60] sm:$0xff]  ;;  %4222 = vset.pattern.permute.xlu2 %v4462_v41  ;;  %4221 = vset.pattern.permute.xlu1 %v4462_v41  ;;  %4248 = vrcp.f32 %v4463_v42  ;;  %s4464_s12 = smov 17   ;;  %s4465_s21 = smov 18  }
  0x2e   : > { %v376_v5 = vadd.f32 %v4627_v4, %v4622_v2  ;;  %v4632_v6 = vld [vmem:[%s4609_s16 + $0x30] sm:$0xff]  ;;  %v4635_v7 = vld [vmem:[%s4609_s16 + $0x38] sm:$0xff]  ;;  %v4643_v10 = vld [vmem:[%s4609_s16 + $0x68] sm:$0xff]  ;;  %4220 = vset.pattern.permute.xlu0 %v4462_v41  ;;  %s7646_s23 = smov 16   ;;  %s4467_s29 = smov 127  }
  0x2f   : > { %383 = vadd.xlane.f32.xlu0 %v382_v3  ;;  %v370_v8 = vadd.f32 %v4635_v7, %v4632_v6  ;;  %v4646_v11 = vld [vmem:[%s4609_s16 + $0x40] sm:$0xff]  ;;  %v4649_v12 = vld [vmem:[%s4609_s16 + $0x48] sm:$0xff]  ;;  %v379_v15 = vadd.f32 %v4643_v10, %v4640_v9  ;;  %v4664_v18 = vld [vmem:[%s4609_s16 + $0x10] sm:$0xff]  ;;  %s4468_s8 = smov 110   ;;  %s4469_s17 = smov 2  }
  0x30   : > { %377 = vadd.xlane.f32.xlu1 %v376_v5  ;;  %v4652_v13 = vld [vmem:[%s4609_s16 + $0x20] sm:$0xff]  ;;  %v4655_v14 = vld [vmem:[%s4609_s16 + $0x28] sm:$0xff]  ;;  %v373_v16 = vadd.f32 %v4649_v12, %v4646_v11  ;;  %v4667_v19 = vld [vmem:[%s4609_s16 + $0x18] sm:$0xff]  ;;  %s4470_s11 = smov 111   ;;  %s4471_s18 = smov 112  }
  0x31   : > { %371 = vadd.xlane.f32.xlu2 %v370_v8  ;;  %v367_v17 = vadd.f32 %v4655_v14, %v4652_v13  ;;  %v4670_v20 = vld [vmem:[%s4609_s16] sm:$0xff]  ;;  %v4673_v21 = vld [vmem:[%s4609_s16 + $0x8] sm:$0xff]  ;;  %v364_v22 = vadd.f32 %v4667_v19, %v4664_v18  ;;  %v4682_v32 = vld [vmem:[%s7507_s3] sm:$0xff]  ;;  %s4472_s19 = smov 126   ;;  %s4474_s9 = smov 95  }
  0x32   : > { %v361_v23 = vadd.f32 %v4673_v21, %v4670_v20  ;;  %v4689_v33 = vld [vmem:[%s7507_s3 + $0x8] sm:$0xff]  ;;  %v4696_v34 = vld [vmem:[%s7507_s3 + $0x10] sm:$0xff]  ;;  %v4703_v35 = vld [vmem:[%s7507_s3 + $0x18] sm:$0xff]  ;;  %s7647_s10 = smov 96   ;;  %s4412_s20 = scalar_lea.hbm %s7511_s7, 256 }
  0x33   : > { %v4710_v36 = vld [vmem:[%s7507_s3 + $0x20] sm:$0xff]  ;;  %v4717_v37 = vld [vmem:[%s7507_s3 + $0x28] sm:$0xff]  ;;  %v4724_v38 = vld [vmem:[%s7507_s3 + $0x30] sm:$0xff]  ;;  %v4249_v44 = vpop.eup %4248 }
  0x34   : > { %v4731_v39 = vld [vmem:[%s7507_s3 + $0x38] sm:$0xff]  ;;  %v452_v45 = vmul.f32 512.0, %v4249_v44  ;;  %vm456_vm1 = vweird.f32 %v4249_v44 }
  0x36   : > { %v453_v47 = vsub.f32 1.0, %v452_v45 }
  0x37   : > { %380 = vadd.xlane.f32.xlu0 %v379_v15 }
  0x38   : > { %374 = vadd.xlane.f32.xlu1 %v373_v16  ;;  %v454_v48 = vmul.f32 %v4249_v44, %v453_v47 }
  0x39   : > { %368 = vadd.xlane.f32.xlu2 %v367_v17 }
  0x3a   : > { %v455_v50 = vadd.f32 %v4249_v44, %v454_v48 }
  0x3c   : > { %v4735_v51 = vsel %vm456_vm1, %v4249_v44, %v455_v50 }
  0x3d   : > { %7691 = vst [vmem:[#allocation9_spill] sm:$0xff] %v4735_v51 }
  0x3f   : > { %365 = vadd.xlane.f32.xlu0 %v364_v22 }
  0x40   : > { %362 = vadd.xlane.f32.xlu1 %v361_v23 }
  0xa2   : > { %v384_v24 = vpop.xlane.xlu0 %383 }
  0xa3   : > { %418 = vmatpush.msra.mxu0 %v384_v24  ;;  %v378_v25 = vpop.xlane.xlu1 %377 }
  0xa4   : > { %v372_v26 = vpop.xlane.xlu2 %371 }
  0xaa   : > { %v381_v27 = vpop.xlane.xlu0 %380 }
  0xab   : > { %419 = vmatpush.msra.mxu0 %v381_v27  ;;  %v375_v28 = vpop.xlane.xlu1 %374 }
  0xac   : > { %v369_v29 = vpop.xlane.xlu2 %368 }
  0xad   : > { %420 = vmatpush.msra.mxu0 %v378_v25 }
  0xaf   : > { %421 = vmatpush.msra.mxu0 %v375_v28 }
  0xb1   : > { %422 = vmatpush.msra.mxu0 %v372_v26 }
  0xb2   : > { %v366_v30 = vpop.xlane.xlu0 %365 }
  0xb3   : > { %423 = vmatpush.msra.mxu0 %v369_v29  ;;  %v363_v31 = vpop.xlane.xlu1 %362 }
  0xb5   : > { %424 = vmatpush.msra.mxu0 %v366_v30 }
  0xb7   : > { %425 = vmatpush.msra.mxu0 %v363_v31 }
  0xb8   : > { %3999 = vmatmul.msk.f32.vlgmr.msra.gmra.mxu0 %vm385_vm0, %v4682_v32 }
  0xc0   : > { %4000 = vmatmul.msk.f32.gmra.mxu0 %vm385_vm0, %v4689_v33 }
  0xc8   : > { %4001 = vmatmul.msk.f32.gmra.mxu0 %vm385_vm0, %v4696_v34 }
  0xd0   : > { %4002 = vmatmul.msk.f32.gmra.mxu0 %vm385_vm0, %v4703_v35 }
  0xd8   : > { %4003 = vmatmul.msk.f32.gmra.mxu0 %vm385_vm0, %v4710_v36 }
  0xe0   : > { %4004 = vmatmul.msk.f32.gmra.mxu0 %vm385_vm0, %v4717_v37 }
  0xe8   : > { %4005 = vmatmul.msk.f32.gmra.mxu0 %vm385_vm0, %v4724_v38 }
  0xf0   : > { %4006 = vmatmul.msk.f32.gmra.mxu0 %vm385_vm0, %v4731_v39 }
 0x135   : > { %v427_v40 = vpop.f32.mrf.mxu0 }
 0x136   : > { %v458_v60 = vmul.f32 %v4735_v51, %v427_v40 }
 0x13d   : > { %v430_v43 = vpop.f32.mrf.mxu0 }
 0x13e   : > { %v459_v63 = vmul.f32 %v4735_v51, %v430_v43 }
 0x145   : > { %v433_v46 = vpop.f32.mrf.mxu0 }
 0x146   : > { %v460_v57 = vmul.f32 %v4735_v51, %v433_v46 }
 0x14d   : > { %v436_v49 = vpop.f32.mrf.mxu0 }
 0x14e   : > { %v461_v62 = vmul.f32 %v4735_v51, %v436_v49 }
 0x155   : > { %v439_v52 = vpop.f32.mrf.mxu0 }
 0x156   : > { %v462_v53 = vmul.f32 %v4735_v51, %v439_v52 }
 0x158   : > { %488 = vperm.xlu2 %4222, %v462_v53  }
 0x15d   : > { %v442_v54 = vpop.f32.mrf.mxu0 }
 0x15e   : > { %v463_v55 = vmul.f32 %v4735_v51, %v442_v54 }
 0x160   : > { %493 = vperm.xlu1 %4221, %v463_v55  }
 0x165   : > { %v445_v56 = vpop.f32.mrf.mxu0 }
 0x166   : > { %v464_v58 = vmul.f32 %v4735_v51, %v445_v56 }
 0x168   : > { %478 = vperm.xlu1 %4221, %v460_v57   ;;  %498 = vperm.xlu0 %4220, %v464_v58  }
 0x16d   : > { %v448_v59 = vpop.f32.mrf.mxu0 }
 0x16e   : > { %v465_v61 = vmul.f32 %v4735_v51, %v448_v59  ;;  %v323_v59 = vld [vmem:[%s7506_s2 + $0x20] sm:$0xff] }
 0x170   : > { %468 = vperm.xlu1 %4221, %v458_v60   ;;  %503 = vperm.xlu2 %4222, %v465_v61   ;;  %v324_v60 = vld [vmem:[%s7506_s2 + $0x28] sm:$0xff]  ;;  %v321_v61 = vld [vmem:[%s7506_s2 + $0x10] sm:$0xff] }
 0x178   : > { %483 = vperm.xlu2 %4222, %v461_v62  }
 0x180   : > { %473 = vperm.xlu2 %4222, %v459_v63  }
 0x1b2   : > { %v489_v3 = vpop.permute.xlu2 %488 }
 0x1ca   : > { %v504_v5 = vpop.permute.xlu2 %503 }
 0x1cb   : > { %v4746_v8 = vsub.f32 %v4616_v0, %v504_v5  ;;  %v4749_v15 = vsub.f32 %v4619_v1, %v504_v5 }
 0x1cd   : > { %v536_v16 = vmul.f32 %v4746_v8, %v4746_v8  ;;  %v537_v17 = vmul.f32 %v4749_v15, %v4749_v15 }
 0x1cf   : > { %v559_v22 = vadd.f32 %v537_v17, %v536_v16 }
 0x1d1   : > { %560 = vadd.xlane.f32.xlu0 %v559_v22 }
 0x1d2   : > { %v494_v23 = vpop.permute.xlu1 %493  ;;  %v484_v24 = vpop.permute.xlu2 %483 }
 0x1d3   : > { %v4756_v25 = vsub.f32 %v4622_v2, %v494_v23  ;;  %v4759_v26 = vsub.f32 %v4627_v4, %v494_v23  ;;  %v4762_v0 = vsub.f32 %v4632_v6, %v484_v24  ;;  %v4765_v1 = vsub.f32 %v4635_v7, %v484_v24 }
 0x1d5   : > { %v532_v27 = vmul.f32 %v4756_v25, %v4756_v25  ;;  %v533_v28 = vmul.f32 %v4759_v26, %v4759_v26  ;;  %v528_v29 = vmul.f32 %v4762_v0, %v4762_v0  ;;  %v529_v2 = vmul.f32 %v4765_v1, %v4765_v1 }
 0x1d7   : > { %v553_v4 = vadd.f32 %v533_v28, %v532_v27  ;;  %v547_v30 = vadd.f32 %v529_v2, %v528_v29 }
 0x1d9   : > { %554 = vadd.xlane.f32.xlu1 %v553_v4  ;;  %548 = vadd.xlane.f32.xlu0 %v547_v30 }
 0x1da   : > { %v479_v6 = vpop.permute.xlu1 %478  ;;  %v499_v31 = vpop.permute.xlu0 %498 }
 0x1db   : > { %v4776_v7 = vsub.f32 %v4652_v13, %v479_v6  ;;  %v4779_v40 = vsub.f32 %v4655_v14, %v479_v6  ;;  %v4782_v41 = vsub.f32 %v4640_v9, %v499_v31  ;;  %v4785_v42 = vsub.f32 %v4643_v10, %v499_v31  ;;  %v474_v52 = vpop.permute.xlu2 %473 }
 0x1dc   : > { %v4796_v14 = vsub.f32 %v4646_v11, %v489_v3  ;;  %v4799_v9 = vsub.f32 %v4649_v12, %v489_v3  ;;  %v4816_v54 = vsub.f32 %v4664_v18, %v474_v52  ;;  %v326_v18 = vld [vmem:[%s7506_s2 + $0x38] sm:$0xff] }
 0x1dd   : > { %v526_v43 = vmul.f32 %v4776_v7, %v4776_v7  ;;  %v527_v44 = vmul.f32 %v4779_v40, %v4779_v40  ;;  %v534_v45 = vmul.f32 %v4782_v41, %v4782_v41  ;;  %v535_v13 = vmul.f32 %v4785_v42, %v4785_v42 }
 0x1de   : > { %v530_v50 = vmul.f32 %v4796_v14, %v4796_v14  ;;  %v531_v11 = vmul.f32 %v4799_v9, %v4799_v9  ;;  %v524_v56 = vmul.f32 %v4816_v54, %v4816_v54 }
 0x1df   : > { %v544_v10 = vadd.f32 %v527_v44, %v526_v43  ;;  %v556_v46 = vadd.f32 %v535_v13, %v534_v45  ;;  %v313_v13 = vld [vmem:[%s7505_s1 + $0x10] sm:$0xff] }
 0x1e1   : > { %545 = vadd.xlane.f32.xlu1 %v544_v10  ;;  %557 = vadd.xlane.f32.xlu2 %v556_v46 }
 0x1e2   : > { %v469_v47 = vpop.permute.xlu1 %468 }
 0x1e3   : > { %v4802_v48 = vsub.f32 %v4670_v20, %v469_v47  ;;  %v4805_v49 = vsub.f32 %v4673_v21, %v469_v47  ;;  %v4819_v20 = vsub.f32 %v4667_v19, %v474_v52  ;;  %v550_v21 = vadd.f32 %v531_v11, %v530_v50  ;;  %v325_v19 = vld [vmem:[%s7506_s2 + $0x30] sm:$0xff] }
 0x1e5   : > { %v522_v12 = vmul.f32 %v4802_v48, %v4802_v48  ;;  %v523_v53 = vmul.f32 %v4805_v49, %v4805_v49  ;;  %v525_v57 = vmul.f32 %v4819_v20, %v4819_v20 }
 0x1e7   : > { %v538_v55 = vadd.f32 %v523_v53, %v522_v12  ;;  %v541_v58 = vadd.f32 %v525_v57, %v524_v56 }
 0x1e9   : > { %551 = vadd.xlane.f32.xlu2 %v550_v21  ;;  %539 = vadd.xlane.f32.xlu0 %v538_v55 }
 0x1f1   : > { %542 = vadd.xlane.f32.xlu2 %v541_v58 }
 0x1fa   : > { %800 = vperm.xlu1 %4221, %v326_v18  }
 0x1fd   : > { %795 = vperm.xlu0 %4220, %v325_v19  }
 0x202   : > { %785 = vperm.xlu1 %4221, %v323_v59  }
 0x205   : > { %790 = vperm.xlu0 %4220, %v324_v60   ;;  %v314_v60 = vld [vmem:[%s7505_s1 + $0x18] sm:$0xff] }
 0x20d   : > { %775 = vperm.xlu0 %4220, %v321_v61  }
 0x244   : > { %v561_v62 = vpop.xlane.xlu0 %560 }
 0x245   : > { %570 = vmatpush.msra.mxu1 %v561_v62 }
 0x24c   : > { %v555_v3 = vpop.xlane.xlu1 %554  ;;  %v549_v16 = vpop.xlane.xlu0 %548 }
 0x254   : > { %v558_v63 = vpop.xlane.xlu2 %557  ;;  %v546_v17 = vpop.xlane.xlu1 %545 }
 0x255   : > { %571 = vmatpush.msra.mxu1 %v558_v63 }
 0x257   : > { %572 = vmatpush.msra.mxu1 %v555_v3 }
 0x25c   : > { %v552_v5 = vpop.xlane.xlu2 %551  ;;  %v540_v23 = vpop.xlane.xlu0 %539 }
 0x25d   : > { %573 = vmatpush.msra.mxu1 %v552_v5 }
 0x25f   : > { %574 = vmatpush.msra.mxu1 %v549_v16 }
 0x261   : > { %575 = vmatpush.msra.mxu1 %v546_v17 }
 0x264   : > { %v543_v22 = vpop.xlane.xlu2 %542 }
 0x265   : > { %576 = vmatpush.msra.mxu1 %v543_v22 }
 0x267   : > { %577 = vmatpush.msra.mxu1 %v540_v23 }
 0x268   : > { %4007 = vmatmul.msk.f32.vlgmr.msra.gmra.mxu1 %vm385_vm0, %v4682_v32 }
 0x270   : > { %4008 = vmatmul.msk.f32.gmra.mxu1 %vm385_vm0, %v4689_v33 }
 0x278   : > { %4009 = vmatmul.msk.f32.gmra.mxu1 %vm385_vm0, %v4696_v34 }
 0x280   : > { %4010 = vmatmul.msk.f32.gmra.mxu1 %vm385_vm0, %v4703_v35 }
 0x288   : > { %4011 = vmatmul.msk.f32.gmra.mxu1 %vm385_vm0, %v4710_v36 }
 0x290   : > { %4012 = vmatmul.msk.f32.gmra.mxu1 %vm385_vm0, %v4717_v37 }
 0x298   : > { %4013 = vmatmul.msk.f32.gmra.mxu1 %vm385_vm0, %v4724_v38 }
 0x2a0   : > { %4014 = vmatmul.msk.f32.gmra.mxu1 %vm385_vm0, %v4731_v39 }
 0x2e5   : > { %v579_v32 = vpop.f32.mrf.mxu1 }
 0x2e6   : > { %v603_v47 = vmul.f32 %v579_v32, %v4735_v51 }
 0x2e8   : > { %v4872_v56 = vadd.f32 1e-05, %v603_v47 }
 0x2ed   : > { %v582_v33 = vpop.f32.mrf.mxu1 }
 0x2ee   : > { %v604_v35 = vmul.f32 %v582_v33, %v4735_v51 }
 0x2f0   : > { %v4859_v37 = vadd.f32 1e-05, %v604_v35  ;;  %v315_v35 = vld [vmem:[%s7505_s1 + $0x20] sm:$0xff] }
 0x2f2   : > { %vm635_vm12 = vweird.f32 %v4859_v37 }
 0x2f5   : > { %v585_v24 = vpop.f32.mrf.mxu1 }
 0x2f6   : > { %v605_v34 = vmul.f32 %v585_v24, %v4735_v51 }
 0x2f8   : > { %v613_v27 = vadd.f32 1e-05, %v605_v34 }
 0x2fa   : > { %4250 = vrsqrt.f32 %v613_v27  ;;  %vm645_vm3 = vweird.f32 %v613_v27 }
 0x2fd   : > { %v588_v28 = vpop.f32.mrf.mxu1 }
 0x2fe   : > { %v606_v36 = vmul.f32 %v588_v28, %v4735_v51 }
 0x300   : > { %v4251_v29 = vpop.eup %4250  ;;  %v614_v2 = vadd.f32 1e-05, %v606_v36 }
 0x301   : > { %v640_v38 = vmul.f32 %v4251_v29, %v613_v27  ;;  %vm646_vm2 = vweird.f32 %v4251_v29 }
 0x302   : > { %4252 = vrsqrt.f32 %v614_v2  ;;  %vm647_vm4 = vmor %vm645_vm3, %vm646_vm2  ;;  %vm655_vm6 = vweird.f32 %v614_v2 }
 0x303   : > { %v641_v4 = vmul.f32 %v4251_v29, %v640_v38  ;;  %4254 = vrsqrt.f32 %v4859_v37 }
 0x305   : > { %v642_v39 = vmul.f32 0.5, %v641_v4  ;;  %v591_v30 = vpop.f32.mrf.mxu1 }
 0x306   : > { %v607_v6 = vmul.f32 %v591_v30, %v4735_v51 }
 0x307   : > { %v643_v31 = vsub.f32 1.5, %v642_v39 }
 0x308   : > { %v4253_v43 = vpop.eup %4252  ;;  %v615_v44 = vadd.f32 1e-05, %v607_v6 }
 0x309   : > { %v650_v45 = vmul.f32 %v4253_v43, %v614_v2  ;;  %v644_v10 = vmul.f32 %v4251_v29, %v643_v31  ;;  %v4866_v46 = vpop.eup %4254  ;;  %vm656_vm5 = vweird.f32 %v4253_v43 }
 0x30a   : > { %4256 = vrsqrt.f32 %v615_v44  ;;  %v630_v12 = vmul.f32 %v4866_v46, %v4859_v37  ;;  %vm657_vm7 = vmor %vm655_vm6, %vm656_vm5  ;;  %vm665_vm9 = vweird.f32 %v615_v44  ;;  %vm636_vm11 = vweird.f32 %v4866_v46 }
 0x30b   : > { %v651_v50 = vmul.f32 %v4253_v43, %v650_v45  ;;  %v648_v11 = vsel %vm647_vm4, %v4251_v29, %v644_v10  ;;  %vm637_vm14 = vmor %vm635_vm12, %vm636_vm11  ;;  %v312_v10 = vld [vmem:[%s7505_s1 + $0x8] sm:$0xff] }
 0x30c   : > { %v701_v52 = vmul.f32 %v648_v11, %v313_v13  ;;  %v631_v19 = vmul.f32 %v4866_v46, %v630_v12 }
 0x30d   : > { %v652_v53 = vmul.f32 0.5, %v651_v50  ;;  %v594_v21 = vpop.f32.mrf.mxu1  ;;  %v316_v50 = vld [vmem:[%s7505_s1 + $0x28] sm:$0xff] }
 0x30e   : > { %v608_v55 = vmul.f32 %v594_v21, %v4735_v51  ;;  %719 = vperm.xlu2 %4222, %v701_v52   ;;  %v632_v5 = vmul.f32 0.5, %v631_v19  ;;  %v317_v19 = vld [vmem:[%s7505_s1 + $0x30] sm:$0xff] }
 0x30f   : > { %v653_v57 = vsub.f32 1.5, %v652_v53 }
 0x310   : > { %v4257_v58 = vpop.eup %4256  ;;  %v616_v18 = vadd.f32 1e-05, %v608_v55  ;;  %v633_v34 = vsub.f32 1.5, %v632_v5 }
 0x311   : > { %v660_v59 = vmul.f32 %v4257_v58, %v615_v44  ;;  %v654_v61 = vmul.f32 %v4253_v43, %v653_v57  ;;  %vm666_vm8 = vweird.f32 %v4257_v58 }
 0x312   : > { %4258 = vrsqrt.f32 %v616_v18  ;;  %vm667_vm10 = vmor %vm665_vm9, %vm666_vm8  ;;  %v634_v30 = vmul.f32 %v4866_v46, %v633_v34  ;;  %vm675_vm15 = vweird.f32 %v616_v18  ;;  %vm625_vm8 = vweird.f32 %v4872_v56 }
 0x313   : > { %4260 = vrsqrt.f32 %v4872_v56  ;;  %v661_v62 = vmul.f32 %v4257_v58, %v660_v59  ;;  %v658_v63 = vsel %vm657_vm7, %v4253_v43, %v654_v61 }
 0x314   : > { %v702_v3 = vmul.f32 %v658_v63, %v314_v60  ;;  %v638_v47 = vsel %vm637_vm14, %v4866_v46, %v634_v30  ;;  %v343_v30 = vld [vmem:[%s7508_s4] sm:$0x3] }
 0x315   : > { %v662_v16 = vmul.f32 0.5, %v661_v62  ;;  %v597_v17 = vpop.f32.mrf.mxu1  ;;  %v700_v12 = vmul.f32 %v638_v47, %v312_v10  ;;  %1007 = vst [vmem:[#allocation1] ss:$9 sm:$0xff] %v343_v30  ;;  %v344_v47 = vld [vmem:[%s7508_s4 + $0x4] sm:$0x3] }
 0x316   : > { %v609_v22 = vmul.f32 %v597_v17, %v4735_v51  ;;  %724 = vperm.xlu1 %4221, %v702_v3  }
 0x317   : > { %v663_v23 = vsub.f32 1.5, %v662_v16  ;;  %v311_v16 = vld [vmem:[%s7505_s1] sm:$0xff] }
 0x318   : > { %v4259_v32 = vpop.eup %4258  ;;  %v617_v33 = vadd.f32 1e-05, %v609_v22  ;;  %v318_v22 = vld [vmem:[%s7505_s1 + $0x38] sm:$0xff] }
 0x319   : > { %v4880_v24 = vpop.eup %4260  ;;  %v670_v27 = vmul.f32 %v4259_v32, %v616_v18  ;;  %v664_v28 = vmul.f32 %v4257_v58, %v663_v23  ;;  %vm676_vm13 = vweird.f32 %v4259_v32 }
 0x31a   : > { %4262 = vrsqrt.f32 %v617_v33  ;;  %v620_v2 = vmul.f32 %v4880_v24, %v4872_v56  ;;  %vm677_vm1 = vmor %vm675_vm15, %vm676_vm13  ;;  %vm685_vm3 = vweird.f32 %v617_v33  ;;  %vm626_vm5 = vweird.f32 %v4880_v24  ;;  %v320_v56 = vld [vmem:[%s7506_s2 + $0x8] sm:$0xff] }
 0x31b   : > { %v671_v36 = vmul.f32 %v4259_v32, %v670_v27  ;;  %v668_v29 = vsel %vm667_vm10, %v4257_v58, %v664_v28  ;;  %vm627_vm9 = vmor %vm625_vm8, %vm626_vm5  ;;  %v322_v27 = vld [vmem:[%s7506_s2 + $0x18] sm:$0xff] }
 0x31c   : > { %v703_v38 = vmul.f32 %v668_v29, %v315_v35  ;;  %v621_v44 = vmul.f32 %v4880_v24, %v620_v2  ;;  %v4921_v35 = vpop.permute.xlu0 %795 }
 0x31d   : > { %v672_v4 = vmul.f32 0.5, %v671_v36  ;;  %v600_v39 = vpop.f32.mrf.mxu1  ;;  %7692 = vst [vmem:[#allocation10_spill] sm:$0xff] %v4921_v35 }
 0x31e   : > { %v610_v6 = vmul.f32 %v600_v39, %v4735_v51  ;;  %729 = vperm.xlu0 %4220, %v703_v38   ;;  %v622_v21 = vmul.f32 0.5, %v621_v44  ;;  %v4926_v38 = vpop.permute.xlu1 %800 }
 0x31f   : > { %v673_v31 = vsub.f32 1.5, %v672_v4  ;;  %7694 = vst [vmem:[#allocation12_spill] sm:$0xff] %v4926_v38 }
 0x320   : > { %v4263_v43 = vpop.eup %4262  ;;  %v618_v45 = vadd.f32 1e-05, %v610_v6  ;;  %v623_v18 = vsub.f32 1.5, %v622_v21 }
 0x321   : > { %v680_v13 = vmul.f32 %v4263_v43, %v617_v33  ;;  %v674_v37 = vmul.f32 %v4259_v32, %v673_v31  ;;  %vm686_vm2 = vweird.f32 %v4263_v43 }
 0x322   : > { %4264 = vrsqrt.f32 %v618_v45  ;;  %vm687_vm4 = vmor %vm685_vm3, %vm686_vm2  ;;  %vm695_vm6 = vweird.f32 %v618_v45  ;;  %v624_v3 = vmul.f32 %v4880_v24, %v623_v18 }
 0x323   : > { %v681_v11 = vmul.f32 %v4263_v43, %v680_v13  ;;  %v678_v52 = vsel %vm677_vm1, %v4259_v32, %v674_v37 }
 0x324   : > { %v704_v53 = vmul.f32 %v678_v52, %v316_v50  ;;  %v628_v17 = vsel %vm627_vm9, %v4880_v24, %v624_v3  ;;  %v319_v24 = vld [vmem:[%s7506_s2] sm:$0xff]  ;;  %v4923_v36 = vpop.permute.xlu0 %790  ;;  %v4957_v50 = vld [vmem:[#allocation1 + $0x9] sm:$0xff] }
 0x325   : > { %v682_v55 = vmul.f32 0.5, %v681_v11  ;;  %v699_v33 = vmul.f32 %v628_v17, %v311_v16  ;;  %7693 = vst [vmem:[#allocation11_spill] sm:$0xff] %v4923_v36 }
 0x326   : > { %714 = vperm.xlu0 %4220, %v700_v12   ;;  %734 = vperm.xlu2 %4222, %v704_v53   ;;  %v4950_v10 = vpop.permute.xlu1 %785 }
 0x327   : > { %v683_v57 = vsub.f32 1.5, %v682_v55  ;;  %7696 = vst [vmem:[#allocation14_spill] sm:$0xff] %v4950_v10 }
 0x328   : > { %v4265_v58 = vpop.eup %4264 }
 0x329   : > { %v690_v46 = vmul.f32 %v4265_v58, %v618_v45  ;;  %v684_v59 = vmul.f32 %v4263_v43, %v683_v57  ;;  %vm696_vm7 = vweird.f32 %v4265_v58 }
 0x32a   : > { %vm697_vm10 = vmor %vm695_vm6, %vm696_vm7 }
 0x32b   : > { %v691_v60 = vmul.f32 %v4265_v58, %v690_v46  ;;  %v688_v61 = vsel %vm687_vm4, %v4263_v43, %v684_v59 }
 0x32c   : > { %v705_v62 = vmul.f32 %v688_v61, %v317_v19 }
 0x32d   : > { %v692_v63 = vmul.f32 0.5, %v691_v60 }
 0x32e   : > { %739 = vperm.xlu1 %4221, %v705_v62  }
 0x32f   : > { %v693_v5 = vsub.f32 1.5, %v692_v63 }
 0x331   : > { %v694_v23 = vmul.f32 %v4265_v58, %v693_v5 }
 0x333   : > { %v698_v32 = vsel %vm697_vm10, %v4265_v58, %v694_v23 }
 0x334   : > { %v706_v34 = vmul.f32 %v698_v32, %v318_v22 }
 0x336   : > { %709 = vperm.xlu1 %4221, %v699_v33   ;;  %744 = vperm.xlu2 %4222, %v706_v34  }
 0x33e   : > { %770 = vperm.xlu1 %4221, %v320_v56   ;;  %780 = vperm.xlu2 %4222, %v322_v27  }
 0x346   : > { %765 = vperm.xlu2 %4222, %v319_v24  }
 0x368   : > { %v720_v28 = vpop.permute.xlu2 %719 }
 0x369   : > { %v751_v6 = vmul.f32 %v720_v28, %v4776_v7  ;;  %v752_v43 = vmul.f32 %v720_v28, %v4779_v40  ;;  %v4955_v40 = vld [vmem:[#allocation1] sm:$0xff] }
 0x36a   : > { %1059 = vst [vmem:[#allocation1] ss:$9 sm:$0xff] %v344_v47 }
 0x380   : > { %v735_v29 = vpop.permute.xlu2 %734 }
 0x381   : > { %v757_v2 = vmul.f32 %v735_v29, %v4756_v25  ;;  %v758_v4 = vmul.f32 %v735_v29, %v4759_v26  ;;  %v4940_v25 = vpop.permute.xlu0 %775 }
 0x382   : > { %7695 = vst [vmem:[#allocation13_spill] sm:$0xff] %v4940_v25  ;;  %v4944_v26 = vadd.f32 %v4940_v25, %v751_v6  ;;  %v4948_v13 = vadd.f32 %v4940_v25, %v752_v43 }
 0x383   : > { %v4930_v39 = vadd.f32 %v4923_v36, %v757_v2  ;;  %v4937_v31 = vadd.f32 %v4923_v36, %v758_v4 }
 0x384   : > { %v839_v37 = vmin.f32 %v4944_v26, 0.0  ;;  %v840_v52 = vmin.f32 %v4948_v13, 0.0  ;;  %vm823_vm15 = vcmp.gt.f32.partialorder %v4944_v26, 0.0  ;;  %vm824_vm1 = vcmp.gt.f32.partialorder %v4948_v13, 0.0 }
 0x385   : > { %v845_v44 = vmin.f32 %v4930_v39, 0.0  ;;  %v846_v45 = vmin.f32 %v4937_v31, 0.0  ;;  %vm829_vm11 = vcmp.gt.f32.partialorder %v4930_v39, 0.0  ;;  %vm830_vm12 = vcmp.gt.f32.partialorder %v4937_v31, 0.0 }
 0x386   : > { %v859_v58 = vmul.f32 1.442695, %v839_v37  ;;  %v861_v46 = vmul.f32 1.442695, %v840_v52 }
 0x387   : > { %v871_v7 = vmul.f32 1.442695, %v845_v44  ;;  %v873_v11 = vmul.f32 1.442695, %v846_v45 }
 0x388   : > { %v725_v60 = vpop.permute.xlu1 %724 }
 0x389   : > { %4266 = vpow2.f32 %v871_v7  ;;  %v754_v16 = vmul.f32 %v725_v60, %v4765_v1 }
 0x38a   : > { %4268 = vpow2.f32 %v873_v11 }
 0x38b   : > { %4270 = vpow2.f32 %v859_v58 }
 0x38c   : > { %4272 = vpow2.f32 %v861_v46 }
 0x390   : > { %v730_v12 = vpop.permute.xlu0 %729  ;;  %v745_v53 = vpop.permute.xlu2 %744 }
 0x391   : > { %v755_v21 = vmul.f32 %v730_v12, %v4796_v14  ;;  %v756_v55 = vmul.f32 %v730_v12, %v4799_v9  ;;  %v761_v57 = vmul.f32 %v745_v53, %v4746_v8  ;;  %v762_v18 = vmul.f32 %v745_v53, %v4749_v15  ;;  %v4267_v8 = vpop.eup %4266 }
 0x392   : > { %v753_v9 = vmul.f32 %v725_v60, %v4762_v0  ;;  %v4269_v5 = vpop.eup %4268  ;;  %v4025_v0 = vadd.f32 -1.0, %v4267_v8  ;;  %v1061_v8 = vld [vmem:[#allocation1 + $0x9] sm:$0xff] }
 0x393   : > { %v811_v19 = vadd.f32 %v4950_v10, %v755_v21  ;;  %v812_v59 = vadd.f32 %v4950_v10, %v756_v55  ;;  %v4968_v63 = vadd.f32 %v4926_v38, %v761_v57  ;;  %v4971_v14 = vadd.f32 %v4926_v38, %v762_v18  ;;  %v4271_v27 = vpop.eup %4270  ;;  %v1060_v57 = vld [vmem:[#allocation1] sm:$0xff] }
 0x394   : > { %v4026_v34 = vadd.f32 -1.0, %v4269_v5  ;;  %v4273_v24 = vpop.eup %4272  ;;  %v4019_v6 = vadd.f32 -1.0, %v4271_v27  ;;  %v909_v43 = vsel %vm829_vm11, %v4930_v39, %v4025_v0 }
 0x395   : > { %v843_v61 = vmin.f32 %v811_v19, 0.0  ;;  %v844_v62 = vmin.f32 %v812_v59, 0.0  ;;  %v849_v22 = vmin.f32 %v4968_v63, 0.0  ;;  %v850_v32 = vmin.f32 %v4971_v14, 0.0 }
 0x396   : > { %v910_v44 = vsel %vm830_vm12, %v4937_v31, %v4026_v34  ;;  %v4020_v7 = vadd.f32 -1.0, %v4273_v24  ;;  %vm827_vm13 = vcmp.gt.f32.partialorder %v811_v19, 0.0  ;;  %vm828_vm14 = vcmp.gt.f32.partialorder %v812_v59, 0.0 }
 0x397   : > { %v867_v15 = vmul.f32 1.442695, %v843_v61  ;;  %v869_v3 = vmul.f32 1.442695, %v844_v62  ;;  %v879_v28 = vmul.f32 1.442695, %v849_v22  ;;  %v4993_v21 = vpack.c.bf16 %v910_v44, %v909_v43 }
 0x398   : > { %v4975_v17 = vpop.permute.xlu2 %780  ;;  %v881_v2 = vmul.f32 1.442695, %v850_v32  ;;  %v903_v46 = vsel %vm823_vm15, %v4944_v26, %v4019_v6  ;;  %vm833_vm4 = vcmp.gt.f32.partialorder %v4968_v63, 0.0  ;;  %vm834_vm5 = vcmp.gt.f32.partialorder %v4971_v14, 0.0 }
 0x399   : > { %7697 = vst [vmem:[#allocation15_spill] sm:$0xff] %v4975_v17  ;;  %4274 = vpow2.f32 %v867_v15  ;;  %v4979_v23 = vadd.f32 %v4975_v17, %v753_v9  ;;  %v4983_v33 = vadd.f32 %v4975_v17, %v754_v16  ;;  %v1062_v9 = vpack.i.b16 %v1060_v57, %v1060_v57 }
 0x39a   : > { %4276 = vpow2.f32 %v869_v3  ;;  %vm971_vm12 = vcmask 138240   ;;  %vm1399_vm15 = vcmask 1039360  }
 0x39b   : > { %v841_v56 = vmin.f32 %v4979_v23, 0.0  ;;  %v842_v1 = vmin.f32 %v4983_v33, 0.0  ;;  %vm825_vm2 = vcmp.gt.f32.partialorder %v4979_v23, 0.0  ;;  %vm826_vm3 = vcmp.gt.f32.partialorder %v4983_v33, 0.0 }
 0x39d   : > { %v863_v29 = vmul.f32 1.442695, %v841_v56  ;;  %v865_v4 = vmul.f32 1.442695, %v842_v1  ;;  %v715_v1 = vpop.permute.xlu0 %714 }
 0x39e   : > { %v749_v6 = vmul.f32 %v715_v1, %v4816_v54 }
 0x39f   : > { %v4275_v30 = vpop.eup %4274  ;;  %4278 = vpow2.f32 %v863_v29  ;;  %v1064_v29 = vperm.slane %v1062_v9, 0 }
 0x3a0   : > { %v4277_v45 = vpop.eup %4276  ;;  %v4023_v47 = vadd.f32 -1.0, %v4275_v30  ;;  %4280 = vpow2.f32 %v865_v4  ;;  %v740_v37 = vpop.permute.xlu1 %739 }
 0x3a1   : > { %v4024_v11 = vadd.f32 -1.0, %v4277_v45  ;;  %4282 = vpow2.f32 %v879_v28  ;;  %v759_v52 = vmul.f32 %v740_v37, %v4782_v41  ;;  %v760_v12 = vmul.f32 %v740_v37, %v4785_v42  ;;  %v5019_v24 = vpop.permute.xlu2 %765 }
 0x3a2   : > { %4284 = vpow2.f32 %v881_v2  ;;  %v907_v53 = vsel %vm827_vm13, %v811_v19, %v4023_v47  ;;  %v904_v19 = vsel %vm824_vm1, %v4948_v13, %v4020_v7  ;;  %7698 = vst [vmem:[#allocation16_spill] sm:$0xff] %v5019_v24  ;;  %v750_v45 = vmul.f32 %v715_v1, %v4819_v20 }
 0x3a3   : > { %v4996_v39 = vadd.f32 %v4921_v35, %v759_v52  ;;  %v4999_v31 = vadd.f32 %v4921_v35, %v760_v12  ;;  %v908_v55 = vsel %vm828_vm14, %v812_v59, %v4024_v11  ;;  %v941_v59 = vunpack.c.l.b16 %v4993_v21 }
 0x3a4   : > { %v5003_v41 = vpack.c.bf16 %v908_v55, %v907_v53  ;;  %v5014_v13 = vpack.c.bf16 %v904_v19, %v903_v46  ;;  %v1013_v7 = vpack.i.b16 %v4957_v50, %v4957_v50  ;;  %v1076_v37 = vunpack.c.l.bf16 %v1064_v29 }
 0x3a5   : > { %v4279_v42 = vpop.eup %4278  ;;  %v847_v58 = vmin.f32 %v4996_v39, 0.0  ;;  %v848_v18 = vmin.f32 %v4999_v31, 0.0  ;;  %vm831_vm6 = vcmp.gt.f32.partialorder %v4996_v39, 0.0  ;;  %v1010_v20 = vpack.i.b16 %v4955_v40, %v4955_v40 }
 0x3a6   : > { %v4281_v60 = vpop.eup %4280  ;;  %v939_v61 = vunpack.c.l.b16 %v5003_v41  ;;  %v4021_v62 = vadd.f32 -1.0, %v4279_v42  ;;  %vm832_vm7 = vcmp.gt.f32.partialorder %v4999_v31, 0.0  ;;  %v1015_v9 = vperm.slane %v1013_v7, 0 }
 0x3a7   : > { %v4283_v15 = vpop.eup %4282  ;;  %v875_v3 = vmul.f32 1.442695, %v847_v58  ;;  %v877_v5 = vmul.f32 1.442695, %v848_v18  ;;  %v4022_v16 = vadd.f32 -1.0, %v4281_v60  ;;  %v940_v29 = vunpack.c.h.b16 %v5003_v41 }
 0x3a8   : > { %v4285_v22 = vpop.eup %4284  ;;  %v710_v32 = vpop.permute.xlu1 %709  ;;  %v951_v0 = vpack.c.b16 %v941_v59, %v939_v61  ;;  %v905_v26 = vsel %vm825_vm2, %v4979_v23, %v4021_v62  ;;  %v1065_v23 = vpack.i.b16 %v1061_v8, %v1061_v8  ;;  %v4029_v2 = vadd.f32 -1.0, %v4283_v15 }
 0x3a9   : > { %4286 = vpow2.f32 %v875_v3  ;;  %v747_v34 = vmul.f32 %v710_v32, %v4802_v48  ;;  %v748_v56 = vmul.f32 %v710_v32, %v4805_v49  ;;  %v906_v27 = vsel %vm826_vm3, %v4983_v33, %v4022_v16 }
 0x3aa   : > { %4288 = vpow2.f32 %v877_v5  ;;  %963 = vrot.lane.b32.xlu1 %v951_v0, %s4464_s12  ;;  %v5022_v28 = vpack.c.bf16 %v906_v27, %v905_v26  ;;  %v4030_v4 = vadd.f32 -1.0, %v4285_v22  ;;  %v936_v49 = vunpack.c.h.b16 %v5014_v13 }
 0x3ab   : > { %v5025_v30 = vadd.f32 %v5019_v24, %v747_v34  ;;  %v5028_v48 = vadd.f32 %v5019_v24, %v748_v56  ;;  %v1067_v47 = vperm.slane %v1065_v23, 0  ;;  %v913_v53 = vsel %vm833_vm4, %v4968_v63, %v4029_v2 }
 0x3ac   : > { %v938_v33 = vunpack.c.h.b16 %v5022_v28  ;;  %v914_v55 = vsel %vm834_vm5, %v4971_v14, %v4030_v4  ;;  %v1012_v15 = vperm.slane %v1010_v20, 0  ;;  %v937_v23 = vunpack.c.l.b16 %v5022_v28 }
 0x3ad   : > { %v835_v43 = vmin.f32 %v5025_v30, 0.0  ;;  %v836_v44 = vmin.f32 %v5028_v48, 0.0  ;;  %v922_v14 = vpack.c.bf16 %v914_v55, %v913_v53  ;;  %v1077_v59 = vunpack.c.l.bf16 %v1067_v47 }
 0x3ae   : > { %v950_v58 = vpack.c.b16 %v938_v33, %v936_v49  ;;  %v5059_v56 = vunpack.c.l.bf16 %v1012_v15  ;;  %v942_v4 = vunpack.c.h.b16 %v4993_v21  ;;  %v935_v49 = vunpack.c.l.b16 %v5014_v13 }
 0x3af   : > { %v4287_v11 = vpop.eup %4286  ;;  %v851_v52 = vmul.f32 1.442695, %v835_v43  ;;  %v853_v12 = vmul.f32 1.442695, %v836_v44  ;;  %v946_v5 = vunpack.c.h.b16 %v922_v14  ;;  %v945_v22 = vunpack.c.l.b16 %v922_v14 }
 0x3b0   : > { %v4289_v57 = vpop.eup %4288  ;;  %v4027_v54 = vadd.f32 -1.0, %v4287_v11  ;;  %v5043_v42 = vpop.permute.xlu1 %770  ;;  %v5053_v0 = vpack.i.bf16 %v1077_v59, %v1076_v37  ;;  %7702 = vst [vmem:[#allocation20_spill] sm:$0xff] %v5059_v56  ;;  %vm819_vm8 = vcmp.gt.f32.partialorder %v5025_v30, 0.0  ;;  %vm820_vm9 = vcmp.gt.f32.partialorder %v5028_v48, 0.0 }
 0x3b1   : > { %7699 = vst [vmem:[#allocation17_spill] sm:$0xff] %v5043_v42  ;;  %v4028_v50 = vadd.f32 -1.0, %v4289_v57  ;;  %4290 = vpow2.f32 %v851_v52  ;;  %v805_v18 = vadd.f32 %v5043_v42, %v749_v6  ;;  %v806_v46 = vadd.f32 %v5043_v42, %v750_v45 }
 0x3b2   : > { %4292 = vpow2.f32 %v853_v12  ;;  %961 = vrot.lane.b32.xlu1 %v950_v58, %s4464_s12  ;;  %v911_v63 = vsel %vm831_vm6, %v4996_v39, %v4027_v54  ;;  %7700 = vst [vmem:[#allocation18_spill] sm:$0xff] %v5053_v0  ;;  %v952_v45 = vpack.c.b16 %v942_v4, %v940_v29  ;;  %v949_v21 = vpack.c.b16 %v937_v23, %v935_v49 }
 0x3b3   : > { %v837_v19 = vmin.f32 %v805_v18, 0.0  ;;  %v838_v60 = vmin.f32 %v806_v46, 0.0  ;;  %v912_v61 = vsel %vm832_vm7, %v4999_v31, %v4028_v50  ;;  %v5057_v31 = vunpack.c.l.bf16 %v1015_v9 }
 0x3b4   : > { %v921_v40 = vpack.c.bf16 %v912_v61, %v911_v63  ;;  %vm821_vm10 = vcmp.gt.f32.partialorder %v805_v18, 0.0  ;;  %vm822_vm11 = vcmp.gt.f32.partialorder %v806_v46, 0.0  ;;  %vm1184_vm13 = vcmask 146432  }
 0x3b5   : > { %v855_v62 = vmul.f32 1.442695, %v837_v19  ;;  %v857_v8 = vmul.f32 1.442695, %v838_v60  ;;  %7701 = vst [vmem:[#allocation19_spill] sm:$0xff] %v5057_v31  ;;  %v5070_v6 = vpack.i.bf16 %v5057_v31, %v5059_v56  ;;  %vm1135_vm14 = vcmask 130048  }
 0x3b6   : > { %v944_v3 = vunpack.c.h.b16 %v921_v40  ;;  %v943_v16 = vunpack.c.l.b16 %v921_v40  ;;  %vm1084_vm1 = vcmask 15360   ;;  %vm1719_vm2 = vcmask 900096  }
 0x3b7   : > { %v4291_v32 = vpop.eup %4290  ;;  %4294 = vpow2.f32 %v855_v62  ;;  %7703 = vst [vmem:[#allocation21_spill] sm:$0xff] %v5070_v6  ;;  %vm1626_vm3 = vcmask 908288   ;;  %vm1585_vm4 = vcmask 916480   ;;  %vm1492_vm5 = vcmask 1031168  }
 0x3b8   : > { %v4293_v39 = vpop.eup %4292  ;;  %4296 = vpow2.f32 %v857_v8  ;;  %v954_v26 = vpack.c.b16 %v946_v5, %v944_v3  ;;  %v953_v34 = vpack.c.b16 %v945_v22, %v943_v16  ;;  %v4015_v27 = vadd.f32 -1.0, %v4291_v32 }
 0x3b9   : > { %v4016_v1 = vadd.f32 -1.0, %v4293_v39  ;;  %vm1233_vm6 = vcmask 261120   ;;  %vm1853_vm7 = vcmask 777216  }
 0x3ba   : > { %969 = vrot.lane.b32.xlu2 %v954_v26, %s4464_s12  ;;  %967 = vrot.lane.b32.xlu0 %v953_v34, %s4464_s12  ;;  %v899_v41 = vsel %vm819_vm8, %v5025_v30, %v4015_v27  ;;  %vm1812_vm8 = vcmask 785408  }
 0x3bb   : > { %4224 = vrot.lane.b32.xlu1 %v5053_v0, %s4465_s21  ;;  %v900_v28 = vsel %vm820_vm9, %v5028_v48, %v4016_v1  ;;  %vm1282_vm9 = vcmask 277504  }
 0x3bc   : > { %v915_v47 = vpack.c.bf16 %v900_v28, %v899_v41 }
 0x3bd   : > { %v4295_v2 = vpop.eup %4294 }
 0x3be   : > { %v4297_v33 = vpop.eup %4296  ;;  %v4017_v43 = vadd.f32 -1.0, %v4295_v2  ;;  %v932_v30 = vunpack.c.h.b16 %v915_v47  ;;  %v931_v12 = vunpack.c.l.b16 %v915_v47 }
 0x3bf   : > { %v4018_v44 = vadd.f32 -1.0, %v4297_v33 }
 0x3c0   : > { %v901_v13 = vsel %vm821_vm10, %v805_v18, %v4017_v43 }
 0x3c1   : > { %v902_v7 = vsel %vm822_vm11, %v806_v46, %v4018_v44 }
 0x3c2   : > { %965 = vrot.lane.b32.xlu0 %v952_v45, %s4464_s12  ;;  %959 = vrot.lane.b32.xlu2 %v949_v21, %s4464_s12  ;;  %v916_v37 = vpack.c.bf16 %v902_v7, %v901_v13 }
 0x3c3   : > { %4229 = vrot.lane.b32.xlu1 %v5070_v6, %s7646_s23  ;;  %s3998_s23 = sshll.u32 %s4605_s22, 7 }
 0x3c4   : > { %v934_v11 = vunpack.c.h.b16 %v916_v37  ;;  %v933_v52 = vunpack.c.l.b16 %v916_v37 }
 0x3c6   : > { %v948_v48 = vpack.c.b16 %v934_v11, %v932_v30  ;;  %v947_v53 = vpack.c.b16 %v933_v52, %v931_v12 }
 0x3ca   : > { %957 = vrot.lane.b32.xlu2 %v948_v48, %s4464_s12  ;;  %955 = vrot.lane.b32.xlu0 %v947_v53, %s4464_s12 }
 0x414   : > { %v5080_v55 = vpop.permute.xlu2 %969 }
 0x41c   : > { %v964_v57 = vpop.permute.xlu1 %963  ;;  %v960_v54 = vpop.permute.xlu2 %959 }
 0x41d   : > { %v5091_v50 = vsel %vm971_vm12, 0, %v960_v54  ;;  %v5094_v46 = vsel %vm971_vm12, 0, %v964_v57 }
 0x41e   : > { %7704 = vst [vmem:[#allocation22_spill] sm:$0xff] %v5094_v46  ;;  %v5099_v14 = vunpack.c.l.bf16 %v5091_v50  ;;  %v5102_v19 = vunpack.c.h.bf16 %v5091_v50 }
 0x420   : > { %7705 = vst [vmem:[#allocation23_spill] sm:$0xff] %v5099_v14 }
 0x421   : > { %7706 = vst [vmem:[#allocation24_spill] sm:$0xff] %v5102_v19 }
 0x424   : > { %v5082_v58 = vpop.permute.xlu1 %961  ;;  %v5154_v4 = vpop.permute.xlu2 %957 }
 0x425   : > { %v5086_v20 = vsel %vm971_vm12, %v960_v54, %v5082_v58  ;;  %7716 = vst [vmem:[#allocation34_spill] sm:$0xff] %v5154_v4 }
 0x426   : > { %1383 = vrot.lane.b32.xlu1 %v5086_v20, %s4467_s29  ;;  %v5109_v59 = vunpack.c.l.bf16 %v5086_v20  ;;  %v5112_v40 = vunpack.c.h.bf16 %v5086_v20 }
 0x428   : > { %7709 = vst [vmem:[#allocation27_spill] sm:$0xff] %v5109_v59 }
 0x429   : > { %7710 = vst [vmem:[#allocation28_spill] sm:$0xff] %v5112_v40 }
 0x42c   : > { %v968_v18 = vpop.permute.xlu0 %967 }
 0x42d   : > { %v4225_v63 = vpop.permute.xlu1 %4224  ;;  %v5136_v26 = vsel %vm971_vm12, %v968_v18, %v5080_v55  ;;  %v5139_v34 = vsel %vm971_vm12, 0, %v968_v18 }
 0x42e   : > { %1387 = vrot.lane.b32.xlu1 %v5094_v46, %s4467_s29  ;;  %v5104_v60 = vunpack.i.h.bf16 %v4225_v63  ;;  %v5106_v61 = vunpack.i.l.bf16 %v4225_v63  ;;  %v5142_v1 = vunpack.c.l.bf16 %v5139_v34  ;;  %v5145_v29 = vunpack.c.l.bf16 %v5136_v26 }
 0x42f   : > { %v5148_v23 = vunpack.c.h.bf16 %v5139_v34  ;;  %v5151_v2 = vunpack.c.h.bf16 %v5136_v26 }
 0x430   : > { %7707 = vst [vmem:[#allocation25_spill] sm:$0xff] %v5104_v60  ;;  %v5116_v62 = vsel %vm1184_vm13, %v5106_v61, %v5104_v60  ;;  %v1195_v8 = vmul.f32 %v5106_v61, %v5099_v14  ;;  %v1198_v9 = vmul.f32 %v5106_v61, %v5102_v19  ;;  %v1207_v13 = vmul.f32 %v5106_v61, %v5142_v1 }
 0x431   : > { %7708 = vst [vmem:[#allocation26_spill] sm:$0xff] %v5106_v61  ;;  %v1196_v15 = vmul.f32 %v5116_v62, %v5109_v59  ;;  %v1199_v3 = vmul.f32 %v5116_v62, %v5112_v40  ;;  %v1208_v7 = vmul.f32 %v5116_v62, %v5145_v29  ;;  %v1210_v47 = vmul.f32 %v5106_v61, %v5148_v23 }
 0x432   : > { %7711 = vst [vmem:[#allocation29_spill] sm:$0xff] %v5116_v62  ;;  %v1211_v37 = vmul.f32 %v5116_v62, %v5151_v2 }
 0x433   : > { %v5128_v16 = vpack.c.bf16 %v1196_v15, %v1195_v8  ;;  %v5130_v22 = vpack.c.bf16 %v1199_v3, %v1198_v9  ;;  %7712 = vst [vmem:[#allocation30_spill] sm:$0xff] %v5142_v1  ;;  %v5209_v63 = vpack.c.bf16 %v1208_v7, %v1207_v13  ;;  %v5216_v3 = vunpack.c.l.bf16 %v5094_v46 }
 0x434   : > { %v5126_v5 = vpop.permute.xlu0 %965  ;;  %7713 = vst [vmem:[#allocation31_spill] sm:$0xff] %v5145_v29  ;;  %v5211_v8 = vpack.c.bf16 %v1211_v37, %v1210_v47 }
 0x435   : > { %v1665_v32 = vunpack.c.l.b16 %v5128_v16  ;;  %v1668_v39 = vunpack.c.l.b16 %v5130_v22  ;;  %7714 = vst [vmem:[#allocation32_spill] sm:$0xff] %v5148_v23  ;;  %v5158_v33 = vsel %vm971_vm12, %v964_v57, %v5126_v5  ;;  %v4230_v57 = vpop.permute.xlu1 %4229  ;;  %v1678_v47 = vunpack.c.h.b16 %v5209_v63 }
 0x436   : > { %7715 = vst [vmem:[#allocation33_spill] sm:$0xff] %v5151_v2  ;;  %v5200_v48 = vunpack.c.l.bf16 %v5158_v33  ;;  %v5203_v53 = vunpack.c.h.bf16 %v5158_v33  ;;  %v1681_v37 = vunpack.c.h.b16 %v5211_v8 }
 0x437   : > { %v1686_v27 = vpack.c.b16 %v1668_v39, %v1665_v32  ;;  %7725 = vst [vmem:[#allocation43_spill] sm:$0xff] %v5216_v3  ;;  %v5218_v32 = vunpack.i.h.bf16 %v4230_v57  ;;  %v5220_v39 = vunpack.i.l.bf16 %v4230_v57 }
 0x438   : > { %7723 = vst [vmem:[#allocation41_spill] sm:$0xff] %v5200_v48  ;;  %v1205_v7 = vmul.f32 %v5116_v62, %v5203_v53 }
 0x439   : > { %1701 = vrot.lane.b32.xlu1 %v1686_v27, %s4468_s8  ;;  %7724 = vst [vmem:[#allocation42_spill] sm:$0xff] %v5203_v53  ;;  %v1202_v27 = vmul.f32 %v5116_v62, %v5200_v48  ;;  %v1152_v38 = vmul.f32 %v5220_v39, %v5216_v3  ;;  %v1158_v17 = vmul.f32 %v5220_v39, %v5142_v1 }
 0x43a   : > { %7726 = vst [vmem:[#allocation44_spill] sm:$0xff] %v5218_v32  ;;  %v1161_v6 = vmul.f32 %v5220_v39, %v5148_v23 }
 0x43b   : > { %7727 = vst [vmem:[#allocation45_spill] sm:$0xff] %v5220_v39 }
 0x43c   : > { %v956_v49 = vpop.permute.xlu0 %955 }
 0x43d   : > { %v5162_v43 = vsel %vm971_vm12, %v956_v49, %v5154_v4  ;;  %v5165_v44 = vsel %vm971_vm12, 0, %v956_v49  ;;  %v5225_v49 = vunpack.c.h.bf16 %v5094_v46 }
 0x43e   : > { %7717 = vst [vmem:[#allocation35_spill] sm:$0xff] %v5162_v43  ;;  %v5168_v41 = vunpack.c.l.bf16 %v5165_v44  ;;  %v5171_v28 = vunpack.c.l.bf16 %v5162_v43  ;;  %v5174_v45 = vunpack.c.h.bf16 %v5165_v44  ;;  %v5177_v21 = vunpack.c.h.bf16 %v5162_v43  ;;  %1375 = vrot.lane.b32.xlu0 %v5165_v44, %s4467_s29  ;;  %1377 = vrot.lane.b32.xlu2 %v5162_v43, %s4467_s29 }
 0x43f   : > { %7718 = vst [vmem:[#allocation36_spill] sm:$0xff] %v5165_v44  ;;  %v1155_v25 = vmul.f32 %v5220_v39, %v5225_v49  ;;  %v1041_v43 = vmul.f32 %v5057_v31, %v5112_v40 }
 0x440   : > { %7719 = vst [vmem:[#allocation37_spill] sm:$0xff] %v5168_v41  ;;  %v1189_v11 = vmul.f32 %v5106_v61, %v5168_v41  ;;  %v1190_v52 = vmul.f32 %v5116_v62, %v5171_v28  ;;  %v1192_v30 = vmul.f32 %v5106_v61, %v5174_v45  ;;  %v1193_v12 = vmul.f32 %v5116_v62, %v5177_v21 }
 0x441   : > { %7720 = vst [vmem:[#allocation38_spill] sm:$0xff] %v5171_v28  ;;  %v1046_v62 = vmul.f32 %v5059_v56, %v5142_v1  ;;  %v1143_v51 = vmul.f32 %v5220_v39, %v5174_v45 }
 0x442   : > { %7721 = vst [vmem:[#allocation39_spill] sm:$0xff] %v5174_v45  ;;  %v5205_v54 = vpack.c.bf16 %v1190_v52, %v1189_v11  ;;  %v5207_v18 = vpack.c.bf16 %v1193_v12, %v1192_v30  ;;  %v1201_v11 = vmul.f32 %v5106_v61, %v5216_v3  ;;  %v1204_v52 = vmul.f32 %v5106_v61, %v5225_v49 }
 0x443   : > { %7722 = vst [vmem:[#allocation40_spill] sm:$0xff] %v5177_v21  ;;  %v5244_v12 = vsel %vm1135_vm14, %v5220_v39, %v5218_v32  ;;  %v1140_v61 = vmul.f32 %v5220_v39, %v5168_v41 }
 0x444   : > { %v1660_v9 = vunpack.c.h.b16 %v5205_v54  ;;  %v1663_v15 = vunpack.c.h.b16 %v5207_v18  ;;  %7728 = vst [vmem:[#allocation46_spill] sm:$0xff] %v5225_v49  ;;  %v5240_v30 = vpack.c.bf16 %v1202_v27, %v1201_v11  ;;  %v5246_v57 = vpack.c.bf16 %v1205_v7, %v1204_v52 }
 0x445   : > { %7729 = vst [vmem:[#allocation47_spill] sm:$0xff] %v5244_v12  ;;  %v5258_v27 = vmul.f32 %v5059_v56, %v5225_v49  ;;  %v1146_v11 = vmul.f32 %v5220_v39, %v5099_v14  ;;  %v1147_v7 = vmul.f32 %v5244_v12, %v5109_v59  ;;  %v1149_v52 = vmul.f32 %v5220_v39, %v5102_v19 }
 0x446   : > { %1389 = vrot.lane.b32.xlu0 %v5158_v33, %s4467_s29  ;;  %1381 = vrot.lane.b32.xlu2 %v5091_v50, %s4467_s29  ;;  %v1684_v13 = vpack.c.b16 %v1663_v15, %v1660_v9  ;;  %v5250_v9 = vmul.f32 %v5059_v56, %v5216_v3  ;;  %v1693_v15 = vpack.c.b16 %v1681_v37, %v1678_v47  ;;  %v1672_v37 = vunpack.c.h.b16 %v5240_v30 }
 0x447   : > { %v1150_v47 = vmul.f32 %v5244_v12, %v5112_v40  ;;  %v1153_v35 = vmul.f32 %v5244_v12, %v5200_v48  ;;  %v1675_v36 = vunpack.c.h.b16 %v5246_v57  ;;  %v1141_v10 = vmul.f32 %v5244_v12, %v5171_v28 }
 0x448   : > { %1697 = vrot.lane.b32.xlu1 %v1684_v13, %s4468_s8  ;;  %v1047_v13 = vmul.f32 %v5057_v31, %v5145_v29  ;;  %v1156_v42 = vmul.f32 %v5244_v12, %v5203_v53  ;;  %v1159_v24 = vmul.f32 %v5244_v12, %v5145_v29  ;;  %v1144_v60 = vmul.f32 %v5244_v12, %v5177_v21 }
 0x449   : > { %v1162_v49 = vmul.f32 %v5244_v12, %v5151_v2  ;;  %v5299_v3 = vpack.c.bf16 %v1147_v7, %v1146_v11  ;;  %v5301_v1 = vpack.c.bf16 %v1150_v47, %v1149_v52  ;;  %v5303_v4 = vpack.c.bf16 %v1153_v35, %v1152_v38 }
 0x44a   : > { %v1039_v29 = vmul.f32 %v5057_v31, %v5109_v59  ;;  %v5313_v39 = vpack.c.bf16 %v1141_v10, %v1140_v61  ;;  %v5315_v44 = vpack.c.bf16 %v1156_v42, %v1155_v25  ;;  %v1048_v11 = vmul.f32 %v5059_v56, %v5148_v23 }
 0x44b   : > { %v5319_v7 = vpack.c.bf16 %v1159_v24, %v1158_v17  ;;  %v5321_v35 = vpack.c.bf16 %v1144_v60, %v1143_v51  ;;  %v1049_v38 = vmul.f32 %v5057_v31, %v5151_v2  ;;  %v5325_v52 = vpack.c.bf16 %v1047_v13, %v1046_v62 }
 0x44c   : > { %v1690_v47 = vpack.c.b16 %v1675_v36, %v1672_v37  ;;  %v5327_v12 = vpack.c.bf16 %v1162_v49, %v1161_v6  ;;  %v1531_v10 = vunpack.c.l.b16 %v5299_v3  ;;  %v1534_v25 = vunpack.c.l.b16 %v5301_v1 }
 0x44d   : > { %v1671_v51 = vunpack.c.l.b16 %v5240_v30  ;;  %v1537_v24 = vunpack.c.l.b16 %v5303_v4  ;;  %v1674_v36 = vunpack.c.l.b16 %v5246_v57  ;;  %v1540_v60 = vunpack.c.l.b16 %v5315_v44 }
 0x44e   : > { %1393 = vrot.lane.b32.xlu0 %v5139_v34, %s4467_s29  ;;  %1395 = vrot.lane.b32.xlu2 %v5136_v26, %s4467_s29  ;;  %v5342_v6 = vpack.c.b16 %v1534_v25, %v1531_v10  ;;  %v1525_v61 = vunpack.c.l.b16 %v5313_v39  ;;  %v1659_v62 = vunpack.c.l.b16 %v5205_v54  ;;  %v1528_v49 = vunpack.c.l.b16 %v5321_v35 }
 0x44f   : > { %v1543_v30 = vunpack.c.l.b16 %v5319_v7  ;;  %v1043_v57 = vmul.f32 %v5057_v31, %v5200_v48  ;;  %v1045_v13 = vmul.f32 %v5057_v31, %v5203_v53  ;;  %v5356_v37 = vpack.c.b16 %v1540_v60, %v1537_v24 }
 0x450   : > { %1715 = vrot.lane.b32.xlu1 %v1693_v15, %s4468_s8  ;;  %v5311_v15 = vsel %vm971_vm12, %v5126_v5, 0  ;;  %7733 = vst [vmem:[#allocation51_spill] sm:$0xff] %v5342_v6  ;;  %v1662_v5 = vunpack.c.l.b16 %v5207_v18  ;;  %v1546_v54 = vunpack.c.l.b16 %v5327_v12  ;;  %v1034_v10 = vmul.f32 %v5059_v56, %v5168_v41 }
 0x451   : > { %7730 = vst [vmem:[#allocation48_spill] sm:$0xff] %v5311_v15  ;;  %v5332_v42 = vunpack.c.l.bf16 %v5311_v15  ;;  %v5335_v17 = vunpack.c.h.bf16 %v5311_v15  ;;  %v5365_v25 = vpack.c.b16 %v1528_v49, %v1525_v61  ;;  %v1036_v24 = vmul.f32 %v5059_v56, %v5174_v45 }
 0x452   : > { %7734 = vst [vmem:[#allocation52_spill] sm:$0xff] %v5356_v37  ;;  %v1037_v60 = vmul.f32 %v5057_v31, %v5177_v21  ;;  %v5373_v15 = vpack.c.b16 %v1546_v54, %v1543_v30  ;;  %v1038_v37 = vmul.f32 %v5059_v56, %v5099_v14  ;;  %v1040_v61 = vmul.f32 %v5059_v56, %v5102_v19 }
 0x453   : > { %7731 = vst [vmem:[#allocation49_spill] sm:$0xff] %v5332_v42  ;;  %v1154_v18 = vmul.f32 %v5218_v32, %v5332_v42  ;;  %v1689_v49 = vpack.c.b16 %v1674_v36, %v1671_v51  ;;  %v5382_v6 = vpack.c.bf16 %v1043_v57, %v5250_v9  ;;  %v5385_v45 = vpack.c.bf16 %v1045_v13, %v5258_v27 }
 0x454   : > { %7732 = vst [vmem:[#allocation50_spill] sm:$0xff] %v5335_v17  ;;  %v5389_v30 = vpack.c.bf16 %v1041_v43, %v1040_v61  ;;  %v5395_v51 = vpack.c.bf16 %v1037_v60, %v1036_v24  ;;  %v1348_v9 = vunpack.c.h.b16 %v5325_v52  ;;  %v1669_v43 = vunpack.c.h.b16 %v5130_v22 }
 0x455   : > { %7735 = vst [vmem:[#allocation53_spill] sm:$0xff] %v5365_v25  ;;  %v1683_v25 = vpack.c.b16 %v1662_v5, %v1659_v62  ;;  %v1344_v27 = vunpack.c.h.b16 %v5382_v6  ;;  %v1346_v62 = vunpack.c.h.b16 %v5385_v45  ;;  %v1680_v24 = vunpack.c.l.b16 %v5211_v8 }
 0x456   : > { %4234 = vrot.lane.b32.xlu0 %v5053_v0, %s4469_s17  ;;  %1709 = vrot.lane.b32.xlu2 %v1690_v47, %s4468_s8  ;;  %v1157_v47 = vmul.f32 %v5218_v32, %v5335_v17  ;;  %v1035_v0 = vmul.f32 %v5057_v31, %v5171_v28  ;;  %v1173_v28 = vpack.c.bf16 %v1154_v18, %v1154_v18  ;;  %v1342_v13 = vunpack.c.h.b16 %v5389_v30  ;;  %s4473_s17 = smov 32  }
 0x457   : > { %v5387_v31 = vpack.c.bf16 %v1039_v29, %v1038_v37  ;;  %v1666_v29 = vunpack.c.h.b16 %v5128_v16  ;;  %v5409_v54 = vpack.c.b16 %v1346_v62, %v1344_v27  ;;  %v1338_v16 = vunpack.c.h.b16 %v5395_v51 }
 0x458   : > { %1614 = vrot.lane.b32.xlu1 %v5094_v46, %s4470_s11  ;;  %v5375_v46 = vpack.c.bf16 %v1049_v38, %v1048_v11  ;;  %v1175_v11 = vpack.c.bf16 %v1157_v47, %v1157_v47  ;;  %v5393_v38 = vpack.c.bf16 %v1035_v0, %v1034_v10  ;;  %v1539_v5 = vunpack.c.l.b16 %v1173_v28 }
 0x459   : > { %v1340_v57 = vunpack.c.h.b16 %v5387_v31  ;;  %7737 = vst [vmem:[#allocation55_spill] sm:$0xff] %v5409_v54  ;;  %v1687_v22 = vpack.c.b16 %v1669_v43, %v1666_v29  ;;  %v1544_v60 = vunpack.c.h.b16 %v5319_v7  ;;  %v1547_v61 = vunpack.c.h.b16 %v5327_v12  ;;  %v7744_v43 = vld [vmem:[#allocation36_spill] sm:$0xff] }
 0x45a   : > { %v1350_v36 = vunpack.c.h.b16 %v5375_v46  ;;  %v1542_v37 = vunpack.c.l.b16 %v1175_v11  ;;  %v1336_v18 = vunpack.c.h.b16 %v5393_v38  ;;  %v5438_v8 = vsel %vm971_vm12, %v5080_v55, 0  ;;  %v7745_v55 = vld [vmem:[#allocation35_spill] sm:$0xff] }
 0x45b   : > { %v5413_v47 = vpack.c.b16 %v1342_v13, %v1340_v57  ;;  %v1559_v11 = vpack.c.b16 %v1547_v61, %v1544_v60  ;;  %7740 = vst [vmem:[#allocation58_spill] sm:$0xff] %v5438_v8  ;;  %v5442_v12 = vsel %vm971_vm12, %v5082_v58, 0  ;;  %v5448_v7 = vunpack.c.h.bf16 %v5438_v8 }
 0x45c   : > { %v5405_v0 = vpack.c.b16 %v1350_v36, %v1348_v9  ;;  %v5415_v10 = vpack.c.b16 %v1338_v16, %v1336_v18  ;;  %v1557_v28 = vpack.c.b16 %v1542_v37, %v1539_v5  ;;  %v1526_v9 = vunpack.c.h.b16 %v5313_v39  ;;  %7741 = vst [vmem:[#allocation59_spill] sm:$0xff] %v5442_v12  ;;  %v7746_v16 = vld [vmem:[#allocation34_spill] sm:$0xff] }
 0x45d   : > { %7738 = vst [vmem:[#allocation56_spill] sm:$0xff] %v5413_v47  ;;  %v1529_v36 = vunpack.c.h.b16 %v5321_v35  ;;  %v5445_v39 = vunpack.c.l.bf16 %v5438_v8  ;;  %v5451_v35 = vunpack.c.l.bf16 %v5442_v12  ;;  %v5454_v29 = vunpack.c.h.bf16 %v5442_v12 }
 0x45e   : > { %1707 = vrot.lane.b32.xlu0 %v1689_v49, %s4468_s8  ;;  %1695 = vrot.lane.b32.xlu2 %v1683_v25, %s4468_s8  ;;  %7736 = vst [vmem:[#allocation54_spill] sm:$0xff] %v5405_v0  ;;  %v1677_v25 = vunpack.c.l.b16 %v5209_v63  ;;  %v1163_v27 = vmul.f32 %v5218_v32, %v5448_v7  ;;  %v1532_v57 = vunpack.c.h.b16 %v5299_v3  ;;  %v1535_v13 = vunpack.c.h.b16 %v5301_v1  ;;  %v7760_v0 = vld [vmem:[#allocation31_spill] sm:$0xff] }
 0x45f   : > { %7739 = vst [vmem:[#allocation57_spill] sm:$0xff] %v5415_v10  ;;  %v1550_v63 = vpack.c.b16 %v1529_v36, %v1526_v9  ;;  %v1160_v58 = vmul.f32 %v5218_v32, %v5445_v39  ;;  %v1148_v62 = vmul.f32 %v5218_v32, %v5451_v35  ;;  %v1151_v5 = vmul.f32 %v5218_v32, %v5454_v29 }
 0x460   : > { %1610 = vrot.lane.b32.xlu1 %v5086_v20, %s4470_s11  ;;  %v1692_v49 = vpack.c.b16 %v1680_v24, %v1677_v25  ;;  %7742 = vst [vmem:[#allocation60_spill] sm:$0xff] %v5451_v35  ;;  %v1538_v37 = vunpack.c.h.b16 %v5303_v4  ;;  %v1541_v18 = vunpack.c.h.b16 %v5315_v44  ;;  %v1179_v25 = vpack.c.bf16 %v1163_v27, %v1163_v27 }
 0x461   : > { %7743 = vst [vmem:[#allocation61_spill] sm:$0xff] %v5454_v29  ;;  %v1553_v24 = vpack.c.b16 %v1535_v13, %v1532_v57  ;;  %v1169_v61 = vpack.c.bf16 %v1148_v62, %v1148_v62 }
 0x462   : > { %v1556_v60 = vpack.c.b16 %v1541_v18, %v1538_v37  ;;  %v1548_v44 = vunpack.c.l.b16 %v1179_v25 }
 0x463   : > { %v1533_v9 = vunpack.c.l.b16 %v1169_v61 }
 0x466   : > { %1703 = vrot.lane.b32.xlu0 %v1687_v22, %s4468_s8  ;;  %1622 = vrot.lane.b32.xlu2 %v5136_v26, %s4470_s11  ;;  %v5474_v22 = vsel %vm971_vm12, %v7746_v16, 0 }
 0x467   : > { %7747 = vst [vmem:[#allocation36_spill] sm:$0xff] %v5474_v22  ;;  %v5480_v3 = vunpack.c.h.bf16 %v5474_v22 }
 0x468   : > { %1577 = vrot.lane.b32.xlu1 %v1557_v28, %s4471_s18  ;;  %v1177_v28 = vpack.c.bf16 %v1160_v58, %v1160_v58 }
 0x469   : > { %7749 = vst [vmem:[#allocation34_spill] sm:$0xff] %v5480_v3 }
 0x46a   : > { %v1545_v1 = vunpack.c.l.b16 %v1177_v28 }
 0x46c   : > { %v1560_v58 = vpack.c.b16 %v1548_v44, %v1545_v1  ;;  %v1339_v44 = vunpack.c.l.b16 %v5387_v31 }
 0x46e   : > { %1620 = vrot.lane.b32.xlu0 %v5139_v34, %s4470_s11  ;;  %1713 = vrot.lane.b32.xlu2 %v1692_v49, %s4468_s8  ;;  %v1171_v49 = vpack.c.bf16 %v1151_v5, %v1151_v5 }
 0x470   : > { %1581 = vrot.lane.b32.xlu1 %v1559_v11, %s4471_s18  ;;  %v5477_v11 = vunpack.c.l.bf16 %v5474_v22  ;;  %v1536_v36 = vunpack.c.l.b16 %v1171_v49 }
 0x472   : > { %7748 = vst [vmem:[#allocation35_spill] sm:$0xff] %v5477_v11  ;;  %v1142_v4 = vmul.f32 %v5218_v32, %v5477_v11  ;;  %v1554_v27 = vpack.c.b16 %v1536_v36, %v1533_v9  ;;  %v1341_v9 = vunpack.c.l.b16 %v5389_v30 }
 0x474   : > { %v1165_v62 = vpack.c.bf16 %v1142_v4, %v1142_v4 }
 0x476   : > { %1616 = vrot.lane.b32.xlu0 %v5158_v33, %s4470_s11  ;;  %1608 = vrot.lane.b32.xlu2 %v5091_v50, %s4470_s11  ;;  %v1527_v57 = vunpack.c.l.b16 %v1165_v62 }
 0x478   : > { %1563 = vrot.lane.b32.xlu1 %v1550_v63, %s4471_s18  ;;  %v1145_v63 = vmul.f32 %v5218_v32, %v5480_v3 }
 0x47a   : > { %v1167_v5 = vpack.c.bf16 %v1145_v63, %v1145_v63 }
 0x47c   : > { %v1530_v13 = vunpack.c.l.b16 %v1167_v5 }
 0x47e   : > { %1602 = vrot.lane.b32.xlu0 %v7744_v43, %s4470_s11  ;;  %1604 = vrot.lane.b32.xlu2 %v7745_v55, %s4470_s11  ;;  %v1551_v37 = vpack.c.b16 %v1530_v13, %v1527_v57  ;;  %v5513_v57 = vpack.c.b16 %v1341_v9, %v1339_v44  ;;  %v7757_v9 = vld [vmem:[#allocation43_spill] sm:$0xff] }
 0x486   : > { %1569 = vrot.lane.b32.xlu0 %v1553_v24, %s4471_s18  ;;  %1575 = vrot.lane.b32.xlu2 %v1556_v60, %s4471_s18 }
 0x48e   : > { %1583 = vrot.lane.b32.xlu0 %v1560_v58, %s4471_s18  ;;  %1571 = vrot.lane.b32.xlu2 %v1554_v27, %s4471_s18  ;;  %v1347_v58 = vunpack.c.l.b16 %v5325_v52  ;;  %v1349_v27 = vunpack.c.l.b16 %v5375_v46  ;;  %v1343_v46 = vunpack.c.l.b16 %v5382_v6 }
 0x490   : > { %v1357_v52 = vpack.c.b16 %v1349_v27, %v1347_v58  ;;  %v7759_v58 = vld [vmem:[#allocation30_spill] sm:$0xff] }
 0x496   : > { %1565 = vrot.lane.b32.xlu0 %v1551_v37, %s4471_s18 }
 0x498   : > { %v5491_v18 = vpop.permute.xlu2 %1377  ;;  %v5495_v24 = vpop.permute.xlu1 %1383 }
 0x499   : > { %7750 = vst [vmem:[#allocation62_spill] sm:$0xff] %v5491_v18 }
 0x49a   : > { %7752 = vst [vmem:[#allocation64_spill] sm:$0xff] %v5495_v24 }
 0x4a0   : > { %v1382_v16 = vpop.permute.xlu2 %1381  ;;  %v1388_v49 = vpop.permute.xlu1 %1387 }
 0x4a1   : > { %v1402_v30 = vsel %vm1399_vm15, %v1382_v16, %v5495_v24 }
 0x4a8   : > { %v5493_v25 = vpop.permute.xlu2 %1395 }
 0x4a9   : > { %7751 = vst [vmem:[#allocation63_spill] sm:$0xff] %v5493_v25 }
 0x4ab   : > { %v5507_v63 = vpop.permute.xlu1 %1701 }
 0x4b0   : > { %v1376_v28 = vpop.permute.xlu0 %1375  ;;  %v5499_v61 = vpop.permute.xlu2 %1709 }
 0x4b1   : > { %v1400_v37 = vsel %vm1399_vm15, %v1376_v28, %v5491_v18 }
 0x4b8   : > { %v5497_v60 = vpop.permute.xlu0 %1389  ;;  %v5511_v62 = vpop.permute.xlu2 %1695 }
 0x4b9   : > { %7753 = vst [vmem:[#allocation65_spill] sm:$0xff] %v5497_v60  ;;  %v1404_v36 = vsel %vm1399_vm15, %v1388_v49, %v5497_v60  ;;  %v1345_v49 = vunpack.c.l.b16 %v5385_v45  ;;  %v7758_v45 = vld [vmem:[#allocation46_spill] sm:$0xff] }
 0x4ba   : > { %v5543_v10 = vpop.permute.xlu1 %1697 }
 0x4c0   : > { %v1394_v1 = vpop.permute.xlu0 %1393  ;;  %v5563_v8 = vpop.permute.xlu2 %1622 }
 0x4c1   : > { %v1406_v4 = vsel %vm1399_vm15, %v1394_v1, %v5493_v25 }
 0x4c2   : > { %2039 = vmatpush.bf16.msra.mxu2 %v1406_v4 }
 0x4c6   : > { %2040 = vmatpush.bf16.msra.mxu2 %v1404_v36 }
 0x4c8   : > { %v4235_v5 = vpop.permute.xlu0 %4234 }
 0x4c9   : > { %v5515_v13 = vunpack.i.h.bf16 %v4235_v5  ;;  %v5517_v31 = vunpack.i.l.bf16 %v4235_v5 }
 0x4ca   : > { %2041 = vmatpush.bf16.msra.mxu2 %v1402_v30 }
 0x4cb   : > { %7754 = vst [vmem:[#allocation66_spill] sm:$0xff] %v5515_v13  ;;  %v1103_v1 = vmul.f32 %v5515_v13, %v5332_v42  ;;  %v1106_v4 = vmul.f32 %v5515_v13, %v5335_v17  ;;  %v1109_v44 = vmul.f32 %v5515_v13, %v5445_v39  ;;  %v1112_v16 = vmul.f32 %v5515_v13, %v5448_v7 }
 0x4cc   : > { %7755 = vst [vmem:[#allocation67_spill] sm:$0xff] %v5517_v31  ;;  %v5535_v28 = vsel %vm1084_vm1, %v5517_v31, %v5515_v13  ;;  %v1101_v6 = vmul.f32 %v5517_v31, %v7757_v9  ;;  %v1104_v36 = vmul.f32 %v5517_v31, %v7758_v45  ;;  %v1107_v27 = vmul.f32 %v5517_v31, %v7759_v58 }
 0x4cd   : > { %7756 = vst [vmem:[#allocation68_spill] sm:$0xff] %v5535_v28  ;;  %v1122_v5 = vpack.c.bf16 %v1103_v1, %v1103_v1  ;;  %v1124_v30 = vpack.c.bf16 %v1106_v4, %v1106_v4  ;;  %v1126_v56 = vpack.c.bf16 %v1109_v44, %v1109_v44  ;;  %v1128_v32 = vpack.c.bf16 %v1112_v16, %v1112_v16 }
 0x4ce   : > { %2042 = vmatpush.bf16.msra.mxu2 %v1400_v37  ;;  %v1102_v47 = vmul.f32 %v5535_v28, %v5200_v48  ;;  %v1105_v54 = vmul.f32 %v5535_v28, %v5203_v53  ;;  %v1108_v18 = vmul.f32 %v5535_v28, %v7760_v0  ;;  %v1110_v24 = vmul.f32 %v5517_v31, %v5148_v23 }
 0x4cf   : > { %v1446_v60 = vunpack.c.l.b16 %v1122_v5  ;;  %v1449_v1 = vunpack.c.l.b16 %v1124_v30  ;;  %v1452_v4 = vunpack.c.l.b16 %v1126_v56  ;;  %v1455_v44 = vunpack.c.l.b16 %v1128_v32 }
 0x4d0   : > { %v5553_v16 = vpop.permute.xlu0 %1707  ;;  %v5555_v25 = vpack.c.bf16 %v1102_v47, %v1101_v6  ;;  %v5557_v37 = vpack.c.bf16 %v1105_v54, %v1104_v36  ;;  %v1111_v22 = vmul.f32 %v5535_v28, %v5151_v2  ;;  %v5561_v12 = vpack.c.bf16 %v1108_v18, %v1107_v27 }
 0x4d1   : > { %v1464_v17 = vpack.c.b16 %v1449_v1, %v1446_v60  ;;  %v1467_v42 = vpack.c.b16 %v1455_v44, %v1452_v4  ;;  %v1095_v5 = vmul.f32 %v5517_v31, %v5099_v14  ;;  %v1096_v56 = vmul.f32 %v5535_v28, %v5109_v59 }
 0x4d2   : > { %2043 = vmatpush.bf16.msra.mxu2 %v1357_v52  ;;  %v1445_v32 = vunpack.c.h.b16 %v5555_v25  ;;  %v1448_v54 = vunpack.c.h.b16 %v5557_v37  ;;  %v1355_v47 = vpack.c.b16 %v1345_v49, %v1343_v46  ;;  %v5571_v6 = vpack.c.bf16 %v1111_v22, %v1110_v24 }
 0x4d3   : > { %1484 = vrot.lane.b32.xlu2 %v1464_v17, %s4472_s19  ;;  %1490 = vrot.lane.b32.xlu1 %v1467_v42, %s4472_s19  ;;  %v1451_v18 = vunpack.c.h.b16 %v5561_v12  ;;  %v1098_v60 = vmul.f32 %v5517_v31, %v5102_v19  ;;  %v1099_v52 = vmul.f32 %v5535_v28, %v5112_v40  ;;  %v1117_v36 = vpack.c.bf16 %v1096_v56, %v1095_v5 }
 0x4d4   : > { %v1463_v27 = vpack.c.b16 %v1448_v54, %v1445_v32  ;;  %v1454_v30 = vunpack.c.h.b16 %v5571_v6  ;;  %v1097_v22 = vmul.f32 %v5515_v13, %v5451_v35  ;;  %v1100_v17 = vmul.f32 %v5515_v13, %v5454_v29 }
 0x4d5   : > { %v1119_v24 = vpack.c.bf16 %v1099_v52, %v1098_v60  ;;  %v1439_v42 = vunpack.c.h.b16 %v1117_v36  ;;  %v1091_v46 = vmul.f32 %v5515_v13, %v5477_v11  ;;  %v1094_v49 = vmul.f32 %v5515_v13, %v5480_v3  ;;  %v5594_v52 = vpop.permute.xlu1 %1715 }
 0x4d6   : > { %1482 = vrot.lane.b32.xlu0 %v1463_v27, %s4472_s19  ;;  %2044 = vmatpush.bf16.msra.mxu2 %v1355_v47  ;;  %v1118_v1 = vpack.c.bf16 %v1097_v22, %v1097_v22  ;;  %v1120_v4 = vpack.c.bf16 %v1100_v17, %v1100_v17  ;;  %v1335_v44 = vunpack.c.l.b16 %v5393_v38  ;;  %v1337_v5 = vunpack.c.l.b16 %v5395_v51  ;;  %v7761_v27 = vld [vmem:[#allocation38_spill] sm:$0xff]  ;;  %v7762_v22 = vld [vmem:[#allocation39_spill] sm:$0xff] }
 0x4d7   : > { %v1442_v56 = vunpack.c.h.b16 %v1119_v24  ;;  %v1114_v32 = vpack.c.bf16 %v1091_v46, %v1091_v46  ;;  %v1116_v54 = vpack.c.bf16 %v1094_v49, %v1094_v49  ;;  %v1089_v60 = vmul.f32 %v5517_v31, %v5168_v41 }
 0x4d8   : > { %v5596_v11 = vpop.permute.xlu0 %1703  ;;  %v1440_v13 = vunpack.c.l.b16 %v1118_v1  ;;  %v1443_v3 = vunpack.c.l.b16 %v1120_v4  ;;  %v1090_v47 = vmul.f32 %v5535_v28, %v7761_v27  ;;  %v1092_v38 = vmul.f32 %v5517_v31, %v7762_v22  ;;  %v1714_v1 = vpop.permute.xlu2 %1713 }
 0x4d9   : > { %v1466_v17 = vpack.c.b16 %v1454_v30, %v1451_v18  ;;  %v1460_v51 = vpack.c.b16 %v1442_v56, %v1439_v42  ;;  %v1093_v46 = vmul.f32 %v5535_v28, %v5177_v21  ;;  %v1444_v49 = vunpack.c.l.b16 %v5555_v25 }
 0x4da   : > { %2045 = vmatpush.bf16.msra.mxu2 %v5513_v57  ;;  %v1351_v29 = vpack.c.b16 %v1337_v5, %v1335_v44  ;;  %v1113_v35 = vpack.c.bf16 %v1090_v47, %v1089_v60  ;;  %v1434_v4 = vunpack.c.l.b16 %v1114_v32  ;;  %v1437_v2 = vunpack.c.l.b16 %v1116_v54 }
 0x4db   : > { %1488 = vrot.lane.b32.xlu2 %v1466_v17, %s4472_s19  ;;  %1476 = vrot.lane.b32.xlu1 %v1460_v51, %s4472_s19  ;;  %v1115_v31 = vpack.c.bf16 %v1093_v46, %v1092_v38  ;;  %v1447_v18 = vunpack.c.l.b16 %v5557_v37  ;;  %v1461_v30 = vpack.c.b16 %v1443_v3, %v1440_v13  ;;  %v1438_v28 = vunpack.c.l.b16 %v1117_v36 }
 0x4dc   : > { %v1433_v42 = vunpack.c.h.b16 %v1113_v35  ;;  %v1432_v56 = vunpack.c.l.b16 %v1113_v35  ;;  %v1441_v44 = vunpack.c.l.b16 %v1119_v24  ;;  %v1726_v5 = vsel %vm1719_vm2, %v1714_v1, %v5594_v52 }
 0x4dd   : > { %v1436_v25 = vunpack.c.h.b16 %v1115_v31  ;;  %v5609_v23 = vpack.c.b16 %v1447_v18, %v1444_v49  ;;  %v1435_v57 = vunpack.c.l.b16 %v1115_v31  ;;  %v1450_v32 = vunpack.c.l.b16 %v5561_v12  ;;  %v4145_v12 = vld [vmem:[%s7509_s5 + $0x10] sm:$0xf0]  ;;  %v1615_v24 = vpop.permute.xlu1 %1614 }
 0x4de   : > { %1478 = vrot.lane.b32.xlu0 %v1461_v30, %s4472_s19  ;;  %2046 = vmatpush.bf16.msra.mxu2 %v1351_v29  ;;  %v1453_v54 = vunpack.c.l.b16 %v5571_v6  ;;  %v5618_v35 = vpack.c.b16 %v1441_v44, %v1438_v28  ;;  %v1458_v31 = vpack.c.b16 %v1437_v2, %v1434_v4  ;;  %v4033_v29 = vld [vmem:[%s7509_s5] sm:$0xf]  ;;  %v1724_v2 = vsel %vm1719_vm2, %v5553_v16, %v5499_v61 }
 0x4df   : > { %v5616_v3 = vpack.c.b16 %v1435_v57, %v1432_v56  ;;  %v1457_v36 = vpack.c.b16 %v1436_v25, %v1433_v42  ;;  %v5628_v6 = vor.u32 %v4145_v12, %v4033_v29  ;;  %v1722_v28 = vsel %vm1719_vm2, %v5507_v63, %v5596_v11  ;;  %v5665_v25 = vld [vmem:[%s4609_s16 + $0xf0] sm:$0xff]  ;;  %v5668_v57 = vld [vmem:[%s4609_s16 + $0xf8] sm:$0xff] }
 0x4e0   : > { %v1621_v13 = vpop.permute.xlu0 %1620  ;;  %v5620_v37 = vpack.c.b16 %v1453_v54, %v1450_v32  ;;  %v1609_v47 = vpop.permute.xlu2 %1608  ;;  %v1720_v38 = vsel %vm1719_vm2, %v5511_v62, %v5543_v10  ;;  %v2275_v44 = vadd.f32 %v5668_v57, %v5665_v25  ;;  %v5675_v32 = vld [vmem:[%s4609_s16 + $0xe0] sm:$0xff]  ;;  %v5678_v54 = vld [vmem:[%s4609_s16 + $0xe8] sm:$0xff] }
 0x4e1   : > { %7763 = vst [vmem:[#allocation38_spill] sm:$0xff] %v5628_v6  ;;  %2047 = vmatmul.bf16.vlgmr.msra.gmra.mxu2 %v5628_v6  ;;  %v1633_v16 = vsel %vm1626_vm3, %v1621_v13, %v5563_v8  ;;  %v5681_v13 = vld [vmem:[%s4609_s16 + $0xd0] sm:$0xff]  ;;  %v2272_v29 = vadd.f32 %v5678_v54, %v5675_v32 }
 0x4e2   : > { %2077 = vmatpush.bf16.msrb.mxu2 %v1726_v5 }
 0x4e3   : > { %1472 = vrot.lane.b32.xlu1 %v1458_v31, %s4472_s19  ;;  %1470 = vrot.lane.b32.xlu2 %v1457_v36, %s4472_s19  ;;  %v5684_v31 = vld [vmem:[%s4609_s16 + $0xd8] sm:$0xff] }
 0x4e5   : > { %v5644_v17 = vpop.permute.xlu1 %1610 }
 0x4e6   : > { %2078 = vmatpush.bf16.msrb.mxu2 %v1724_v2  ;;  %7764 = vst [vmem:[#allocation69_spill] sm:$0xff] %v5644_v17  ;;  %v1629_v62 = vsel %vm1626_vm3, %v1609_v47, %v5644_v17  ;;  %v5693_v2 = vld [vmem:[%s4609_s16 + $0xc0] sm:$0xff] }
 0x4e8   : > { %v5639_v60 = vpop.permute.xlu0 %1616  ;;  %v5650_v46 = vpop.permute.xlu2 %1604 }
 0x4e9   : > { %v1631_v63 = vsel %vm1626_vm3, %v1615_v24, %v5639_v60  ;;  %7765 = vst [vmem:[#allocation70_spill] sm:$0xff] %v5650_v46  ;;  %v2269_v24 = vadd.f32 %v5684_v31, %v5681_v13 }
 0x4ea   : > { %2079 = vmatpush.bf16.msrb.mxu2 %v1722_v28  ;;  %v5696_v28 = vld [vmem:[%s4609_s16 + $0xc8] sm:$0xff] }
 0x4ed   : > { %v1578_v49 = vpop.permute.xlu1 %1577 }
 0x4ee   : > { %2080 = vmatpush.bf16.msrb.mxu2 %v1720_v38 }
 0x4f0   : > { %v1603_v51 = vpop.permute.xlu0 %1602  ;;  %v5658_v18 = vpop.permute.xlu2 %1575 }
 0x4f1   : > { %v1627_v4 = vsel %vm1626_vm3, %v1603_v51, %v5650_v46  ;;  %v1591_v5 = vsel %vm1585_vm4, %v5658_v18, %v1578_v49  ;;  %v5708_v49 = vld [vmem:[%s4609_s16 + $0xb8] sm:$0xff] }
 0x4f2   : > { %2081 = vmatpush.bf16.msrb.mxu2 %v1633_v16  ;;  %v2266_v16 = vadd.f32 %v5696_v28, %v5693_v2 }
 0x4f5   : > { %v5660_v30 = vpop.permute.xlu1 %1581 }
 0x4f6   : > { %2082 = vmatpush.bf16.msrb.mxu2 %v1631_v63  ;;  %v5705_v63 = vld [vmem:[%s4609_s16 + $0xb0] sm:$0xff] }
 0x4f8   : > { %v5654_v1 = vpop.permute.xlu0 %1569  ;;  %v1572_v36 = vpop.permute.xlu2 %1571 }
 0x4f9   : > { %v1589_v12 = vsel %vm1585_vm4, %v5654_v1, %v1572_v36 }
 0x4fa   : > { %2083 = vmatpush.bf16.msrb.mxu2 %v1629_v62  ;;  %v5711_v62 = vld [vmem:[%s4609_s16 + $0xa0] sm:$0xff] }
 0x4fd   : > { %v5698_v38 = vpop.permute.xlu1 %1563 }
 0x4fe   : > { %2084 = vmatpush.bf16.msrb.mxu2 %v1627_v4  ;;  %v5714_v4 = vld [vmem:[%s4609_s16 + $0xa8] sm:$0xff] }
 0x500   : > { %v1584_v42 = vpop.permute.xlu0 %1583 }
 0x501   : > { %v1593_v56 = vsel %vm1585_vm4, %v5660_v30, %v1584_v42  ;;  %v2263_v42 = vadd.f32 %v5708_v49, %v5705_v63 }
 0x502   : > { %2153 = vmatpush.bf16.msra.mxu2 %v1593_v56  ;;  %v2260_v56 = vadd.f32 %v5714_v4, %v5711_v62 }
 0x506   : > { %2154 = vmatpush.bf16.msra.mxu2 %v1591_v5  ;;  %v5724_v5 = vld [vmem:[%s4609_s16 + $0x98] sm:$0xff] }
 0x508   : > { %2276 = vadd.xlane.f32.xlu0 %v2275_v44  ;;  %v1566_v47 = vpop.permute.xlu0 %1565  ;;  %v5721_v44 = vld [vmem:[%s4609_s16 + $0x90] sm:$0xff] }
 0x509   : > { %v1587_v51 = vsel %vm1585_vm4, %v5698_v38, %v1566_v47  ;;  %v2257_v36 = vadd.f32 %v5724_v5, %v5721_v44  ;;  %v4150_v47 = vld [vmem:[%s7509_s5 + $0x38] sm:$0xf0] }
 0x50a   : > { %2155 = vmatpush.bf16.msra.mxu2 %v1589_v12  ;;  %v5732_v12 = vld [vmem:[%s4609_s16 + $0x88] sm:$0xff] }
 0x50b   : > { %7767 = vst [vmem:[#allocation72_spill] sm:$0xff] %v5732_v12 }
 0x50c   : > { %2273 = vadd.xlane.f32.xlu2 %v2272_v29  ;;  %v5729_v29 = vld [vmem:[%s4609_s16 + $0x80] sm:$0xff] }
 0x50d   : > { %2270 = vadd.xlane.f32.xlu1 %v2269_v24  ;;  %7766 = vst [vmem:[#allocation71_spill] sm:$0xff] %v5729_v29  ;;  %v4053_v24 = vld [vmem:[%s7509_s5 + $0x28] sm:$0xf] }
 0x50e   : > { %2156 = vmatpush.bf16.msra.mxu2 %v1587_v51  ;;  %v2254_v51 = vadd.f32 %v5732_v12, %v5729_v29 }
 0x510   : > { %2267 = vadd.xlane.f32.xlu0 %v2266_v16  ;;  %v5740_v16 = vor.u32 %v4150_v47, %v4053_v24  ;;  %v7771_v24 = vld [vmem:[#allocation21_spill] sm:$0xff]  ;;  %v7772_v47 = vld [vmem:[#allocation52_spill] sm:$0xff] }
 0x512   : > { %7768 = vst [vmem:[#allocation73_spill] sm:$0xff] %v5740_v16  ;;  %2052 = vmatmul.bf16.gmra.mxu2 %v5740_v16 }
 0x514   : > { %2264 = vadd.xlane.f32.xlu2 %v2263_v42  ;;  %v4041_v42 = vld [vmem:[%s7509_s5 + $0x8] sm:$0xf] }
 0x515   : > { %2261 = vadd.xlane.f32.xlu1 %v2260_v56  ;;  %v4146_v56 = vld [vmem:[%s7509_s5 + $0x18] sm:$0xf0] }
 0x516   : > { %v5751_v6 = vor.u32 %v4146_v56, %v4041_v42  ;;  %v4061_v42 = vld [vmem:[%s7509_s5 + $0x30] sm:$0xf]  ;;  %v4151_v56 = vld [vmem:[%s7509_s5 + $0x40] sm:$0xf0] }
 0x518   : > { %2258 = vadd.xlane.f32.xlu0 %v2257_v36  ;;  %7769 = vst [vmem:[#allocation74_spill] sm:$0xff] %v5751_v6  ;;  %v7770_v36 = vld [vmem:[#allocation51_spill] sm:$0xff] }
 0x51c   : > { %2255 = vadd.xlane.f32.xlu2 %v2254_v51  ;;  %v7773_v51 = vld [vmem:[#allocation53_spill] sm:$0xff] }
 0x522   : > { %2085 = vmatmul.bf16.vlgmr.msrb.gmra.mxu2 %v5751_v6 }
 0x52c   : > { %1567 = vrot.lane.b32.xlu0 %v7770_v36, %s4471_s18  ;;  %v5769_v36 = vor.u32 %v4151_v56, %v4061_v42  ;;  %v4143_v56 = vld [vmem:[%s7509_s5 + $0x4] sm:$0xf] }
 0x52e   : > { %4239 = vrot.lane.b32.xlu1 %v7771_v24, %s4473_s17  ;;  %7774 = vst [vmem:[#allocation51_spill] sm:$0xff] %v5769_v36  ;;  %v1485_v24 = vpop.permute.xlu2 %1484  ;;  %s4476_s17 = smov 34  }
 0x532   : > { %2090 = vmatmul.bf16.gmra.mxu2 %v5769_v36 }
 0x534   : > { %1480 = vrot.lane.b32.xlu0 %v5609_v23, %s4472_s19  ;;  %1573 = vrot.lane.b32.xlu2 %v7772_v47, %s4471_s18  ;;  %v7775_v23 = vld [vmem:[#allocation22_spill] sm:$0xff] }
 0x536   : > { %1561 = vrot.lane.b32.xlu1 %v7773_v51, %s4471_s18  ;;  %v5782_v47 = vpop.permute.xlu2 %1488 }
 0x53c   : > { %1579 = vrot.lane.b32.xlu0 %v5373_v15, %s4471_s18  ;;  %1468 = vrot.lane.b32.xlu2 %v5616_v3, %s4472_s19 }
 0x53e   : > { %1474 = vrot.lane.b32.xlu1 %v5618_v35, %s4472_s19 }
 0x544   : > { %1847 = vrot.lane.b32.xlu0 %v5139_v34, %s4474_s9  ;;  %1841 = vrot.lane.b32.xlu2 %v7775_v23, %s4474_s9 }
 0x545   : > { %v1491_v51 = vpop.permute.xlu1 %1490 }
 0x546   : > { %1849 = vrot.lane.b32.xlu1 %v5136_v26, %s4474_s9  ;;  %v1500_v15 = vsel %vm1492_vm5, %v5782_v47, %v1491_v51 }
 0x547   : > { %2157 = vmatpush.bf16.msra.mxu2 %v1500_v15 }
 0x548   : > { %v5788_v3 = vpop.permute.xlu0 %1482 }
 0x549   : > { %v1498_v35 = vsel %vm1492_vm5, %v5788_v3, %v1485_v24 }
 0x54b   : > { %2158 = vmatpush.bf16.msra.mxu2 %v1498_v35 }
 0x54c   : > { %1843 = vrot.lane.b32.xlu0 %v5158_v33, %s4474_s9  ;;  %1486 = vrot.lane.b32.xlu2 %v5620_v37, %s4472_s19  ;;  %v4035_v33 = vld [vmem:[%s7509_s5 + $0x14] sm:$0xf0] }
 0x54d   : > { %v5796_v34 = vpop.permute.xlu1 %1476  ;;  %v5818_v23 = vor.u32 %v4143_v56, %v4035_v33 }
 0x54e   : > { %1835 = vrot.lane.b32.xlu1 %v5091_v50, %s4474_s9  ;;  %v5812_v50 = vpop.permute.xlu2 %1470 }
 0x54f   : > { %7776 = vst [vmem:[#allocation21_spill] sm:$0xff] %v5818_v23 }
 0x550   : > { %v1479_v26 = vpop.permute.xlu0 %1478 }
 0x551   : > { %v1496_v42 = vsel %vm1492_vm5, %v5796_v34, %v1479_v26 }
 0x552   : > { %2159 = vmatpush.bf16.msra.mxu2 %v1496_v42 }
 0x554   : > { %1829 = vrot.lane.b32.xlu0 %v7744_v43, %s4474_s9  ;;  %1837 = vrot.lane.b32.xlu2 %v5086_v20, %s4474_s9  ;;  %v4148_v43 = vld [vmem:[%s7509_s5 + $0x2c] sm:$0xf]  ;;  %v4055_v20 = vld [vmem:[%s7509_s5 + $0x3c] sm:$0xf0] }
 0x555   : > { %v1473_v37 = vpop.permute.xlu1 %1472  ;;  %v5827_v51 = vor.u32 %v4148_v43, %v4055_v20  ;;  %v5840_v43 = vld [vmem:[%s7507_s3 + $0x8] sm:$0xff] }
 0x556   : > { %1831 = vrot.lane.b32.xlu1 %v7745_v55, %s4474_s9  ;;  %v1494_v24 = vsel %vm1492_vm5, %v5812_v50, %v1473_v37  ;;  %7779 = vst [vmem:[#allocation22_spill] sm:$0xff] %v5840_v43 }
 0x557   : > { %2160 = vmatpush.bf16.msra.mxu2 %v1494_v24  ;;  %7777 = vst [vmem:[#allocation52_spill] sm:$0xff] %v5827_v51  ;;  %v5833_v24 = vld [vmem:[%s7507_s3] sm:$0xff] }
 0x558   : > { %7778 = vst [vmem:[#allocation53_spill] sm:$0xff] %v5833_v24 }
 0x55a   : > { %2161 = vmatmul.bf16.vlgmr.msra.gmra.mxu2 %v5818_v23 }
 0x564   : > { %v5844_v20 = vpop.f32.mrf.mxu2 }
 0x565   : > { %7780 = vst [vmem:[#allocation75_spill] sm:$0xff] %v5844_v20 }
 0x56a   : > { %2166 = vmatmul.bf16.gmra.mxu2 %v5827_v51 }
 0x56c   : > { %v5893_v17 = vpop.f32.mrf.mxu2 }
 0x56d   : > { %7785 = vst [vmem:[#allocation80_spill] sm:$0xff] %v5893_v17 }
 0x57b   : > { %v2277_v55 = vpop.xlane.xlu0 %2276 }
 0x57c   : > { %2286 = vmatpush.msrb.mxu2 %v2277_v55 }
 0x57f   : > { %v2274_v15 = vpop.xlane.xlu2 %2273 }
 0x580   : > { %2287 = vmatpush.msrb.mxu2 %v2274_v15  ;;  %v2271_v35 = vpop.xlane.xlu1 %2270 }
 0x582   : > { %2288 = vmatpush.msrb.mxu2 %v2271_v35 }
 0x583   : > { %v2268_v26 = vpop.xlane.xlu0 %2267 }
 0x584   : > { %2289 = vmatpush.msrb.mxu2 %v2268_v26 }
 0x587   : > { %v2265_v42 = vpop.xlane.xlu2 %2264 }
 0x588   : > { %2290 = vmatpush.msrb.mxu2 %v2265_v42  ;;  %v2262_v56 = vpop.xlane.xlu1 %2261 }
 0x58a   : > { %2291 = vmatpush.msrb.mxu2 %v2262_v56  ;;  %v5857_v56 = vld [vmem:[%s7507_s3 + $0x10] sm:$0xff] }
 0x58b   : > { %v2259_v33 = vpop.xlane.xlu0 %2258  ;;  %7783 = vst [vmem:[#allocation78_spill] sm:$0xff] %v5857_v56 }
 0x58c   : > { %2292 = vmatpush.msrb.mxu2 %v2259_v33 }
 0x58f   : > { %v2256_v37 = vpop.xlane.xlu2 %2255 }
 0x590   : > { %2293 = vmatpush.msrb.mxu2 %v2256_v37 }
 0x591   : > { %4091 = vmatmul.msk.f32.vlgmr.msrb.gmra.mxu2 %vm385_vm0, %v5833_v24 }
 0x597   : > { %v5846_v55 = vpop.permute.xlu2 %1573 }
 0x599   : > { %4092 = vmatmul.msk.f32.gmra.mxu2 %vm385_vm0, %v5840_v43 }
 0x59e   : > { %v5848_v15 = vpop.permute.xlu0 %1567 }
 0x59f   : > { %v5891_v46 = vpop.permute.xlu2 %1468 }
 0x5a0   : > { %v4240_v35 = vpop.permute.xlu1 %4239 }
 0x5a1   : > { %v5850_v26 = vunpack.i.h.bf16 %v4240_v35  ;;  %v5852_v42 = vunpack.i.l.bf16 %v4240_v35  ;;  %4093 = vmatmul.msk.f32.gmra.mxu2 %vm385_vm0, %v5857_v56 }
 0x5a3   : > { %7781 = vst [vmem:[#allocation76_spill] sm:$0xff] %v5850_v26  ;;  %v5863_v33 = vsel %vm1233_vm6, %v5852_v42, %v5850_v26  ;;  %v1244_v37 = vmul.f32 %v5852_v42, %v5099_v14  ;;  %v1247_v20 = vmul.f32 %v5852_v42, %v5102_v19  ;;  %v1250_v35 = vmul.f32 %v5852_v42, %v7757_v9 }
 0x5a4   : > { %7782 = vst [vmem:[#allocation77_spill] sm:$0xff] %v5852_v42  ;;  %v1245_v16 = vmul.f32 %v5863_v33, %v5109_v59  ;;  %v1248_v43 = vmul.f32 %v5863_v33, %v5112_v40  ;;  %v1251_v56 = vmul.f32 %v5863_v33, %v5200_v48  ;;  %v1253_v24 = vmul.f32 %v5852_v42, %v7758_v45 }
 0x5a5   : > { %7784 = vst [vmem:[#allocation79_spill] sm:$0xff] %v5863_v33  ;;  %v1254_v14 = vmul.f32 %v5863_v33, %v5203_v53  ;;  %v1238_v19 = vmul.f32 %v5852_v42, %v5168_v41  ;;  %v1239_v9 = vmul.f32 %v5863_v33, %v7761_v27  ;;  %v1241_v59 = vmul.f32 %v5852_v42, %v7762_v22  ;;  %v5898_v22 = vld [vmem:[%s7507_s3 + $0x18] sm:$0xff] }
 0x5a6   : > { %v5887_v36 = vpop.permute.xlu0 %1480  ;;  %v1266_v40 = vpack.c.bf16 %v1245_v16, %v1244_v37  ;;  %v1268_v6 = vpack.c.bf16 %v1248_v43, %v1247_v20  ;;  %v1270_v48 = vpack.c.bf16 %v1251_v56, %v1250_v35  ;;  %v1242_v45 = vmul.f32 %v5863_v33, %v5177_v21 }
 0x5a7   : > { %v1272_v26 = vpack.c.bf16 %v1254_v14, %v1253_v24  ;;  %v1262_v20 = vpack.c.bf16 %v1239_v9, %v1238_v19  ;;  %v1257_v19 = vmul.f32 %v5863_v33, %v7760_v0  ;;  %v5922_v0 = vld [vmem:[%s7507_s3 + $0x20] sm:$0xff] }
 0x5a8   : > { %v1758_v53 = vunpack.c.l.b16 %v1266_v40  ;;  %v1761_v12 = vunpack.c.l.b16 %v1268_v6  ;;  %v1764_v41 = vunpack.c.l.b16 %v1270_v48  ;;  %v1765_v29 = vunpack.c.h.b16 %v1270_v48  ;;  %v7786_v48 = vld [vmem:[#allocation25_spill] sm:$0xff]  ;;  %v1562_v17 = vpop.permute.xlu1 %1561 }
 0x5a9   : > { %4094 = vmatmul.msk.f32.gmra.mxu2 %vm385_vm0, %v5898_v22  ;;  %v1767_v16 = vunpack.c.l.b16 %v1272_v26  ;;  %v1768_v43 = vunpack.c.h.b16 %v1272_v26  ;;  %v1264_v24 = vpack.c.bf16 %v1242_v45, %v1241_v59  ;;  %v1209_v35 = vmul.f32 %v7786_v48, %v5445_v39  ;;  %v7787_v45 = vld [vmem:[#allocation32_spill] sm:$0xff] }
 0x5aa   : > { %v1779_v14 = vpack.c.b16 %v1761_v12, %v1758_v53  ;;  %v1753_v21 = vunpack.c.h.b16 %v1262_v20  ;;  %v1256_v26 = vmul.f32 %v5852_v42, %v7759_v58  ;;  %v1212_v59 = vmul.f32 %v7786_v48, %v5448_v7  ;;  %v7788_v12 = vld [vmem:[#allocation33_spill] sm:$0xff]  ;;  %v5928_v58 = vpop.f32.mrf.mxu2 }
 0x5ab   : > { %v1782_v56 = vpack.c.b16 %v1767_v16, %v1764_v41  ;;  %v1783_v37 = vpack.c.b16 %v1768_v43, %v1765_v29  ;;  %v1756_v53 = vunpack.c.h.b16 %v1264_v24  ;;  %v1759_v9 = vunpack.c.h.b16 %v1266_v40  ;;  %v5926_v40 = vpop.permute.xlu2 %1841 }
 0x5ac   : > { %1794 = vrot.lane.b32.xlu0 %v1779_v14, %s7647_s10  ;;  %v1259_v29 = vmul.f32 %v5852_v42, %v7787_v45  ;;  %v1260_v16 = vmul.f32 %v5863_v33, %v7788_v12  ;;  %v1762_v14 = vunpack.c.h.b16 %v1268_v6  ;;  %v1274_v45 = vpack.c.bf16 %v1257_v19, %v1256_v26 }
 0x5ad   : > { %1800 = vrot.lane.b32.xlu1 %v1782_v56, %s7647_s10  ;;  %1802 = vrot.lane.b32.xlu2 %v1783_v37, %s7647_s10  ;;  %v1752_v56 = vunpack.c.l.b16 %v1262_v20  ;;  %v1755_v37 = vunpack.c.l.b16 %v1264_v24  ;;  %v1777_v42 = vpack.c.b16 %v1756_v53, %v1753_v21  ;;  %v1226_v12 = vpack.c.bf16 %v1209_v35, %v1209_v35  ;;  %v7789_v21 = vld [vmem:[#allocation49_spill] sm:$0xff]  ;;  %v7790_v53 = vld [vmem:[#allocation50_spill] sm:$0xff] }
 0x5ae   : > { %v1580_v41 = vpop.permute.xlu0 %1579  ;;  %v1276_v33 = vpack.c.bf16 %v1260_v16, %v1259_v29  ;;  %v1590_v6 = vsel %vm1585_vm4, %v5846_v55, %v5658_v18  ;;  %v1228_v24 = vpack.c.bf16 %v1212_v59, %v1212_v59  ;;  %v1203_v26 = vmul.f32 %v7786_v48, %v7789_v21  ;;  %v5946_v16 = vld [vmem:[%s7507_s3 + $0x28] sm:$0xff] }
 0x5af   : > { %v1592_v43 = vsel %vm1585_vm4, %v1580_v41, %v5660_v30  ;;  %v1780_v30 = vpack.c.b16 %v1762_v14, %v1759_v9  ;;  %v1776_v20 = vpack.c.b16 %v1755_v37, %v1752_v56  ;;  %v1771_v35 = vunpack.c.h.b16 %v1274_v45 }
 0x5b0   : > { %2058 = vmatpush.bf16.msra.mxu3 %v1592_v43  ;;  %v1774_v19 = vunpack.c.h.b16 %v1276_v33  ;;  %v1679_v41 = vunpack.c.l.b16 %v1226_v12  ;;  %v1206_v29 = vmul.f32 %v7786_v48, %v7790_v53  ;;  %v1475_v18 = vpop.permute.xlu1 %1474  ;;  %v1588_v55 = vsel %vm1585_vm4, %v5848_v15, %v5654_v1 }
 0x5b1   : > { %4095 = vmatmul.msk.f32.gmra.mxu2 %vm385_vm0, %v5922_v0  ;;  %v1682_v59 = vunpack.c.l.b16 %v1228_v24  ;;  %v1773_v9 = vunpack.c.l.b16 %v1276_v33  ;;  %v1222_v43 = vpack.c.bf16 %v1203_v26, %v1203_v26  ;;  %v1586_v56 = vsel %vm1585_vm4, %v1562_v17, %v5698_v38  ;;  %v7793_v24 = vld [vmem:[#allocation61_spill] sm:$0xff] }
 0x5b2   : > { %v1786_v12 = vpack.c.b16 %v1774_v19, %v1771_v35  ;;  %v1224_v14 = vpack.c.bf16 %v1206_v29, %v1206_v29  ;;  %v5953_v33 = vpop.f32.mrf.mxu2  ;;  %v1200_v17 = vmul.f32 %v7786_v48, %v7793_v24  ;;  %v5968_v35 = vld [vmem:[%s7507_s3 + $0x30] sm:$0xff] }
 0x5b3   : > { %v1694_v37 = vpack.c.b16 %v1682_v59, %v1679_v41  ;;  %v1487_v15 = vpop.permute.xlu2 %1486  ;;  %7791 = vst [vmem:[#allocation49_spill] sm:$0xff] %v5953_v33  ;;  %v1497_v59 = vsel %vm1492_vm5, %v5887_v36, %v5788_v3  ;;  %v5987_v36 = vld [vmem:[%s7507_s3 + $0x38] sm:$0xff] }
 0x5b4   : > { %2059 = vmatpush.bf16.msra.mxu3 %v1590_v6  ;;  %1790 = vrot.lane.b32.xlu0 %v1777_v42, %s7647_s10  ;;  %v1770_v42 = vunpack.c.l.b16 %v1274_v45  ;;  %v1673_v45 = vunpack.c.l.b16 %v1222_v43  ;;  %v1676_v6 = vunpack.c.l.b16 %v1224_v14  ;;  %v1499_v38 = vsel %vm1492_vm5, %v1487_v15, %v5782_v47  ;;  %v7795_v14 = vld [vmem:[#allocation34_spill] sm:$0xff] }
 0x5b5   : > { %1796 = vrot.lane.b32.xlu1 %v1780_v30, %s7647_s10  ;;  %1788 = vrot.lane.b32.xlu2 %v1776_v20, %s7647_s10  ;;  %v7792_v30 = vld [vmem:[#allocation60_spill] sm:$0xff]  ;;  %v1220_v29 = vpack.c.bf16 %v1200_v17, %v1200_v17 }
 0x5b6   : > { %v1785_v1 = vpack.c.b16 %v1773_v9, %v1770_v42  ;;  %v1197_v20 = vmul.f32 %v7786_v48, %v7792_v30  ;;  %v1691_v19 = vpack.c.b16 %v1676_v6, %v1673_v45  ;;  %v1493_v6 = vsel %vm1492_vm5, %v5891_v46, %v5812_v50 }
 0x5b7   : > { %v1670_v42 = vunpack.c.l.b16 %v1220_v29 }
 0x5b8   : > { %2060 = vmatpush.bf16.msra.mxu3 %v1588_v55  ;;  %v5963_v26 = vpop.permute.xlu1 %1849  ;;  %v1218_v41 = vpack.c.bf16 %v1197_v20, %v1197_v20  ;;  %v1848_v55 = vpop.permute.xlu0 %1847 }
 0x5b9   : > { %4096 = vmatmul.msk.f32.gmra.mxu2 %vm385_vm0, %v5946_v16 }
 0x5ba   : > { %v1667_v47 = vunpack.c.l.b16 %v1218_v41  ;;  %v5976_v9 = vpop.f32.mrf.mxu2 }
 0x5bb   : > { %v6005_v50 = vpop.permute.xlu2 %1837 }
 0x5bc   : > { %2061 = vmatpush.bf16.msra.mxu3 %v1586_v56  ;;  %1808 = vrot.lane.b32.xlu0 %v1786_v12, %s7647_s10  ;;  %v7794_v12 = vld [vmem:[#allocation35_spill] sm:$0xff]  ;;  %v1194_v56 = vmul.f32 %v7786_v48, %v7795_v14  ;;  %v1688_v3 = vpack.c.b16 %v1670_v42, %v1667_v47  ;;  %v7797_v47 = vld [vmem:[#allocation58_spill] sm:$0xff] }
 0x5bd   : > { %1717 = vrot.lane.b32.xlu1 %v1694_v37, %s4468_s8  ;;  %1806 = vrot.lane.b32.xlu2 %v1785_v1, %s7647_s10  ;;  %v1191_v43 = vmul.f32 %v7786_v48, %v7794_v12  ;;  %v1495_v37 = vsel %vm1492_vm5, %v1475_v18, %v5796_v34  ;;  %v1860_v34 = vsel %vm1853_vm7, %v1848_v55, %v5963_v26  ;;  %v7798_v42 = vld [vmem:[#allocation59_spill] sm:$0xff] }
 0x5be   : > { %v1216_v15 = vpack.c.bf16 %v1194_v56, %v1194_v56 }
 0x5bf   : > { %v1214_v1 = vpack.c.bf16 %v1191_v43, %v1191_v43 }
 0x5c0   : > { %2062 = vmatpush.bf16.msra.mxu3 %v1499_v38  ;;  %v1836_v45 = vpop.permute.xlu1 %1835  ;;  %v5997_v18 = vpop.permute.xlu0 %1843  ;;  %v1664_v17 = vunpack.c.l.b16 %v1216_v15 }
 0x5c1   : > { %4097 = vmatmul.msk.f32.gmra.mxu2 %vm385_vm0, %v5968_v35  ;;  %v1661_v20 = vunpack.c.l.b16 %v1214_v1  ;;  %v1858_v38 = vsel %vm1853_vm7, %v5926_v40, %v5997_v18  ;;  %v1856_v41 = vsel %vm1853_vm7, %v1836_v45, %v6005_v50 }
 0x5c3   : > { %v1685_v46 = vpack.c.b16 %v1664_v17, %v1661_v20 }
 0x5c4   : > { %2063 = vmatpush.bf16.msra.mxu3 %v1497_v59  ;;  %1711 = vrot.lane.b32.xlu0 %v1691_v19, %s4468_s8  ;;  %v6003_v19 = vpop.f32.mrf.mxu2 }
 0x5c8   : > { %2064 = vmatpush.bf16.msra.mxu3 %v1495_v37  ;;  %v6010_v29 = vpop.permute.xlu1 %1831  ;;  %v1830_v55 = vpop.permute.xlu0 %1829 }
 0x5c9   : > { %4098 = vmatmul.msk.f32.gmra.mxu2 %vm385_vm0, %v5987_v36  ;;  %v1854_v59 = vsel %vm1853_vm7, %v1830_v55, %v6010_v29 }
 0x5cc   : > { %2065 = vmatpush.bf16.msra.mxu3 %v1493_v6  ;;  %1705 = vrot.lane.b32.xlu0 %v1688_v3, %s4468_s8  ;;  %v6014_v40 = vpop.f32.mrf.mxu2 }
 0x5cd   : > { %7796 = vst [vmem:[#allocation50_spill] sm:$0xff] %v6014_v40 }
 0x5cf   : > { %2066 = vmatmul.bf16.vlgmr.msra.gmra.mxu3 %v5818_v23 }
 0x5d0   : > { %2096 = vmatpush.bf16.msrb.mxu3 %v1860_v34 }
 0x5d4   : > { %2097 = vmatpush.bf16.msrb.mxu3 %v1858_v38  ;;  %1699 = vrot.lane.b32.xlu0 %v1685_v46, %s4468_s8  ;;  %v6021_v43 = vpop.f32.mrf.mxu2 }
 0x5d5   : > { %7799 = vst [vmem:[#allocation60_spill] sm:$0xff] %v6021_v43 }
 0x5d8   : > { %2098 = vmatpush.bf16.msrb.mxu3 %v1856_v41 }
 0x5dc   : > { %2099 = vmatpush.bf16.msrb.mxu3 %v1854_v59  ;;  %1624 = vrot.lane.b32.xlu0 %v7797_v47, %s4470_s11 }
 0x5dd   : > { %v6023_v56 = vpop.f32.mrf.mxu2 }
 0x5de   : > { %7800 = vst [vmem:[#allocation61_spill] sm:$0xff] %v6023_v56 }
 0x5df   : > { %2071 = vmatmul.bf16.gmra.mxu3 %v5827_v51 }
 0x5e4   : > { %1612 = vrot.lane.b32.xlu0 %v7798_v42, %s4470_s11 }
 0x5e5   : > { %v6025_v37 = vpop.f32.mrf.mxu2 }
 0x5e6   : > { %7801 = vst [vmem:[#allocation35_spill] sm:$0xff] %v6025_v37 }
 0x5ed   : > { %v6027_v3 = vpop.f32.mrf.mxu2 }
 0x5ee   : > { %7802 = vst [vmem:[#allocation34_spill] sm:$0xff] %v6027_v3  ;;  %v7804_v3 = vld [vmem:[#allocation9_spill] sm:$0xff] }
 0x5f5   : > { %v6029_v1 = vpop.f32.mrf.mxu2 }
 0x5f6   : > { %7803 = vst [vmem:[#allocation58_spill] sm:$0xff] %v6029_v1 }
 0x607   : > { %v6031_v45 = vpop.permute.xlu2 %1802 }
 0x60f   : > { %v1789_v20 = vpop.permute.xlu2 %1788 }
 0x614   : > { %v2295_v15 = vpop.f32.mrf.mxu2 }
 0x617   : > { %v1807_v55 = vpop.permute.xlu2 %1806 }
 0x61c   : > { %v2298_v6 = vpop.f32.mrf.mxu2 }
 0x61e   : > { %v1795_v34 = vpop.permute.xlu0 %1794 }
 0x61f   : > { %v1801_v38 = vpop.permute.xlu1 %1800 }
 0x620   : > { %v1817_v48 = vsel %vm1812_vm8, %v1801_v38, %v6031_v45 }
 0x624   : > { %v2301_v17 = vpop.f32.mrf.mxu2 }
 0x626   : > { %v6033_v46 = vpop.permute.xlu0 %1790 }
 0x627   : > { %v6037_v51 = vpop.permute.xlu1 %1796  ;;  %v1813_v33 = vsel %vm1812_vm8, %v1789_v20, %v6033_v46 }
 0x628   : > { %v1815_v43 = vsel %vm1812_vm8, %v1795_v34, %v6037_v51 }
 0x62c   : > { %v2304_v41 = vpop.f32.mrf.mxu2 }
 0x62e   : > { %v6035_v59 = vpop.permute.xlu0 %1808 }
 0x62f   : > { %v1819_v23 = vsel %vm1812_vm8, %v1807_v55, %v6035_v59  ;;  %v1718_v40 = vpop.permute.xlu1 %1717 }
 0x630   : > { %2100 = vmatpush.bf16.msrb.mxu3 %v1819_v23  ;;  %v1727_v23 = vsel %vm1719_vm2, %v5594_v52, %v1718_v40  ;;  %v2321_v40 = vmul.f32 %v2301_v17, %v7804_v3  ;;  %v7806_v17 = vld [vmem:[#allocation48_spill] sm:$0xff] }
 0x634   : > { %2101 = vmatpush.bf16.msrb.mxu3 %v1817_v48  ;;  %v2307_v1 = vpop.f32.mrf.mxu2 }
 0x635   : > { %v2323_v37 = vmul.f32 %v2307_v1, %v7804_v3 }
 0x636   : > { %v1712_v56 = vpop.permute.xlu0 %1711 }
 0x637   : > { %2349 = vperm.xlu1 %4221, %v2323_v37   ;;  %v1725_v37 = vsel %vm1719_vm2, %v5499_v61, %v1712_v56  ;;  %v2319_v56 = vmul.f32 %v2295_v15, %v7804_v3 }
 0x638   : > { %2102 = vmatpush.bf16.msrb.mxu3 %v1815_v43 }
 0x63c   : > { %2103 = vmatpush.bf16.msrb.mxu3 %v1813_v33  ;;  %v2310_v55 = vpop.f32.mrf.mxu2 }
 0x63d   : > { %v2324_v48 = vmul.f32 %v2310_v55, %v7804_v3  ;;  %v2322_v55 = vmul.f32 %v2304_v41, %v7804_v3 }
 0x63e   : > { %v1706_v38 = vpop.permute.xlu0 %1705 }
 0x63f   : > { %2354 = vperm.xlu2 %4222, %v2324_v48   ;;  %v1723_v43 = vsel %vm1719_vm2, %v5596_v11, %v1706_v38  ;;  %v7805_v48 = vld [vmem:[#allocation36_spill] sm:$0xff] }
 0x640   : > { %2172 = vmatpush.bf16.msra.mxu3 %v1727_v23 }
 0x644   : > { %2173 = vmatpush.bf16.msra.mxu3 %v1725_v37  ;;  %v2313_v1 = vpop.f32.mrf.mxu2 }
 0x645   : > { %v2325_v34 = vmul.f32 %v2313_v1, %v7804_v3 }
 0x646   : > { %v1700_v20 = vpop.permute.xlu0 %1699 }
 0x647   : > { %2359 = vperm.xlu1 %4221, %v2325_v34   ;;  %v1721_v52 = vsel %vm1719_vm2, %v5543_v10, %v1700_v20  ;;  %v2320_v10 = vmul.f32 %v2298_v6, %v7804_v3 }
 0x648   : > { %2174 = vmatpush.bf16.msra.mxu3 %v1723_v43 }
 0x64c   : > { %2175 = vmatpush.bf16.msra.mxu3 %v1721_v52  ;;  %v2316_v33 = vpop.f32.mrf.mxu2 }
 0x64d   : > { %v2326_v23 = vmul.f32 %v2316_v33, %v7804_v3 }
 0x64e   : > { %v1625_v61 = vpop.permute.xlu0 %1624 }
 0x64f   : > { %2339 = vperm.xlu1 %4221, %v2321_v40   ;;  %2364 = vperm.xlu2 %4222, %v2326_v23   ;;  %v1634_v11 = vsel %vm1626_vm3, %v5563_v8, %v1625_v61 }
 0x650   : > { %2176 = vmatpush.bf16.msra.mxu3 %v1634_v11 }
 0x657   : > { %2329 = vperm.xlu1 %4221, %v2319_v56   ;;  %2344 = vperm.xlu2 %4222, %v2322_v55  }
 0x65f   : > { %1606 = vrot.lane.b32.xlu1 %v7805_v48, %s4470_s11  ;;  %2334 = vperm.xlu2 %4222, %v2320_v10  }
 0x667   : > { %1618 = vrot.lane.b32.xlu2 %v7806_v17, %s4470_s11 }
 0x699   : > { %v2355_v38 = vpop.permute.xlu2 %2354 }
 0x69a   : > { %v6070_v37 = vsub.f32 %v5681_v13, %v2355_v38  ;;  %v6073_v8 = vsub.f32 %v5684_v31, %v2355_v38 }
 0x69c   : > { %7807 = vst [vmem:[#allocation59_spill] sm:$0xff] %v6070_v37  ;;  %v2393_v15 = vmul.f32 %v6070_v37, %v6070_v37  ;;  %v2394_v6 = vmul.f32 %v6073_v8, %v6073_v8 }
 0x69d   : > { %7808 = vst [vmem:[#allocation9_spill] sm:$0xff] %v6073_v8  ;;  %v7834_v8 = vld [vmem:[#allocation63_spill] sm:$0xff] }
 0x69e   : > { %v2414_v41 = vadd.f32 %v2394_v6, %v2393_v15 }
 0x6a0   : > { %2415 = vadd.xlane.f32.xlu1 %v2414_v41 }
 0x6a9   : > { %v2365_v1 = vpop.permute.xlu2 %2364  ;;  %v2350_v13 = vpop.permute.xlu1 %2349 }
 0x6aa   : > { %v6080_v43 = vsub.f32 %v5665_v25, %v2365_v1  ;;  %v6083_v34 = vsub.f32 %v5668_v57, %v2365_v1  ;;  %v6090_v52 = vsub.f32 %v5693_v2, %v2350_v13  ;;  %v6093_v33 = vsub.f32 %v5696_v28, %v2350_v13 }
 0x6ac   : > { %7809 = vst [vmem:[#allocation36_spill] sm:$0xff] %v6080_v43  ;;  %v2397_v31 = vmul.f32 %v6080_v43, %v6080_v43  ;;  %v2398_v20 = vmul.f32 %v6083_v34, %v6083_v34  ;;  %v2391_v57 = vmul.f32 %v6090_v52, %v6090_v52  ;;  %v2392_v23 = vmul.f32 %v6093_v33, %v6093_v33 }
 0x6ad   : > { %7810 = vst [vmem:[#allocation48_spill] sm:$0xff] %v6083_v34 }
 0x6ae   : > { %v2420_v40 = vadd.f32 %v2398_v20, %v2397_v31  ;;  %v2411_v61 = vadd.f32 %v2392_v23, %v2391_v57 }
 0x6b0   : > { %2421 = vadd.xlane.f32.xlu2 %v2420_v40 }
 0x6b1   : > { %v2345_v25 = vpop.permute.xlu2 %2344 }
 0x6b8   : > { %2412 = vadd.xlane.f32.xlu2 %v2411_v61  ;;  %v7813_v61 = vld [vmem:[#allocation69_spill] sm:$0xff] }
 0x6b9   : > { %v2360_v11 = vpop.permute.xlu1 %2359  ;;  %v2335_v56 = vpop.permute.xlu2 %2334 }
 0x6ba   : > { %v6100_v55 = vsub.f32 %v5675_v32, %v2360_v11  ;;  %v6103_v2 = vsub.f32 %v5678_v54, %v2360_v11  ;;  %v6106_v28 = vsub.f32 %v5721_v44, %v2335_v56  ;;  %v6109_v10 = vsub.f32 %v5724_v5, %v2335_v56  ;;  %v7814_v56 = vld [vmem:[#allocation71_spill] sm:$0xff] }
 0x6bb   : > { %v6120_v54 = vsub.f32 %v5705_v63, %v2345_v25  ;;  %v6123_v44 = vsub.f32 %v5708_v49, %v2345_v25  ;;  %v1613_v25 = vpop.permute.xlu0 %1612 }
 0x6bc   : > { %7811 = vst [vmem:[#allocation81_spill] sm:$0xff] %v6100_v55  ;;  %v2385_v38 = vmul.f32 %v6106_v28, %v6106_v28  ;;  %v2386_v15 = vmul.f32 %v6109_v10, %v6109_v10  ;;  %v2395_v6 = vmul.f32 %v6100_v55, %v6100_v55  ;;  %v2396_v32 = vmul.f32 %v6103_v2, %v6103_v2 }
 0x6bd   : > { %7812 = vst [vmem:[#allocation82_spill] sm:$0xff] %v6103_v2  ;;  %v2389_v31 = vmul.f32 %v6120_v54, %v6120_v54  ;;  %v2390_v49 = vmul.f32 %v6123_v44, %v6123_v44 }
 0x6be   : > { %v2417_v5 = vadd.f32 %v2396_v32, %v2395_v6  ;;  %v2402_v41 = vadd.f32 %v2386_v15, %v2385_v38  ;;  %v7815_v15 = vld [vmem:[#allocation72_spill] sm:$0xff] }
 0x6c0   : > { %2418 = vadd.xlane.f32.xlu0 %v2417_v5  ;;  %2403 = vadd.xlane.f32.xlu2 %v2402_v41 }
 0x6c1   : > { %v2340_v1 = vpop.permute.xlu1 %2339  ;;  %v1619_v13 = vpop.permute.xlu2 %1618 }
 0x6c2   : > { %v6128_v20 = vsub.f32 %v5711_v62, %v2340_v1  ;;  %v6131_v40 = vsub.f32 %v5714_v4, %v2340_v1  ;;  %v1632_v63 = vsel %vm1626_vm3, %v5639_v60, %v1619_v13  ;;  %v1630_v62 = vsel %vm1626_vm3, %v7813_v61, %v1613_v25  ;;  %v7816_v13 = vld [vmem:[#allocation70_spill] sm:$0xff] }
 0x6c3   : > { %2177 = vmatpush.bf16.msra.mxu3 %v1632_v63  ;;  %v2408_v4 = vadd.f32 %v2390_v49, %v2389_v31  ;;  %v7817_v63 = vld [vmem:[#allocation76_spill] sm:$0xff] }
 0x6c4   : > { %v2387_v57 = vmul.f32 %v6128_v20, %v6128_v20  ;;  %v2388_v23 = vmul.f32 %v6131_v40, %v6131_v40  ;;  %v1240_v49 = vmul.f32 %v7817_v63, %v7794_v12  ;;  %v1243_v25 = vmul.f32 %v7817_v63, %v7795_v14 }
 0x6c6   : > { %v2405_v11 = vadd.f32 %v2388_v23, %v2387_v57  ;;  %v1263_v57 = vpack.c.bf16 %v1240_v49, %v1240_v49  ;;  %v1265_v23 = vpack.c.bf16 %v1243_v25, %v1243_v25  ;;  %v1252_v49 = vmul.f32 %v7817_v63, %v7789_v21 }
 0x6c7   : > { %2178 = vmatpush.bf16.msra.mxu3 %v1630_v62  ;;  %v1255_v25 = vmul.f32 %v7817_v63, %v7790_v53 }
 0x6c8   : > { %2406 = vadd.xlane.f32.xlu1 %v2405_v11  ;;  %2409 = vadd.xlane.f32.xlu0 %v2408_v4  ;;  %v1754_v61 = vunpack.c.l.b16 %v1263_v57  ;;  %v1757_v62 = vunpack.c.l.b16 %v1265_v23  ;;  %v1258_v11 = vmul.f32 %v7817_v63, %v5445_v39  ;;  %v1261_v4 = vmul.f32 %v7817_v63, %v5448_v7 }
 0x6c9   : > { %v2330_v60 = vpop.permute.xlu1 %2329  ;;  %v1246_v23 = vmul.f32 %v7817_v63, %v7792_v30 }
 0x6ca   : > { %v6144_v38 = vsub.f32 %v7814_v56, %v2330_v60  ;;  %v6147_v6 = vsub.f32 %v7815_v15, %v2330_v60  ;;  %v4144_v60 = vld [vmem:[%s7509_s5 + $0xc] sm:$0xf]  ;;  %v4043_v56 = vld [vmem:[%s7509_s5 + $0x1c] sm:$0xf0] }
 0x6cb   : > { %v6171_v15 = vor.u32 %v4144_v60, %v4043_v56  ;;  %v4063_v60 = vld [vmem:[%s7509_s5 + $0x44] sm:$0xf0]  ;;  %v1267_v56 = vpack.c.bf16 %v1246_v23, %v1246_v23  ;;  %v7822_v23 = vld [vmem:[#allocation51_spill] sm:$0xff] }
 0x6cc   : > { %v2383_v32 = vmul.f32 %v6144_v38, %v6144_v38  ;;  %v2384_v5 = vmul.f32 %v6147_v6, %v6147_v6 }
 0x6cd   : > { %7818 = vst [vmem:[#allocation69_spill] sm:$0xff] %v6171_v15  ;;  %2104 = vmatmul.bf16.vlgmr.msrb.gmra.mxu3 %v6171_v15 }
 0x6ce   : > { %v2399_v41 = vadd.f32 %v2384_v5, %v2383_v32  ;;  %v1778_v32 = vpack.c.b16 %v1757_v62, %v1754_v61  ;;  %v1275_v5 = vpack.c.bf16 %v1258_v11, %v1258_v11  ;;  %v1249_v61 = vmul.f32 %v7817_v63, %v7793_v24 }
 0x6cf   : > { %v1271_v62 = vpack.c.bf16 %v1252_v49, %v1252_v49  ;;  %v1273_v11 = vpack.c.bf16 %v1255_v25, %v1255_v25 }
 0x6d0   : > { %2400 = vadd.xlane.f32.xlu0 %v2399_v41  ;;  %v1277_v41 = vpack.c.bf16 %v1261_v4, %v1261_v4  ;;  %v4149_v4 = vld [vmem:[%s7509_s5 + $0x34] sm:$0xf] }
 0x6d1   : > { %v1607_v1 = vpop.permute.xlu1 %1606 }
 0x6d2   : > { %v1628_v31 = vsel %vm1626_vm3, %v7816_v13, %v1607_v1  ;;  %v7819_v1 = vld [vmem:[#allocation18_spill] sm:$0xff]  ;;  %v1772_v13 = vunpack.c.l.b16 %v1275_v5  ;;  %v1766_v5 = vunpack.c.l.b16 %v1271_v62 }
 0x6d3   : > { %2179 = vmatpush.bf16.msra.mxu3 %v1628_v31  ;;  %v1775_v31 = vunpack.c.l.b16 %v1277_v41  ;;  %v1769_v41 = vunpack.c.l.b16 %v1273_v11 }
 0x6d5   : > { %v1787_v57 = vpack.c.b16 %v1775_v31, %v1772_v13  ;;  %v1760_v13 = vunpack.c.l.b16 %v1267_v56  ;;  %v1784_v49 = vpack.c.b16 %v1769_v41, %v1766_v5  ;;  %v7823_v56 = vld [vmem:[#allocation53_spill] sm:$0xff] }
 0x6d8   : > { %1379 = vrot.lane.b32.xlu2 %v7805_v48, %s4467_s29 }
 0x6e0   : > { %1792 = vrot.lane.b32.xlu2 %v1778_v32, %s7647_s10  ;;  %v1269_v32 = vpack.c.bf16 %v1249_v61, %v1249_v61 }
 0x6e1   : > { %4244 = vrot.lane.b32.xlu1 %v7819_v1, %s4476_s17  ;;  %v6195_v1 = vor.u32 %v4149_v4, %v4063_v60  ;;  %s4477_s17 = smov 94  }
 0x6e2   : > { %v1763_v31 = vunpack.c.l.b16 %v1269_v32  ;;  %v6216_v32 = vpop.f32.mrf.mxu3 }
 0x6e3   : > { %7820 = vst [vmem:[#allocation71_spill] sm:$0xff] %v6195_v1  ;;  %2109 = vmatmul.bf16.gmra.mxu3 %v6195_v1 }
 0x6e4   : > { %1385 = vrot.lane.b32.xlu0 %v7798_v42, %s4467_s29  ;;  %v1781_v25 = vpack.c.b16 %v1763_v31, %v1760_v13  ;;  %v7827_v31 = vld [vmem:[#allocation78_spill] sm:$0xff] }
 0x6e8   : > { %1810 = vrot.lane.b32.xlu2 %v1787_v57, %s7647_s10  ;;  %v7821_v57 = vld [vmem:[#allocation74_spill] sm:$0xff] }
 0x6e9   : > { %1397 = vrot.lane.b32.xlu1 %v7797_v47, %s4467_s29 }
 0x6ec   : > { %1391 = vrot.lane.b32.xlu0 %v7806_v17, %s4467_s29 }
 0x6f0   : > { %1845 = vrot.lane.b32.xlu2 %v7806_v17, %s4474_s9 }
 0x6f1   : > { %1804 = vrot.lane.b32.xlu1 %v1784_v49, %s7647_s10 }
 0x6f3   : > { %2180 = vmatmul.bf16.vlgmr.msra.gmra.mxu3 %v7821_v57 }
 0x6f4   : > { %1798 = vrot.lane.b32.xlu0 %v1781_v25, %s7647_s10  ;;  %s6540_s10 = scalar_lea.vmem [#allocation5], %s3998_s23 }
 0x6f9   : > { %1839 = vrot.lane.b32.xlu1 %v7798_v42, %s4474_s9 }
 0x6fc   : > { %1833 = vrot.lane.b32.xlu0 %v7805_v48, %s4474_s9 }
 0x703   : > { %2185 = vmatmul.bf16.gmra.mxu3 %v7822_v23 }
 0x704   : > { %1851 = vrot.lane.b32.xlu0 %v7797_v47, %s4474_s9  ;;  %v7824_v47 = vld [vmem:[#allocation22_spill] sm:$0xff] }
 0x713   : > { %v2416_v62 = vpop.xlane.xlu1 %2415 }
 0x723   : > { %v2422_v61 = vpop.xlane.xlu2 %2421 }
 0x724   : > { %2431 = vmatpush.msrb.mxu3 %v2422_v61 }
 0x72b   : > { %v2413_v11 = vpop.xlane.xlu2 %2412 }
 0x733   : > { %v2419_v17 = vpop.xlane.xlu0 %2418  ;;  %v2404_v48 = vpop.xlane.xlu2 %2403 }
 0x734   : > { %2432 = vmatpush.msrb.mxu3 %v2419_v17 }
 0x736   : > { %2433 = vmatpush.msrb.mxu3 %v2416_v62  ;;  %v7829_v62 = vld [vmem:[#allocation37_spill] sm:$0xff] }
 0x738   : > { %2434 = vmatpush.msrb.mxu3 %v2413_v11 }
 0x73b   : > { %v2410_v4 = vpop.xlane.xlu0 %2409  ;;  %v2407_v42 = vpop.xlane.xlu1 %2406 }
 0x73c   : > { %2435 = vmatpush.msrb.mxu3 %v2410_v4 }
 0x73e   : > { %2436 = vmatpush.msrb.mxu3 %v2407_v42  ;;  %v7830_v42 = vld [vmem:[#allocation39_spill] sm:$0xff] }
 0x740   : > { %2437 = vmatpush.msrb.mxu3 %v2404_v48 }
 0x743   : > { %v2401_v60 = vpop.xlane.xlu0 %2400 }
 0x744   : > { %2438 = vmatpush.msrb.mxu3 %v2401_v60  ;;  %v7831_v60 = vld [vmem:[#allocation40_spill] sm:$0xff] }
 0x745   : > { %4099 = vmatmul.msk.f32.vlgmr.msrb.gmra.mxu3 %vm385_vm0, %v7823_v56 }
 0x74d   : > { %4100 = vmatmul.msk.f32.gmra.mxu3 %vm385_vm0, %v7824_v47 }
 0x753   : > { %v4245_v5 = vpop.permute.xlu1 %4244 }
 0x754   : > { %v6218_v41 = vunpack.i.h.bf16 %v4245_v5  ;;  %v6220_v13 = vunpack.i.l.bf16 %v4245_v5 }
 0x755   : > { %4101 = vmatmul.msk.f32.gmra.mxu3 %vm385_vm0, %v7827_v31 }
 0x756   : > { %7825 = vst [vmem:[#allocation72_spill] sm:$0xff] %v6218_v41  ;;  %v1386_v49 = vpop.permute.xlu0 %1385  ;;  %v1289_v25 = vmul.f32 %v6218_v41, %v7794_v12  ;;  %v1292_v61 = vmul.f32 %v6218_v41, %v7795_v14  ;;  %v6230_v17 = vsel %vm1282_vm9, %v6220_v13, %v6218_v41  ;;  %v1287_v11 = vmul.f32 %v6220_v13, %v7829_v62  ;;  %v7832_v62 = vld [vmem:[#allocation23_spill] sm:$0xff] }
 0x757   : > { %7826 = vst [vmem:[#allocation70_spill] sm:$0xff] %v6220_v13  ;;  %v1288_v4 = vmul.f32 %v6230_v17, %v7761_v27  ;;  %v1290_v48 = vmul.f32 %v6220_v13, %v7830_v42  ;;  %v1291_v56 = vmul.f32 %v6230_v17, %v7831_v60  ;;  %v1295_v14 = vmul.f32 %v6218_v41, %v7792_v30  ;;  %v7833_v27 = vld [vmem:[#allocation27_spill] sm:$0xff] }
 0x758   : > { %7828 = vst [vmem:[#allocation18_spill] sm:$0xff] %v6230_v17  ;;  %v1312_v12 = vpack.c.bf16 %v1289_v25, %v1289_v25  ;;  %v1314_v47 = vpack.c.bf16 %v1292_v61, %v1292_v61  ;;  %v1298_v5 = vmul.f32 %v6218_v41, %v7793_v24  ;;  %v1293_v57 = vmul.f32 %v6220_v13, %v7832_v62 }
 0x759   : > { %v1311_v31 = vpack.c.bf16 %v1288_v4, %v1287_v11  ;;  %v1313_v23 = vpack.c.bf16 %v1291_v56, %v1290_v48  ;;  %v1294_v63 = vmul.f32 %v6230_v17, %v7833_v27  ;;  %v1316_v43 = vpack.c.bf16 %v1295_v14, %v1295_v14  ;;  %v6250_v4 = vpop.f32.mrf.mxu3  ;;  %v7839_v27 = vld [vmem:[#allocation31_spill] sm:$0xff] }
 0x75a   : > { %v1888_v42 = vunpack.c.l.b16 %v1312_v12  ;;  %v1891_v34 = vunpack.c.l.b16 %v1314_v47  ;;  %v1318_v60 = vpack.c.bf16 %v1298_v5, %v1298_v5  ;;  %v7835_v12 = vld [vmem:[#allocation24_spill] sm:$0xff] }
 0x75b   : > { %v1398_v25 = vpop.permute.xlu1 %1397  ;;  %v1886_v61 = vunpack.c.l.b16 %v1311_v31  ;;  %v1889_v2 = vunpack.c.l.b16 %v1313_v23  ;;  %v1887_v55 = vunpack.c.h.b16 %v1311_v31  ;;  %v1890_v30 = vunpack.c.h.b16 %v1313_v23  ;;  %v7836_v5 = vld [vmem:[#allocation28_spill] sm:$0xff]  ;;  %v7837_v31 = vld [vmem:[#allocation65_spill] sm:$0xff] }
 0x75c   : > { %v1407_v24 = vsel %vm1399_vm15, %v7834_v8, %v1398_v25  ;;  %v1912_v11 = vpack.c.b16 %v1891_v34, %v1888_v42  ;;  %v1296_v47 = vmul.f32 %v6220_v13, %v7835_v12  ;;  %v1894_v23 = vunpack.c.l.b16 %v1316_v43  ;;  %v7844_v12 = vld [vmem:[#allocation46_spill] sm:$0xff] }
 0x75d   : > { %2134 = vmatpush.bf16.msrb.mxu1 %v1407_v24  ;;  %4102 = vmatmul.msk.f32.gmra.mxu3 %vm385_vm0, %v5898_v22  ;;  %v1910_v48 = vpack.c.b16 %v1889_v2, %v1886_v61  ;;  %v1911_v56 = vpack.c.b16 %v1890_v30, %v1887_v55  ;;  %v1297_v8 = vmul.f32 %v6230_v17, %v7836_v5  ;;  %v1897_v55 = vunpack.c.l.b16 %v1318_v60  ;;  %v7838_v2 = vld [vmem:[#allocation30_spill] sm:$0xff]  ;;  %v7840_v61 = vld [vmem:[#allocation32_spill] sm:$0xff]  ;;  %v7843_v60 = vld [vmem:[#allocation41_spill] sm:$0xff] }
 0x75e   : > { %1926 = vrot.lane.b32.xlu0 %v1912_v11, %s4477_s17  ;;  %v1392_v14 = vpop.permute.xlu0 %1391  ;;  %v1315_v34 = vpack.c.bf16 %v1294_v63, %v1293_v57  ;;  %v1305_v62 = vmul.f32 %v6220_v13, %v7838_v2  ;;  %v1306_v42 = vmul.f32 %v6230_v17, %v7839_v27  ;;  %v1308_v30 = vmul.f32 %v6220_v13, %v7840_v61  ;;  %v7841_v63 = vld [vmem:[#allocation33_spill] sm:$0xff]  ;;  %v7842_v11 = vld [vmem:[#allocation43_spill] sm:$0xff]  ;;  %v7846_v2 = vld [vmem:[#allocation64_spill] sm:$0xff]  ;;  %v1380_v61 = vpop.permute.xlu2 %1379 }
 0x75f   : > { %1922 = vrot.lane.b32.xlu1 %v1910_v48, %s4477_s17  ;;  %1924 = vrot.lane.b32.xlu2 %v1911_v56, %s4477_s17  ;;  %v1405_v22 = vsel %vm1399_vm15, %v7837_v31, %v1392_v14  ;;  %v1317_v25 = vpack.c.bf16 %v1297_v8, %v1296_v47  ;;  %v1309_v57 = vmul.f32 %v6230_v17, %v7841_v63  ;;  %v7845_v8 = vld [vmem:[#allocation42_spill] sm:$0xff] }
 0x760   : > { %v1892_v43 = vunpack.c.l.b16 %v1315_v34  ;;  %v1893_v24 = vunpack.c.h.b16 %v1315_v34  ;;  %v1299_v48 = vmul.f32 %v6220_v13, %v7842_v11  ;;  %v1300_v56 = vmul.f32 %v6230_v17, %v7843_v60 }
 0x761   : > { %2135 = vmatpush.bf16.msrb.mxu1 %v1405_v22  ;;  %v1302_v14 = vmul.f32 %v6220_v13, %v7844_v12  ;;  %v1895_v5 = vunpack.c.l.b16 %v1317_v25  ;;  %v1896_v47 = vunpack.c.h.b16 %v1317_v25  ;;  %v1303_v31 = vmul.f32 %v6230_v17, %v7845_v8  ;;  %v6284_v25 = vpop.f32.mrf.mxu3 }
 0x762   : > { %v1403_v27 = vsel %vm1399_vm15, %v7846_v2, %v1386_v49  ;;  %v1915_v22 = vpack.c.b16 %v1897_v55, %v1894_v23  ;;  %v1323_v34 = vpack.c.bf16 %v1306_v42, %v1305_v62  ;;  %v1325_v63 = vpack.c.bf16 %v1309_v57, %v1308_v30  ;;  %v7847_v49 = vld [vmem:[#allocation62_spill] sm:$0xff] }
 0x763   : > { %v1319_v37 = vpack.c.bf16 %v1300_v56, %v1299_v48  ;;  %v1913_v11 = vpack.c.b16 %v1895_v5, %v1892_v43  ;;  %v1914_v60 = vpack.c.b16 %v1896_v47, %v1893_v24  ;;  %v1321_v12 = vpack.c.bf16 %v1303_v31, %v1302_v14  ;;  %v7848_v14 = vld [vmem:[#allocation54_spill] sm:$0xff] }
 0x764   : > { %v1401_v23 = vsel %vm1399_vm15, %v7847_v49, %v1380_v61  ;;  %v1904_v55 = vunpack.c.l.b16 %v1323_v34  ;;  %v1907_v62 = vunpack.c.l.b16 %v1325_v63  ;;  %v1304_v24 = vmul.f32 %v6218_v41, %v7790_v53  ;;  %v7850_v53 = vld [vmem:[#allocation55_spill] sm:$0xff] }
 0x765   : > { %2136 = vmatpush.bf16.msrb.mxu1 %v1403_v27  ;;  %4103 = vmatmul.msk.f32.gmra.mxu3 %vm385_vm0, %v5922_v0  ;;  %v1898_v42 = vunpack.c.l.b16 %v1319_v37  ;;  %v1301_v0 = vmul.f32 %v6218_v41, %v7789_v21  ;;  %v1901_v43 = vunpack.c.l.b16 %v1321_v12  ;;  %v1899_v30 = vunpack.c.h.b16 %v1319_v37 }
 0x766   : > { %1932 = vrot.lane.b32.xlu0 %v1915_v22, %s4477_s17  ;;  %v1902_v57 = vunpack.c.h.b16 %v1321_v12  ;;  %v1919_v48 = vpack.c.b16 %v1907_v62, %v1904_v55  ;;  %v1322_v8 = vpack.c.bf16 %v1304_v24, %v1304_v24  ;;  %v1905_v21 = vunpack.c.h.b16 %v1323_v34  ;;  %v339_v22 = vld [vmem:[%s7510_s6] sm:$0xff]  ;;  %v340_v55 = vld [vmem:[%s7510_s6 + $0x8] sm:$0xff]  ;;  %v7853_v62 = vld [vmem:[#allocation38_spill] sm:$0xff] }
 0x767   : > { %1928 = vrot.lane.b32.xlu1 %v1913_v11, %s4477_s17  ;;  %1930 = vrot.lane.b32.xlu2 %v1914_v60, %s4477_s17  ;;  %v1320_v56 = vpack.c.bf16 %v1301_v0, %v1301_v0  ;;  %v1916_v5 = vpack.c.b16 %v1901_v43, %v1898_v42  ;;  %v1908_v37 = vunpack.c.h.b16 %v1325_v63  ;;  %v1310_v61 = vmul.f32 %v6218_v41, %v5448_v7  ;;  %v7851_v60 = vld [vmem:[#allocation56_spill] sm:$0xff]  ;;  %v342_v0 = vld [vmem:[%s7510_s6 + $0x18] sm:$0xff] }
 0x768   : > { %v1917_v47 = vpack.c.b16 %v1902_v57, %v1899_v30  ;;  %v1903_v27 = vunpack.c.l.b16 %v1322_v8  ;;  %v7854_v30 = vld [vmem:[#allocation73_spill] sm:$0xff]  ;;  %v6350_v8 = vpop.permute.xlu0 %1798 }
 0x769   : > { %2137 = vmatpush.bf16.msrb.mxu1 %v1401_v23  ;;  %v6300_v31 = vpop.f32.mrf.mxu3  ;;  %v1900_v2 = vunpack.c.l.b16 %v1320_v56  ;;  %v1920_v11 = vpack.c.b16 %v1908_v37, %v1905_v21  ;;  %v1326_v12 = vpack.c.bf16 %v1310_v61, %v1310_v61  ;;  %v6352_v21 = vpop.permute.xlu1 %1804 }
 0x76a   : > { %7849 = vst [vmem:[#allocation53_spill] sm:$0xff] %v6300_v31 }
 0x76b   : > { %v1918_v34 = vpack.c.b16 %v1903_v27, %v1900_v2  ;;  %v1909_v49 = vunpack.c.l.b16 %v1326_v12 }
 0x76d   : > { %2138 = vmatpush.bf16.msrb.mxu1 %v7848_v14  ;;  %4104 = vmatmul.msk.f32.gmra.mxu3 %vm385_vm0, %v5946_v16  ;;  %v1307_v16 = vmul.f32 %v6218_v41, %v5445_v39  ;;  %v7852_v39 = vld [vmem:[#allocation57_spill] sm:$0xff] }
 0x76e   : > { %1940 = vrot.lane.b32.xlu0 %v1919_v48, %s4477_s17 }
 0x76f   : > { %1934 = vrot.lane.b32.xlu1 %v1916_v5, %s4477_s17  ;;  %1936 = vrot.lane.b32.xlu2 %v1917_v47, %s4477_s17  ;;  %v1324_v63 = vpack.c.bf16 %v1307_v16, %v1307_v16 }
 0x770   : > { %v6358_v2 = vpop.permute.xlu0 %1833 }
 0x771   : > { %2139 = vmatpush.bf16.msrb.mxu1 %v7850_v53  ;;  %v1906_v7 = vunpack.c.l.b16 %v1324_v63  ;;  %v6316_v23 = vpop.f32.mrf.mxu3  ;;  %v6360_v16 = vpop.permute.xlu1 %1839 }
 0x773   : > { %v1921_v42 = vpack.c.b16 %v1909_v49, %v1906_v7 }
 0x775   : > { %2140 = vmatpush.bf16.msrb.mxu1 %v7851_v60  ;;  %4105 = vmatmul.msk.f32.gmra.mxu3 %vm385_vm0, %v5968_v35  ;;  %v341_v35 = vld [vmem:[%s7510_s6 + $0x10] sm:$0xff] }
 0x776   : > { %1965 = vperm.xlu0 %4220, %v339_v22  }
 0x777   : > { %1942 = vrot.lane.b32.xlu1 %v1920_v11, %s4477_s17  ;;  %1938 = vrot.lane.b32.xlu2 %v1918_v34, %s4477_s17 }
 0x778   : > { %v6365_v60 = vpop.permute.xlu0 %1851 }
 0x779   : > { %2141 = vmatpush.bf16.msrb.mxu1 %v7852_v39  ;;  %v6331_v43 = vpop.f32.mrf.mxu3 }
 0x77c   : > { %2142 = vmatmul.bf16.vlgmr.msrb.gmra.mxu1 %v7853_v62 }
 0x77d   : > { %4106 = vmatmul.msk.f32.gmra.mxu3 %vm385_vm0, %v5987_v36  ;;  %v6340_v36 = vpop.permute.xlu2 %1792 }
 0x77e   : > { %1970 = vperm.xlu0 %4220, %v340_v55  }
 0x77f   : > { %1975 = vperm.xlu1 %4221, %v341_v35   ;;  %1944 = vrot.lane.b32.xlu2 %v1921_v42, %s4477_s17 }
 0x781   : > { %v6334_v57 = vpop.f32.mrf.mxu3 }
 0x782   : > { %7855 = vst [vmem:[#allocation22_spill] sm:$0xff] %v6334_v57 }
 0x785   : > { %v6344_v14 = vpop.permute.xlu2 %1810 }
 0x787   : > { %1980 = vperm.xlu2 %4222, %v342_v0  }
 0x789   : > { %v6336_v24 = vpop.f32.mrf.mxu3 }
 0x78a   : > { %7856 = vst [vmem:[#allocation78_spill] sm:$0xff] %v6336_v24 }
 0x78c   : > { %2147 = vmatmul.bf16.gmra.mxu1 %v7854_v30 }
 0x78d   : > { %v6348_v47 = vpop.permute.xlu2 %1845 }
 0x791   : > { %v6338_v48 = vpop.f32.mrf.mxu3 }
 0x792   : > { %7857 = vst [vmem:[#allocation37_spill] sm:$0xff] %v6338_v48 }
 0x799   : > { %v6342_v56 = vpop.f32.mrf.mxu3 }
 0x79a   : > { %7858 = vst [vmem:[#allocation39_spill] sm:$0xff] %v6342_v56 }
 0x7a1   : > { %v6346_v5 = vpop.f32.mrf.mxu3 }
 0x7a2   : > { %7859 = vst [vmem:[#allocation40_spill] sm:$0xff] %v6346_v5 }
 0x7a9   : > { %v6354_v37 = vpop.f32.mrf.mxu3 }
 0x7aa   : > { %7860 = vst [vmem:[#allocation23_spill] sm:$0xff] %v6354_v37 }
 0x7b9   : > { %v6356_v53 = vpop.permute.xlu2 %1924 }
 0x7c1   : > { %v6363_v22 = vpop.permute.xlu2 %1930 }
 0x7c8   : > { %v2440_v27 = vpop.f32.mrf.mxu3 }
 0x7c9   : > { %v2464_v61 = vmul.f32 %v2440_v27, %v7804_v3  ;;  %v6370_v55 = vpop.permute.xlu2 %1936 }
 0x7cb   : > { %v2472_v11 = vadd.f32 1e-05, %v2464_v61 }
 0x7cd   : > { %4298 = vrsqrt.f32 %v2472_v11  ;;  %vm2486_vm11 = vweird.f32 %v2472_v11 }
 0x7d0   : > { %v2443_v34 = vpop.f32.mrf.mxu3  ;;  %v6372_v35 = vpop.permute.xlu0 %1926 }
 0x7d1   : > { %v2465_v63 = vmul.f32 %v2443_v34, %v7804_v3  ;;  %v6368_v12 = vpop.permute.xlu1 %1922  ;;  %v1939_v37 = vpop.permute.xlu2 %1938 }
 0x7d3   : > { %v4299_v39 = vpop.eup %4298  ;;  %v2473_v7 = vadd.f32 1e-05, %v2465_v63 }
 0x7d4   : > { %v2481_v49 = vmul.f32 %v4299_v39, %v2472_v11  ;;  %vm2487_vm10 = vweird.f32 %v4299_v39 }
 0x7d5   : > { %4300 = vrsqrt.f32 %v2473_v7  ;;  %vm2488_vm13 = vmor %vm2486_vm11, %vm2487_vm10  ;;  %vm2496_vm1 = vweird.f32 %v2473_v7  ;;  %vm1946_vm11 = vcmask 769024  }
 0x7d6   : > { %v2482_v42 = vmul.f32 %v4299_v39, %v2481_v49  ;;  %v4354_v49 = vld [vmem:[%s7505_s1] sm:$0xff] }
 0x7d8   : > { %v2483_v0 = vmul.f32 0.5, %v2482_v42  ;;  %v2446_v27 = vpop.f32.mrf.mxu3  ;;  %v1933_v56 = vpop.permute.xlu0 %1932 }
 0x7d9   : > { %v2466_v61 = vmul.f32 %v2446_v27, %v7804_v3  ;;  %v6375_v30 = vpop.permute.xlu1 %1928 }
 0x7da   : > { %v2484_v62 = vsub.f32 1.5, %v2483_v0 }
 0x7db   : > { %v4301_v34 = vpop.eup %4300  ;;  %v2474_v41 = vadd.f32 1e-05, %v2466_v61 }
 0x7dc   : > { %v2485_v17 = vmul.f32 %v4299_v39, %v2484_v62  ;;  %v2491_v63 = vmul.f32 %v4301_v34, %v2473_v7  ;;  %vm2497_vm14 = vweird.f32 %v4301_v34 }
 0x7dd   : > { %4302 = vrsqrt.f32 %v2474_v41  ;;  %vm2498_vm6 = vmor %vm2496_vm1, %vm2497_vm14  ;;  %vm2506_vm9 = vweird.f32 %v2474_v41 }
 0x7de   : > { %v2492_v13 = vmul.f32 %v4301_v34, %v2491_v63  ;;  %v2489_v5 = vsel %vm2488_vm13, %v4299_v39, %v2485_v17 }
 0x7df   : > { %v2560_v42 = vmul.f32 %v4354_v49, %v2489_v5 }
 0x7e0   : > { %v2493_v27 = vmul.f32 0.5, %v2492_v13  ;;  %v2449_v48 = vpop.f32.mrf.mxu3  ;;  %v4355_v13 = vld [vmem:[%s7505_s1 + $0x8] sm:$0xff] }
 0x7e1   : > { %v2467_v0 = vmul.f32 %v2449_v48, %v7804_v3  ;;  %v1935_v24 = vpop.permute.xlu1 %1934  ;;  %2570 = vperm.xlu0 %4220, %v2560_v42   ;;  %v1945_v48 = vpop.permute.xlu2 %1944 }
 0x7e2   : > { %v2494_v62 = vsub.f32 1.5, %v2493_v27  ;;  %v1941_v27 = vpop.permute.xlu0 %1940 }
 0x7e3   : > { %v4303_v11 = vpop.eup %4302  ;;  %v2475_v61 = vadd.f32 1e-05, %v2467_v0 }
 0x7e4   : > { %v2495_v31 = vmul.f32 %v4301_v34, %v2494_v62  ;;  %v2501_v63 = vmul.f32 %v4303_v11, %v2474_v41  ;;  %vm2507_vm10 = vweird.f32 %v4303_v11 }
 0x7e5   : > { %4304 = vrsqrt.f32 %v2475_v61  ;;  %vm2508_vm13 = vmor %vm2506_vm9, %vm2507_vm10  ;;  %vm2516_vm14 = vweird.f32 %v2475_v61 }
 0x7e6   : > { %v2502_v17 = vmul.f32 %v4303_v11, %v2501_v63  ;;  %v2499_v39 = vsel %vm2498_vm6, %v4301_v34, %v2495_v31 }
 0x7e7   : > { %v2561_v5 = vmul.f32 %v4355_v13, %v2499_v39  ;;  %v1951_v13 = vsel %vm1946_vm11, %v1935_v24, %v6370_v55  ;;  %v1949_v24 = vsel %vm1946_vm11, %v6375_v30, %v6363_v22 }
 0x7e8   : > { %v2503_v49 = vmul.f32 0.5, %v2502_v17  ;;  %v2452_v42 = vpop.f32.mrf.mxu3 }
 0x7e9   : > { %v2468_v0 = vmul.f32 %v2452_v42, %v7804_v3  ;;  %v1943_v7 = vpop.permute.xlu1 %1942  ;;  %2575 = vperm.xlu1 %4221, %v2561_v5   ;;  %v1952_v5 = vsel %vm1946_vm11, %v6370_v55, %v1939_v37  ;;  %v1950_v37 = vsel %vm1946_vm11, %v6363_v22, %v1933_v56  ;;  %v1947_v56 = vsel %vm1946_vm11, %v6368_v12, %v6356_v53  ;;  %v4357_v12 = vld [vmem:[%s7505_s1 + $0x18] sm:$0xff] }
 0x7ea   : > { %v2504_v62 = vsub.f32 1.5, %v2503_v49  ;;  %v1954_v63 = vsel %vm1946_vm11, %v1943_v7, %v1945_v48  ;;  %v1953_v31 = vsel %vm1946_vm11, %v1941_v27, %v1943_v7  ;;  %v4356_v48 = vld [vmem:[%s7505_s1 + $0x10] sm:$0xff] }
 0x7eb   : > { %v4305_v34 = vpop.eup %4304  ;;  %v2476_v57 = vadd.f32 1e-05, %v2468_v0  ;;  %2119 = vmatpush.bf16.msrb.mxu0 %v1953_v31  ;;  %2214 = vmatpush.bf16.msra.mxu1 %v1954_v63  ;;  %v4147_v31 = vld [vmem:[%s7509_s5 + $0x20] sm:$0xf0] }
 0x7ec   : > { %v2505_v41 = vmul.f32 %v4303_v11, %v2504_v62  ;;  %v2511_v17 = vmul.f32 %v4305_v34, %v2475_v61  ;;  %vm2517_vm1 = vweird.f32 %v4305_v34  ;;  %v4049_v61 = vld [vmem:[%s7509_s5 + $0x10] sm:$0xf] }
 0x7ed   : > { %4306 = vrsqrt.f32 %v2476_v57  ;;  %vm6400_vm6 = vmor %vm2516_vm14, %vm2517_vm1  ;;  %vm2526_vm9 = vweird.f32 %v2476_v57 }
 0x7ee   : > { %v2512_v39 = vmul.f32 %v4305_v34, %v2511_v17  ;;  %v2509_v49 = vsel %vm2508_vm13, %v4303_v11, %v2505_v41  ;;  %v1948_v17 = vsel %vm1946_vm11, %v6356_v53, %v6372_v35 }
 0x7ef   : > { %2120 = vmatpush.bf16.msrb.mxu0 %v1951_v13  ;;  %2215 = vmatpush.bf16.msra.mxu1 %v1952_v5  ;;  %v2562_v42 = vmul.f32 %v4356_v48, %v2509_v49  ;;  %v6418_v13 = vor.u32 %v4147_v31, %v4049_v61  ;;  %v1861_v5 = vsel %vm1853_vm7, %v5963_v26, %v6365_v60 }
 0x7f0   : > { %v2513_v27 = vmul.f32 0.5, %v2512_v39  ;;  %v2455_v0 = vpop.f32.mrf.mxu3 }
 0x7f1   : > { %v2469_v7 = vmul.f32 %v2455_v0, %v7804_v3  ;;  %2580 = vperm.xlu1 %4221, %v2562_v42   ;;  %7863 = vst [vmem:[#allocation27_spill] sm:$0xff] %v6418_v13 }
 0x7f2   : > { %v2514_v62 = vsub.f32 1.5, %v2513_v27 }
 0x7f3   : > { %v4307_v55 = vpop.eup %4306  ;;  %v2477_v63 = vadd.f32 1e-05, %v2469_v7  ;;  %2121 = vmatpush.bf16.msrb.mxu0 %v1949_v24  ;;  %2216 = vmatpush.bf16.msra.mxu1 %v1950_v37  ;;  %v4358_v24 = vld [vmem:[%s7505_s1 + $0x20] sm:$0xff] }
 0x7f4   : > { %v2515_v30 = vmul.f32 %v4305_v34, %v2514_v62  ;;  %v2521_v41 = vmul.f32 %v4307_v55, %v2476_v57  ;;  %vm2527_vm10 = vweird.f32 %v4307_v55  ;;  %v1859_v57 = vsel %vm1853_vm7, %v5997_v18, %v6348_v47 }
 0x7f5   : > { %4308 = vrsqrt.f32 %v2477_v63  ;;  %vm2528_vm13 = vmor %vm2526_vm9, %vm2527_vm10  ;;  %v1857_v62 = vsel %vm1853_vm7, %v6005_v50, %v6360_v16  ;;  %vm2536_vm14 = vweird.f32 %v2477_v63  ;;  %v1855_v50 = vsel %vm1853_vm7, %v6010_v29, %v6358_v2  ;;  %v4069_v16 = vld [vmem:[%s7509_s5 + $0x38] sm:$0xf]  ;;  %v4359_v2 = vld [vmem:[%s7505_s1 + $0x28] sm:$0xff] }
 0x7f6   : > { %v2522_v22 = vmul.f32 %v4307_v55, %v2521_v41  ;;  %v2519_v39 = vsel %vm6400_vm6, %v4305_v34, %v2515_v30  ;;  %v1820_v29 = vsel %vm1812_vm8, %v6035_v59, %v6344_v14  ;;  %v1818_v59 = vsel %vm1812_vm8, %v6031_v45, %v6352_v21 }
 0x7f7   : > { %2122 = vmatpush.bf16.msrb.mxu0 %v1947_v56  ;;  %2217 = vmatpush.bf16.msra.mxu1 %v1948_v17  ;;  %v2563_v49 = vmul.f32 %v4357_v12, %v2519_v39  ;;  %v1814_v21 = vsel %vm1812_vm8, %v6033_v46, %v6340_v36  ;;  %v6485_v46 = vpop.permute.xlu1 %1975 }
 0x7f8   : > { %v2523_v48 = vmul.f32 0.5, %v2522_v22  ;;  %v2458_v53 = vpop.f32.mrf.mxu3  ;;  %7868 = vst [vmem:[#allocation30_spill] sm:$0xff] %v6485_v46 }
 0x7f9   : > { %v2470_v35 = vmul.f32 %v2458_v53, %v7804_v3  ;;  %2585 = vperm.xlu2 %4222, %v2563_v49  }
 0x7fa   : > { %v2524_v34 = vsub.f32 1.5, %v2523_v48  ;;  %4071 = vmatmul.msk.bf16.vlgmr.msrb.gmra.mxu0 %vm385_vm0, %v6418_v13  ;;  %4073 = vmatmul.msk.bf16.vlgmr.msra.gmra.mxu1 %vm385_vm0, %v6418_v13 }
 0x7fb   : > { %2191 = vmatpush.bf16.msra.mxu0 %v1861_v5  ;;  %v4309_v26 = vpop.eup %4308  ;;  %v2478_v60 = vadd.f32 1e-05, %v2470_v35  ;;  %v1816_v35 = vsel %vm1812_vm8, %v6037_v51, %v6350_v8  ;;  %v4361_v51 = vld [vmem:[%s7505_s1 + $0x38] sm:$0xff] }
 0x7fc   : > { %v2525_v42 = vmul.f32 %v4307_v55, %v2524_v34  ;;  %v2531_v27 = vmul.f32 %v4309_v26, %v2477_v63  ;;  %vm2537_vm1 = vweird.f32 %v4309_v26  ;;  %v4152_v63 = vld [vmem:[%s7509_s5 + $0x48] sm:$0xf0]  ;;  %v4360_v34 = vld [vmem:[%s7505_s1 + $0x30] sm:$0xff] }
 0x7fd   : > { %4310 = vrsqrt.f32 %v2478_v60  ;;  %vm2538_vm6 = vmor %vm2536_vm14, %vm2537_vm1  ;;  %v6450_v22 = vor.u32 %v4152_v63, %v4069_v16  ;;  %vm2546_vm9 = vweird.f32 %v2478_v60 }
 0x7fe   : > { %v2532_v0 = vmul.f32 %v4309_v26, %v2531_v27  ;;  %v2529_v7 = vsel %vm2528_vm13, %v4307_v55, %v2525_v42  ;;  %v6479_v27 = vpop.permute.xlu0 %1965 }
 0x7ff   : > { %2192 = vmatpush.bf16.msra.mxu0 %v1859_v57  ;;  %v2564_v37 = vmul.f32 %v4358_v24, %v2529_v7  ;;  %7864 = vst [vmem:[#allocation63_spill] sm:$0xff] %v6450_v22 }
 0x800   : > { %v2533_v11 = vmul.f32 0.5, %v2532_v0  ;;  %v2461_v18 = vpop.f32.mrf.mxu3  ;;  %7865 = vst [vmem:[#allocation24_spill] sm:$0xff] %v6479_v27  ;;  %v6481_v0 = vpop.permute.xlu2 %1980 }
 0x801   : > { %v2471_v47 = vmul.f32 %v2461_v18, %v7804_v3  ;;  %2590 = vperm.xlu2 %4222, %v2564_v37   ;;  %7866 = vst [vmem:[#allocation28_spill] sm:$0xff] %v6481_v0 }
 0x802   : > { %v2534_v61 = vsub.f32 1.5, %v2533_v11 }
 0x803   : > { %2193 = vmatpush.bf16.msra.mxu0 %v1857_v62  ;;  %v4311_v31 = vpop.eup %4310  ;;  %v2479_v55 = vadd.f32 1e-05, %v2471_v47  ;;  %v7869_v47 = vld [vmem:[#allocation16_spill] sm:$0xff] }
 0x804   : > { %v2535_v30 = vmul.f32 %v4309_v26, %v2534_v61  ;;  %v2541_v41 = vmul.f32 %v4311_v31, %v2478_v60  ;;  %vm2547_vm10 = vweird.f32 %v4311_v31 }
 0x805   : > { %4312 = vrsqrt.f32 %v2479_v55  ;;  %vm2548_vm13 = vmor %vm2546_vm9, %vm2547_vm10  ;;  %vm2556_vm14 = vweird.f32 %v2479_v55 }
 0x806   : > { %v2542_v3 = vmul.f32 %v4311_v31, %v2541_v41  ;;  %v2539_v56 = vsel %vm2538_vm6, %v4309_v26, %v2535_v30  ;;  %v6483_v7 = vpop.permute.xlu0 %1970 }
 0x807   : > { %2194 = vmatpush.bf16.msra.mxu0 %v1855_v50  ;;  %v2565_v17 = vmul.f32 %v4359_v2, %v2539_v56  ;;  %7867 = vst [vmem:[#allocation65_spill] sm:$0xff] %v6483_v7  ;;  %v7871_v2 = vld [vmem:[#allocation17_spill] sm:$0xff] }
 0x808   : > { %v2543_v39 = vmul.f32 0.5, %v2542_v3 }
 0x809   : > { %2595 = vperm.xlu0 %4220, %v2565_v17  }
 0x80a   : > { %v2544_v5 = vsub.f32 1.5, %v2543_v39  ;;  %4072 = vmatmul.msk.bf16.gmra.mxu0 %vm385_vm0, %v6450_v22  ;;  %4074 = vmatmul.msk.bf16.gmra.mxu1 %vm385_vm0, %v6450_v22 }
 0x80b   : > { %2195 = vmatpush.bf16.msra.mxu0 %v1820_v29  ;;  %v4313_v12 = vpop.eup %4312 }
 0x80c   : > { %v2545_v14 = vmul.f32 %v4311_v31, %v2544_v5  ;;  %v2551_v49 = vmul.f32 %v4313_v12, %v2479_v55  ;;  %vm2557_vm1 = vweird.f32 %v4313_v12  ;;  %v7870_v55 = vld [vmem:[#allocation15_spill] sm:$0xff] }
 0x80d   : > { %vm2558_vm6 = vmor %vm2556_vm14, %vm2557_vm1 }
 0x80e   : > { %v2552_v48 = vmul.f32 %v4313_v12, %v2551_v49  ;;  %v2549_v53 = vsel %vm2548_vm13, %v4311_v31, %v2545_v14 }
 0x80f   : > { %2196 = vmatpush.bf16.msra.mxu0 %v1818_v59  ;;  %v2566_v26 = vmul.f32 %v4360_v34, %v2549_v53 }
 0x810   : > { %v2553_v60 = vmul.f32 0.5, %v2552_v48 }
 0x811   : > { %2600 = vperm.xlu0 %4220, %v2566_v26  }
 0x812   : > { %v2554_v45 = vsub.f32 1.5, %v2553_v60  ;;  %v7872_v60 = vld [vmem:[#allocation13_spill] sm:$0xff] }
 0x813   : > { %2197 = vmatpush.bf16.msra.mxu0 %v1816_v35 }
 0x814   : > { %v2555_v57 = vmul.f32 %v4313_v12, %v2554_v45 }
 0x816   : > { %v2559_v42 = vsel %vm2558_vm6, %v4313_v12, %v2555_v57 }
 0x817   : > { %2198 = vmatpush.bf16.msra.mxu0 %v1814_v21  ;;  %v2567_v8 = vmul.f32 %v4361_v51, %v2559_v42  ;;  %v7873_v51 = vld [vmem:[#allocation75_spill] sm:$0xff] }
 0x819   : > { %2605 = vperm.xlu1 %4221, %v2567_v8   ;;  %v2049_v8 = vadd.f32 %v7873_v51, %v6479_v27 }
 0x81a   : > { %2199 = vmatmul.bf16.vlgmr.msra.gmra.mxu0 %v6171_v15 }
 0x82a   : > { %2204 = vmatmul.bf16.gmra.mxu0 %v6195_v1 }
 0x853   : > { %v2571_v36 = vpop.permute.xlu0 %2570  ;;  %v2586_v62 = vpop.permute.xlu2 %2585 }
 0x854   : > { %v2608_v24 = vmul.f32 %v2571_v36, %v6144_v38  ;;  %v2609_v37 = vmul.f32 %v2571_v36, %v6147_v6  ;;  %v2614_v11 = vmul.f32 %v2586_v62, %v6120_v54  ;;  %v2615_v18 = vmul.f32 %v2586_v62, %v6123_v44 }
 0x856   : > { %v2624_v61 = vadd.f32 %v2608_v24, %v7869_v47  ;;  %v2625_v31 = vadd.f32 %v2609_v37, %v7869_v47  ;;  %v6494_v50 = vadd.f32 %v2614_v11, %v7870_v55  ;;  %v6497_v16 = vadd.f32 %v2615_v18, %v7870_v55  ;;  %v6512_v55 = vpop.f32.mrf.mxu1 }
 0x858   : > { %v2656_v63 = vmin.f32 %v2624_v61, 0.0  ;;  %v2657_v30 = vmin.f32 %v2625_v31, 0.0  ;;  %v2662_v6 = vmin.f32 %v6494_v50, 0.0  ;;  %v2663_v54 = vmin.f32 %v6497_v16, 0.0 }
 0x859   : > { %vm2640_vm9 = vcmp.gt.f32.partialorder %v2624_v61, 0.0  ;;  %vm2641_vm10 = vcmp.gt.f32.partialorder %v2625_v31, 0.0  ;;  %vm2646_vm1 = vcmp.gt.f32.partialorder %v6494_v50, 0.0  ;;  %vm2647_vm6 = vcmp.gt.f32.partialorder %v6497_v16, 0.0 }
 0x85a   : > { %v2672_v41 = vmul.f32 1.442695, %v2656_v63  ;;  %v2674_v38 = vmul.f32 1.442695, %v2657_v30  ;;  %v2684_v29 = vmul.f32 1.442695, %v2662_v6  ;;  %v2068_v6 = vadd.f32 %v6216_v32, %v2049_v8 }
 0x85b   : > { %v2576_v3 = vpop.permute.xlu1 %2575  ;;  %v2686_v5 = vmul.f32 1.442695, %v2663_v54  ;;  %v2591_v21 = vpop.permute.xlu2 %2590 }
 0x85c   : > { %4314 = vpow2.f32 %v2672_v41  ;;  %v2610_v44 = vmul.f32 %v2576_v3, %v6106_v28  ;;  %v2611_v56 = vmul.f32 %v2576_v3, %v6109_v10  ;;  %v2616_v11 = vmul.f32 %v2591_v21, %v6090_v52 }
 0x85d   : > { %4316 = vpow2.f32 %v2674_v38  ;;  %v2617_v30 = vmul.f32 %v2591_v21, %v6093_v33  ;;  %v7875_v33 = vld [vmem:[#allocation80_spill] sm:$0xff] }
 0x85e   : > { %v2626_v17 = vadd.f32 %v2610_v44, %v7871_v2  ;;  %v2627_v39 = vadd.f32 %v2611_v56, %v7871_v2  ;;  %4318 = vpow2.f32 %v2684_v29  ;;  %v7874_v44 = vld [vmem:[#allocation14_spill] sm:$0xff]  ;;  %v6532_v21 = vpop.f32.mrf.mxu1 }
 0x85f   : > { %4320 = vpow2.f32 %v2686_v5  ;;  %v6517_v56 = vadd.f32 %v2616_v11, %v7874_v44  ;;  %v6520_v2 = vadd.f32 %v2617_v30, %v7874_v44  ;;  %v2051_v5 = vadd.f32 %v7875_v33, %v6483_v7 }
 0x860   : > { %v2658_v12 = vmin.f32 %v2626_v17, 0.0  ;;  %v2659_v59 = vmin.f32 %v2627_v39, 0.0  ;;  %vm2642_vm13 = vcmp.gt.f32.partialorder %v2626_v17, 0.0  ;;  %vm2643_vm14 = vcmp.gt.f32.partialorder %v2627_v39, 0.0 }
 0x862   : > { %v4315_v14 = vpop.eup %4314  ;;  %v2676_v49 = vmul.f32 1.442695, %v2658_v12  ;;  %v2678_v48 = vmul.f32 1.442695, %v2659_v59 }
 0x863   : > { %v4317_v53 = vpop.eup %4316  ;;  %v2581_v35 = vpop.permute.xlu1 %2580  ;;  %v4107_v34 = vadd.f32 -1.0, %v4315_v14 }
 0x864   : > { %4322 = vpow2.f32 %v2676_v49  ;;  %v2612_v28 = vmul.f32 %v2581_v35, %v6128_v20  ;;  %v2613_v10 = vmul.f32 %v2581_v35, %v6131_v40  ;;  %v4108_v26 = vadd.f32 -1.0, %v4317_v53  ;;  %v4319_v42 = vpop.eup %4318 }
 0x865   : > { %4324 = vpow2.f32 %v2678_v48  ;;  %v4321_v62 = vpop.eup %4320  ;;  %v2720_v37 = vsel %vm2640_vm9, %v2624_v61, %v4107_v34  ;;  %v4113_v61 = vadd.f32 -1.0, %v4319_v42  ;;  %v2664_v48 = vmin.f32 %v6517_v56, 0.0 }
 0x866   : > { %v2628_v45 = vadd.f32 %v2612_v28, %v7872_v60  ;;  %v2629_v57 = vadd.f32 %v2613_v10, %v7872_v60  ;;  %v2721_v40 = vsel %vm2641_vm10, %v2625_v31, %v4108_v26  ;;  %v4114_v31 = vadd.f32 -1.0, %v4321_v62 }
 0x867   : > { %v2736_v54 = vpack.c.bf16 %v2721_v40, %v2720_v37  ;;  %v2726_v14 = vsel %vm2646_vm1, %v6494_v50, %v4113_v61  ;;  %v2087_v53 = vadd.f32 %v5976_v9, %v2068_v6  ;;  %v2665_v28 = vmin.f32 %v6520_v2, 0.0 }
 0x868   : > { %v2660_v36 = vmin.f32 %v2628_v45, 0.0  ;;  %v2661_v24 = vmin.f32 %v2629_v57, 0.0  ;;  %v2727_v49 = vsel %vm2647_vm6, %v6497_v16, %v4114_v31  ;;  %vm2644_vm9 = vcmp.gt.f32.partialorder %v2628_v45, 0.0 }
 0x869   : > { %v2753_v32 = vunpack.c.h.b16 %v2736_v54  ;;  %v2752_v12 = vunpack.c.l.b16 %v2736_v54  ;;  %v2739_v42 = vpack.c.bf16 %v2727_v49, %v2726_v14  ;;  %vm2645_vm10 = vcmp.gt.f32.partialorder %v2629_v57, 0.0  ;;  %v7880_v49 = vld [vmem:[#allocation50_spill] sm:$0xff] }
 0x86a   : > { %v4323_v20 = vpop.eup %4322  ;;  %v2680_v18 = vmul.f32 1.442695, %v2660_v36  ;;  %v2682_v41 = vmul.f32 1.442695, %v2661_v24  ;;  %v2688_v16 = vmul.f32 1.442695, %v2664_v48  ;;  %v2106_v51 = vadd.f32 %v6316_v23, %v2087_v53 }
 0x86b   : > { %v4325_v47 = vpop.eup %4324  ;;  %v4109_v63 = vadd.f32 -1.0, %v4323_v20  ;;  %v2690_v8 = vmul.f32 1.442695, %v2665_v28  ;;  %v2070_v24 = vadd.f32 %v6250_v4, %v2051_v5  ;;  %v2759_v40 = vunpack.c.h.b16 %v2739_v42  ;;  %v7876_v4 = vld [vmem:[#allocation59_spill] sm:$0xff] }
 0x86c   : > { %v4110_v38 = vadd.f32 -1.0, %v4325_v47  ;;  %4326 = vpow2.f32 %v2680_v18  ;;  %v2758_v18 = vunpack.c.l.b16 %v2739_v42 }
 0x86d   : > { %v2722_v3 = vsel %vm2642_vm13, %v2626_v17, %v4109_v63  ;;  %4328 = vpow2.f32 %v2682_v41  ;;  %v2089_v63 = vadd.f32 %v6003_v19, %v2070_v24  ;;  %v7877_v41 = vld [vmem:[#allocation9_spill] sm:$0xff]  ;;  %vm2648_vm13 = vcmp.gt.f32.partialorder %v6517_v56, 0.0 }
 0x86e   : > { %v2723_v52 = vsel %vm2643_vm14, %v2627_v39, %v4110_v38  ;;  %4330 = vpow2.f32 %v2688_v16  ;;  %vm2649_vm14 = vcmp.gt.f32.partialorder %v6520_v2, 0.0  ;;  %v7885_v16 = vld [vmem:[#allocation53_spill] sm:$0xff] }
 0x86f   : > { %v2737_v29 = vpack.c.bf16 %v2723_v52, %v2722_v3  ;;  %4332 = vpow2.f32 %v2690_v8  ;;  %v6550_v3 = vpop.f32.mrf.mxu1  ;;  %v2108_v61 = vadd.f32 %v6331_v43, %v2089_v63  ;;  %v7881_v43 = vld [vmem:[#allocation81_spill] sm:$0xff] }
 0x871   : > { %v2755_v17 = vunpack.c.h.b16 %v2737_v29  ;;  %v2754_v59 = vunpack.c.l.b16 %v2737_v29 }
 0x872   : > { %v4327_v39 = vpop.eup %4326 }
 0x873   : > { %v4329_v35 = vpop.eup %4328  ;;  %v4111_v10 = vadd.f32 -1.0, %v4327_v39  ;;  %v2769_v34 = vpack.c.b16 %v2755_v17, %v2753_v32  ;;  %v2768_v26 = vpack.c.b16 %v2754_v59, %v2752_v12  ;;  %v7879_v12 = vld [vmem:[#allocation49_spill] sm:$0xff] }
 0x874   : > { %v4112_v60 = vadd.f32 -1.0, %v4329_v35  ;;  %v4331_v52 = vpop.eup %4330  ;;  %v2056_v59 = vadd.f32 %v7879_v12, %v6481_v0 }
 0x875   : > { %v2724_v50 = vsel %vm2644_vm9, %v2628_v45, %v4111_v10  ;;  %2778 = vrot.lane.b32.xlu2 %v2769_v34, %s4464_s12  ;;  %2776 = vrot.lane.b32.xlu1 %v2768_v26, %s4464_s12  ;;  %v2054_v45 = vadd.f32 %v5928_v58, %v6485_v46  ;;  %v7878_v58 = vld [vmem:[#allocation11_spill] sm:$0xff]  ;;  %v4333_v33 = vpop.eup %4332  ;;  %v4115_v39 = vadd.f32 -1.0, %v4331_v52  ;;  %v7883_v10 = vld [vmem:[#allocation10_spill] sm:$0xff] }
 0x876   : > { %v2725_v9 = vsel %vm2645_vm10, %v2629_v57, %v4112_v60  ;;  %v4116_v53 = vadd.f32 -1.0, %v4333_v33  ;;  %v7884_v60 = vld [vmem:[#allocation22_spill] sm:$0xff] }
 0x877   : > { %v2738_v36 = vpack.c.bf16 %v2725_v9, %v2724_v50  ;;  %v2124_v62 = vpop.f32.mrf.mxu0  ;;  %v2073_v19 = vadd.f32 %v6284_v25, %v2054_v45  ;;  %v7882_v25 = vld [vmem:[#allocation82_spill] sm:$0xff]  ;;  %v2075_v9 = vadd.f32 %v7885_v16, %v2056_v59  ;;  %v6574_v24 = vpop.f32.mrf.mxu1 }
 0x878   : > { %v2125_v20 = vadd.f32 %v2124_v62, %v2106_v51  ;;  %v2728_v51 = vsel %vm2648_vm13, %v6517_v56, %v4115_v39  ;;  %v2729_v8 = vsel %vm2649_vm14, %v6520_v2, %v4116_v53  ;;  %v7887_v2 = vld [vmem:[#allocation36_spill] sm:$0xff] }
 0x879   : > { %v2757_v37 = vunpack.c.h.b16 %v2738_v36  ;;  %v2756_v11 = vunpack.c.l.b16 %v2738_v36  ;;  %v2092_v48 = vadd.f32 %v7880_v49, %v2073_v19  ;;  %v2740_v45 = vpack.c.bf16 %v2729_v8, %v2728_v51 }
 0x87a   : > { %2229 = vst [vmem:[%s6540_s10] sm:$0xff] %v2125_v20 }
 0x87b   : > { %v2596_v23 = vpop.permute.xlu0 %2595  ;;  %v2771_v57 = vpack.c.b16 %v2759_v40, %v2757_v37  ;;  %v2770_v47 = vpack.c.b16 %v2758_v18, %v2756_v11  ;;  %v2111_v42 = vadd.f32 %v7884_v60, %v2092_v48  ;;  %v2761_v12 = vunpack.c.h.b16 %v2740_v45 }
 0x87c   : > { %v2618_v30 = vmul.f32 %v2596_v23, %v7876_v4  ;;  %v2619_v38 = vmul.f32 %v2596_v23, %v7877_v41 }
 0x87d   : > { %2782 = vrot.lane.b32.xlu0 %v2771_v57, %s4464_s12  ;;  %2780 = vrot.lane.b32.xlu2 %v2770_v47, %s4464_s12  ;;  %v7886_v47 = vld [vmem:[#allocation60_spill] sm:$0xff] }
 0x87e   : > { %v2634_v6 = vadd.f32 %v2618_v30, %v7878_v58  ;;  %v2635_v54 = vadd.f32 %v2619_v38, %v7878_v58  ;;  %v2094_v56 = vadd.f32 %v7886_v47, %v2075_v9  ;;  %v7888_v30 = vld [vmem:[#allocation48_spill] sm:$0xff]  ;;  %v2144_v58 = vadd.f32 %v6512_v55, %v6479_v27  ;;  %v7891_v55 = vld [vmem:[#allocation61_spill] sm:$0xff] }
 0x87f   : > { %v2126_v31 = vpop.f32.mrf.mxu0  ;;  %v2219_v49 = vpop.f32.mrf.mxu1  ;;  %v2149_v47 = vadd.f32 %v6550_v3, %v6485_v46 }
 0x880   : > { %v2666_v44 = vmin.f32 %v2634_v6, 0.0  ;;  %v2667_v29 = vmin.f32 %v2635_v54, 0.0  ;;  %v2127_v5 = vadd.f32 %v2126_v31, %v2108_v61  ;;  %vm2650_vm1 = vcmp.gt.f32.partialorder %v2634_v6, 0.0  ;;  %v7889_v31 = vld [vmem:[#allocation12_spill] sm:$0xff] }
 0x881   : > { %vm2651_vm6 = vcmp.gt.f32.partialorder %v2635_v54, 0.0 }
 0x882   : > { %v2692_v32 = vmul.f32 1.442695, %v2666_v44  ;;  %v2694_v17 = vmul.f32 1.442695, %v2667_v29  ;;  %2231 = vst [vmem:[%s6540_s10 + $0x10] sm:$0xff] %v2127_v5  ;;  %v7890_v29 = vld [vmem:[#allocation78_spill] sm:$0xff] }
 0x883   : > { %v2601_v14 = vpop.permute.xlu0 %2600  ;;  %v2113_v33 = vadd.f32 %v7890_v29, %v2094_v56 }
 0x884   : > { %4334 = vpow2.f32 %v2692_v32  ;;  %v2620_v35 = vmul.f32 %v2601_v14, %v7881_v43  ;;  %v2621_v28 = vmul.f32 %v2601_v14, %v7882_v25 }
 0x885   : > { %4336 = vpow2.f32 %v2694_v17 }
 0x886   : > { %v6561_v34 = vadd.f32 %v2620_v35, %v7883_v10  ;;  %v6564_v26 = vadd.f32 %v2621_v28, %v7883_v10  ;;  %v2146_v10 = vadd.f32 %v6532_v21, %v6483_v7 }
 0x887   : > { %v2129_v50 = vpop.f32.mrf.mxu0 }
 0x888   : > { %v2668_v36 = vmin.f32 %v6561_v34, 0.0  ;;  %v2669_v62 = vmin.f32 %v6564_v26, 0.0  ;;  %v2130_v20 = vadd.f32 %v2129_v50, %v2111_v42  ;;  %v7892_v50 = vld [vmem:[#allocation37_spill] sm:$0xff]  ;;  %vm2652_vm9 = vcmp.gt.f32.partialorder %v6561_v34, 0.0 }
 0x889   : > { %vm2653_vm10 = vcmp.gt.f32.partialorder %v6564_v26, 0.0 }
 0x88a   : > { %v4335_v37 = vpop.eup %4334  ;;  %v2696_v40 = vmul.f32 1.442695, %v2668_v36  ;;  %v2698_v11 = vmul.f32 1.442695, %v2669_v62  ;;  %2233 = vst [vmem:[%s6540_s10 + $0x20] sm:$0xff] %v2130_v20  ;;  %v7893_v36 = vld [vmem:[#allocation35_spill] sm:$0xff] }
 0x88b   : > { %v4337_v18 = vpop.eup %4336  ;;  %v4117_v23 = vadd.f32 -1.0, %v4335_v37  ;;  %v2606_v57 = vpop.permute.xlu1 %2605  ;;  %v2165_v62 = vadd.f32 %v7893_v36, %v2146_v10 }
 0x88c   : > { %v4118_v63 = vadd.f32 -1.0, %v4337_v18  ;;  %4338 = vpow2.f32 %v2696_v40  ;;  %v2622_v4 = vmul.f32 %v2606_v57, %v7887_v2  ;;  %v2623_v41 = vmul.f32 %v2606_v57, %v7888_v30  ;;  %v2221_v18 = vpop.f32.mrf.mxu1 }
 0x88d   : > { %v2730_v38 = vsel %vm2650_vm1, %v2634_v6, %v4117_v23  ;;  %4340 = vpow2.f32 %v2698_v11  ;;  %v2760_v6 = vunpack.c.l.b16 %v2740_v45 }
 0x88e   : > { %v2731_v61 = vsel %vm2651_vm6, %v2635_v54, %v4118_v63  ;;  %v2638_v19 = vadd.f32 %v2622_v4, %v7889_v31  ;;  %v2639_v52 = vadd.f32 %v2623_v41, %v7889_v31  ;;  %v2163_v54 = vadd.f32 %v7891_v55, %v2144_v58  ;;  %v7894_v63 = vld [vmem:[#allocation39_spill] sm:$0xff] }
 0x88f   : > { %v2741_v44 = vpack.c.bf16 %v2731_v61, %v2730_v38  ;;  %v2131_v5 = vpop.f32.mrf.mxu0  ;;  %v2184_v2 = vadd.f32 %v7894_v63, %v2165_v62  ;;  %v7895_v61 = vld [vmem:[#allocation34_spill] sm:$0xff] }
 0x890   : > { %v2670_v32 = vmin.f32 %v2638_v19, 0.0  ;;  %v2671_v17 = vmin.f32 %v2639_v52, 0.0  ;;  %v2132_v59 = vadd.f32 %v2131_v5, %v2113_v33  ;;  %v2182_v16 = vadd.f32 %v7892_v50, %v2163_v54 }
 0x891   : > { %v2763_v39 = vunpack.c.h.b16 %v2741_v44  ;;  %v2762_v14 = vunpack.c.l.b16 %v2741_v44  ;;  %vm2654_vm13 = vcmp.gt.f32.partialorder %v2638_v19, 0.0  ;;  %vm2655_vm14 = vcmp.gt.f32.partialorder %v2639_v52, 0.0 }
 0x892   : > { %v4339_v48 = vpop.eup %4338  ;;  %v2700_v53 = vmul.f32 1.442695, %v2670_v32  ;;  %v2702_v43 = vmul.f32 1.442695, %v2671_v17  ;;  %2235 = vst [vmem:[%s6540_s10 + $0x30] sm:$0xff] %v2132_v59  ;;  %v2168_v31 = vadd.f32 %v7895_v61, %v2149_v47 }
 0x893   : > { %v4341_v35 = vpop.eup %4340  ;;  %v2773_v25 = vpack.c.b16 %v2763_v39, %v2761_v12  ;;  %v2772_v28 = vpack.c.b16 %v2762_v14, %v2760_v6  ;;  %v4119_v60 = vadd.f32 -1.0, %v4339_v48  ;;  %v7897_v12 = vld [vmem:[#allocation58_spill] sm:$0xff]  ;;  %v7898_v6 = vld [vmem:[#allocation23_spill] sm:$0xff] }
 0x894   : > { %4342 = vpow2.f32 %v2700_v53  ;;  %v4120_v42 = vadd.f32 -1.0, %v4341_v35  ;;  %v2224_v3 = vpop.f32.mrf.mxu1 }
 0x895   : > { %4344 = vpow2.f32 %v2702_v43  ;;  %2786 = vrot.lane.b32.xlu1 %v2773_v25, %s4464_s12  ;;  %2784 = vrot.lane.b32.xlu0 %v2772_v28, %s4464_s12  ;;  %v2732_v20 = vsel %vm2652_vm9, %v6561_v34, %v4119_v60 }
 0x896   : > { %v2733_v37 = vsel %vm2653_vm10, %v6564_v26, %v4120_v42  ;;  %v7899_v42 = vld [vmem:[#allocation45_spill] sm:$0xff] }
 0x897   : > { %v2200_v9 = vpop.f32.mrf.mxu0  ;;  %v2742_v23 = vpack.c.bf16 %v2733_v37, %v2732_v20  ;;  %v7901_v20 = vld [vmem:[#allocation67_spill] sm:$0xff] }
 0x898   : > { %v2201_v51 = vadd.f32 %v2200_v9, %v2182_v16  ;;  %v7900_v16 = vld [vmem:[#allocation47_spill] sm:$0xff] }
 0x899   : > { %v2765_v30 = vunpack.c.h.b16 %v2742_v23  ;;  %v2764_v38 = vunpack.c.l.b16 %v2742_v23 }
 0x89a   : > { %v4343_v8 = vpop.eup %4342  ;;  %v2220_v40 = vadd.f32 %v2219_v49, %v2201_v51 }
 0x89b   : > { %v4345_v21 = vpop.eup %4344  ;;  %v4121_v11 = vadd.f32 -1.0, %v4343_v8 }
 0x89c   : > { %v4122_v45 = vadd.f32 -1.0, %v4345_v21  ;;  %2230 = vst [vmem:[%s6540_s10 + $0x8] sm:$0xff] %v2220_v40  ;;  %v2226_v48 = vpop.f32.mrf.mxu1  ;;  %v7902_v40 = vld [vmem:[#allocation68_spill] sm:$0xff] }
 0x89d   : > { %v2734_v57 = vsel %vm2654_vm13, %v2638_v19, %v4121_v11  ;;  %v2151_v19 = vadd.f32 %v6574_v24, %v6481_v0 }
 0x89e   : > { %v2735_v56 = vsel %vm2655_vm14, %v2639_v52, %v4122_v45  ;;  %v7896_v52 = vld [vmem:[#allocation40_spill] sm:$0xff] }
 0x89f   : > { %v2743_v34 = vpack.c.bf16 %v2735_v56, %v2734_v57  ;;  %v2202_v4 = vpop.f32.mrf.mxu0  ;;  %v2187_v5 = vadd.f32 %v7896_v52, %v2168_v31  ;;  %v2170_v59 = vadd.f32 %v7897_v12, %v2151_v19  ;;  %v7906_v52 = vld [vmem:[#allocation18_spill] sm:$0xff] }
 0x8a0   : > { %v2203_v26 = vadd.f32 %v2202_v4, %v2184_v2  ;;  %v7903_v2 = vld [vmem:[#allocation26_spill] sm:$0xff]  ;;  %v7904_v4 = vld [vmem:[#allocation29_spill] sm:$0xff] }
 0x8a1   : > { %v2767_v41 = vunpack.c.h.b16 %v2743_v34  ;;  %v2766_v58 = vunpack.c.l.b16 %v2743_v34  ;;  %v2189_v14 = vadd.f32 %v7898_v6, %v2170_v59 }
 0x8a2   : > { %v2222_v44 = vadd.f32 %v2221_v18, %v2203_v26 }
 0x8a3   : > { %v2775_v29 = vpack.c.b16 %v2767_v41, %v2765_v30  ;;  %v2774_v33 = vpack.c.b16 %v2766_v58, %v2764_v38 }
 0x8a4   : > { %2232 = vst [vmem:[%s6540_s10 + $0x18] sm:$0xff] %v2222_v44 }
 0x8a5   : > { %2790 = vrot.lane.b32.xlu2 %v2775_v29, %s4464_s12  ;;  %2788 = vrot.lane.b32.xlu1 %v2774_v33, %s4464_s12  ;;  %s7909_s12 = smov 96  }
 0x8a7   : > { %v2205_v32 = vpop.f32.mrf.mxu0 }
 0x8a8   : > { %v2206_v17 = vadd.f32 %v2205_v32, %v2187_v5 }
 0x8aa   : > { %v2225_v39 = vadd.f32 %v2224_v3, %v2206_v17  ;;  %v7905_v3 = vld [vmem:[#allocation70_spill] sm:$0xff] }
 0x8ac   : > { %2234 = vst [vmem:[%s6540_s10 + $0x28] sm:$0xff] %v2225_v39 }
 0x8af   : > { %v2207_v49 = vpop.f32.mrf.mxu0 }
 0x8b0   : > { %v2208_v55 = vadd.f32 %v2207_v49, %v2189_v14 }
 0x8b2   : > { %v2227_v54 = vadd.f32 %v2226_v48, %v2208_v55 }
 0x8b4   : > { %2236 = vst [vmem:[%s6540_s10 + $0x38] sm:$0xff] %v2227_v54 }
 0x8cf   : > { %v2779_v53 = vpop.permute.xlu2 %2778 }
 0x8d0   : > { %v6642_v57 = vsel %vm971_vm12, %v2779_v53, 0 }
 0x8e7   : > { %v2777_v43 = vpop.permute.xlu1 %2776 }
 0x8e8   : > { %v2792_v35 = vsel %vm971_vm12, %v2777_v43, %v2779_v53  ;;  %v2801_v24 = vsel %vm971_vm12, 0, %v2777_v43  ;;  %v2781_v43 = vpop.permute.xlu2 %2780 }
 0x8e9   : > { %v6614_v25 = vunpack.c.l.bf16 %v2801_v24  ;;  %v6616_v28 = vunpack.c.l.bf16 %v2792_v35  ;;  %v6618_v10 = vunpack.c.h.bf16 %v2801_v24  ;;  %v6620_v60 = vunpack.c.h.bf16 %v2792_v35  ;;  %3120 = vrot.lane.b32.xlu0 %v2801_v24, %s4467_s29  ;;  %3346 = vrot.lane.b32.xlu2 %v2792_v35, %s4470_s11 }
 0x8ea   : > { %3122 = vrot.lane.b32.xlu1 %v2792_v35, %s4467_s29 }
 0x8eb   : > { %v2912_v50 = vmul.f32 %v7899_v42, %v6614_v25  ;;  %v2913_v9 = vmul.f32 %v6616_v28, %v7900_v16  ;;  %v2915_v51 = vmul.f32 %v7899_v42, %v6618_v10  ;;  %v2916_v8 = vmul.f32 %v6620_v60, %v7900_v16 }
 0x8ec   : > { %v2872_v37 = vmul.f32 %v7901_v20, %v6614_v25  ;;  %v2873_v21 = vmul.f32 %v6616_v28, %v7902_v40  ;;  %v2875_v11 = vmul.f32 %v7901_v20, %v6618_v10  ;;  %v2876_v18 = vmul.f32 %v6620_v60, %v7902_v40 }
 0x8ed   : > { %v2936_v36 = vpack.c.bf16 %v2913_v9, %v2912_v50  ;;  %v2938_v62 = vpack.c.bf16 %v2916_v8, %v2915_v51  ;;  %v2952_v34 = vmul.f32 %v7903_v2, %v6614_v25  ;;  %v2953_v26 = vmul.f32 %v6616_v28, %v7904_v4 }
 0x8ee   : > { %v2896_v56 = vpack.c.bf16 %v2873_v21, %v2872_v37  ;;  %v2898_v63 = vpack.c.bf16 %v2876_v18, %v2875_v11  ;;  %v2955_v38 = vmul.f32 %v7903_v2, %v6618_v10  ;;  %v2956_v58 = vmul.f32 %v6620_v60, %v7904_v4 }
 0x8ef   : > { %v3268_v45 = vunpack.c.l.b16 %v2936_v36  ;;  %v3271_v23 = vunpack.c.l.b16 %v2938_v62  ;;  %v3269_v61 = vunpack.c.h.b16 %v2936_v36  ;;  %v3272_v44 = vunpack.c.h.b16 %v2938_v62  ;;  %v2783_v54 = vpop.permute.xlu0 %2782 }
 0x8f0   : > { %v3177_v30 = vunpack.c.h.b16 %v2896_v56  ;;  %v3180_v41 = vunpack.c.h.b16 %v2898_v63  ;;  %v2976_v29 = vpack.c.bf16 %v2953_v26, %v2952_v34  ;;  %v2978_v33 = vpack.c.bf16 %v2956_v58, %v2955_v38 }
 0x8f1   : > { %3124 = vrot.lane.b32.xlu0 %v6642_v57, %s4467_s29  ;;  %v3292_v47 = vpack.c.b16 %v3271_v23, %v3268_v45  ;;  %v3032_v19 = vmul.f32 %v7905_v3, %v6614_v25  ;;  %v3033_v5 = vmul.f32 %v6616_v28, %v7906_v52  ;;  %v3035_v32 = vmul.f32 %v7905_v3, %v6618_v10 }
 0x8f2   : > { %3570 = vrot.lane.b32.xlu1 %v2792_v35, %s4474_s9  ;;  %v3201_v31 = vpack.c.b16 %v3180_v41, %v3177_v30  ;;  %v3036_v17 = vmul.f32 %v6620_v60, %v7906_v52  ;;  %v3176_v12 = vunpack.c.l.b16 %v2896_v56  ;;  %v3179_v59 = vunpack.c.l.b16 %v2898_v63 }
 0x8f3   : > { %3304 = vrot.lane.b32.xlu2 %v3292_v47, %s4471_s18  ;;  %v3401_v39 = vunpack.c.h.b16 %v2976_v29  ;;  %v3404_v6 = vunpack.c.h.b16 %v2978_v33  ;;  %v3293_v14 = vpack.c.b16 %v3272_v44, %v3269_v61  ;;  %v3056_v49 = vpack.c.bf16 %v3033_v5, %v3032_v19 }
 0x8f4   : > { %v3058_v48 = vpack.c.bf16 %v3036_v17, %v3035_v32  ;;  %v3200_v55 = vpack.c.b16 %v3179_v59, %v3176_v12  ;;  %v2793_v50 = vsel %vm971_vm12, %v2781_v43, %v2783_v54  ;;  %v3400_v9 = vunpack.c.l.b16 %v2976_v29 }
 0x8f5   : > { %v3425_v53 = vpack.c.b16 %v3404_v6, %v3401_v39  ;;  %v3625_v35 = vunpack.c.h.b16 %v3056_v49  ;;  %v3403_v51 = vunpack.c.l.b16 %v2978_v33  ;;  %v6672_v8 = vsel %vm971_vm12, 0, %v2781_v43 }
 0x8f6   : > { %v3624_v36 = vunpack.c.l.b16 %v3056_v49  ;;  %v3627_v62 = vunpack.c.l.b16 %v3058_v48  ;;  %v6674_v37 = vunpack.c.l.bf16 %v2793_v50  ;;  %v6676_v21 = vunpack.c.h.bf16 %v2793_v50 }
 0x8f7   : > { %v3424_v18 = vpack.c.b16 %v3403_v51, %v3400_v9  ;;  %v6679_v45 = vunpack.c.l.bf16 %v6672_v8  ;;  %v6682_v23 = vunpack.c.h.bf16 %v6672_v8  ;;  %v6708_v32 = vsel %vm971_vm12, %v2783_v54, 0  ;;  %v7907_v51 = vld [vmem:[#allocation79_spill] sm:$0xff] }
 0x8f8   : > { %v3648_v47 = vpack.c.b16 %v3627_v62, %v3624_v36  ;;  %v2919_v56 = vmul.f32 %v6674_v37, %v7900_v16  ;;  %v2922_v63 = vmul.f32 %v6676_v21, %v7900_v16  ;;  %v2879_v61 = vmul.f32 %v6674_v37, %v7902_v40 }
 0x8f9   : > { %3568 = vrot.lane.b32.xlu0 %v2801_v24, %s4474_s9  ;;  %v2918_v34 = vmul.f32 %v7899_v42, %v6679_v45  ;;  %v2921_v26 = vmul.f32 %v7899_v42, %v6682_v23  ;;  %v2878_v44 = vmul.f32 %v7901_v20, %v6679_v45  ;;  %v2881_v29 = vmul.f32 %v7901_v20, %v6682_v23 }
 0x8fa   : > { %3344 = vrot.lane.b32.xlu1 %v2801_v24, %s4470_s11  ;;  %v3628_v24 = vunpack.c.h.b16 %v3058_v48  ;;  %v2959_v59 = vmul.f32 %v6674_v37, %v7904_v4  ;;  %v2962_v39 = vmul.f32 %v6676_v21, %v7904_v4  ;;  %v2958_v6 = vmul.f32 %v7903_v2, %v6679_v45 }
 0x8fb   : > { %3214 = vrot.lane.b32.xlu2 %v3201_v31, %s4472_s19  ;;  %v2940_v30 = vpack.c.bf16 %v2919_v56, %v2918_v34  ;;  %v2942_v41 = vpack.c.bf16 %v2922_v63, %v2921_v26  ;;  %v2882_v31 = vmul.f32 %v6676_v21, %v7902_v40  ;;  %v2900_v19 = vpack.c.bf16 %v2879_v61, %v2878_v44  ;;  %v7908_v63 = vld [vmem:[#allocation77_spill] sm:$0xff] }
 0x8fc   : > { %v3649_v11 = vpack.c.b16 %v3628_v24, %v3625_v35  ;;  %v2980_v54 = vpack.c.bf16 %v2959_v59, %v2958_v6  ;;  %v3042_v9 = vmul.f32 %v6676_v21, %v7906_v52  ;;  %v2999_v36 = vmul.f32 %v6674_v37, %v7907_v51 }
 0x8fd   : > { %v3275_v38 = vunpack.c.h.b16 %v2940_v30  ;;  %v3278_v58 = vunpack.c.h.b16 %v2942_v41  ;;  %v2902_v5 = vpack.c.bf16 %v2882_v31, %v2881_v29  ;;  %v3183_v17 = vunpack.c.h.b16 %v2900_v19 }
 0x8fe   : > { %v3274_v49 = vunpack.c.l.b16 %v2940_v30  ;;  %v3277_v48 = vunpack.c.l.b16 %v2942_v41  ;;  %v3407_v35 = vunpack.c.h.b16 %v2980_v54  ;;  %v3002_v62 = vmul.f32 %v6676_v21, %v7907_v51 }
 0x8ff   : > { %v3296_v33 = vpack.c.b16 %v3278_v58, %v3275_v38  ;;  %v3186_v12 = vunpack.c.h.b16 %v2902_v5  ;;  %v3185_v56 = vunpack.c.l.b16 %v2902_v5  ;;  %v2998_v34 = vmul.f32 %v7908_v63, %v6679_v45 }
 0x900   : > { %v3295_v43 = vpack.c.b16 %v3277_v48, %v3274_v49  ;;  %v3001_v26 = vmul.f32 %v7908_v63, %v6682_v23 }
 0x901   : > { %3306 = vrot.lane.b32.xlu0 %v3293_v14, %s4471_s18  ;;  %v2961_v14 = vmul.f32 %v7903_v2, %v6682_v23  ;;  %v3020_v58 = vpack.c.bf16 %v2999_v36, %v2998_v34 }
 0x902   : > { %3212 = vrot.lane.b32.xlu1 %v3200_v55, %s4472_s19  ;;  %v3204_v55 = vpack.c.b16 %v3186_v12, %v3183_v17  ;;  %v3022_v61 = vpack.c.bf16 %v3002_v62, %v3001_v26 }
 0x903   : > { %3438 = vrot.lane.b32.xlu2 %v3425_v53, %s4468_s8  ;;  %v2982_v53 = vpack.c.bf16 %v2962_v39, %v2961_v14  ;;  %v3499_v17 = vunpack.c.h.b16 %v3020_v58  ;;  %v3406_v39 = vunpack.c.l.b16 %v2980_v54 }
 0x904   : > { %v3502_v12 = vunpack.c.h.b16 %v3022_v61 }
 0x905   : > { %v3410_v24 = vunpack.c.h.b16 %v2982_v53  ;;  %v3409_v6 = vunpack.c.l.b16 %v2982_v53  ;;  %v3498_v53 = vunpack.c.l.b16 %v3020_v58 }
 0x907   : > { %v3428_v30 = vpack.c.b16 %v3410_v24, %v3407_v35  ;;  %v2785_v31 = vpop.permute.xlu0 %2784  ;;  %v6743_v44 = vpop.permute.xlu1 %2786  ;;  %v3427_v54 = vpack.c.b16 %v3409_v6, %v3406_v39  ;;  %v3501_v35 = vunpack.c.l.b16 %v3022_v61  ;;  %v7910_v39 = vld [vmem:[#allocation72_spill] sm:$0xff] }
 0x908   : > { %v6748_v5 = vsel %vm971_vm12, 0, %v2785_v31  ;;  %v6753_v59 = vsel %vm971_vm12, %v2785_v31, %v6743_v44  ;;  %v6797_v31 = vunpack.c.l.bf16 %v6708_v32 }
 0x909   : > { %3662 = vrot.lane.b32.xlu0 %v3649_v11, %s4477_s17  ;;  %v3038_v11 = vmul.f32 %v7905_v3, %v6679_v45  ;;  %v6756_v14 = vunpack.c.l.bf16 %v6748_v5  ;;  %v6759_v49 = vunpack.c.l.bf16 %v6753_v59  ;;  %v6762_v48 = vunpack.c.h.bf16 %v6748_v5 }
 0x90a   : > { %3436 = vrot.lane.b32.xlu1 %v3424_v18, %s4468_s8  ;;  %v3041_v18 = vmul.f32 %v7905_v3, %v6682_v23  ;;  %v3040_v6 = vmul.f32 %v7910_v39, %v6797_v31 }
 0x90b   : > { %3660 = vrot.lane.b32.xlu2 %v3648_v47, %s4477_s17  ;;  %v3182_v47 = vunpack.c.l.b16 %v2900_v19  ;;  %v2924_v24 = vmul.f32 %v7899_v42, %v6756_v14  ;;  %v2884_v26 = vmul.f32 %v7901_v20, %v6756_v14  ;;  %v2887_v58 = vmul.f32 %v7901_v20, %v6762_v48 }
 0x90c   : > { %v3062_v38 = vpack.c.bf16 %v3042_v9, %v3041_v18  ;;  %v2927_v9 = vmul.f32 %v7899_v42, %v6762_v48  ;;  %v3519_v18 = vpack.c.b16 %v3501_v35, %v3498_v53  ;;  %v2967_v35 = vmul.f32 %v7903_v2, %v6762_v48 }
 0x90d   : > { %v3203_v29 = vpack.c.b16 %v3185_v56, %v3182_v47 }
 0x90e   : > { %v3634_v19 = vunpack.c.h.b16 %v3062_v38 }
 0x911   : > { %3126 = vrot.lane.b32.xlu0 %v6672_v8, %s4467_s29 }
 0x912   : > { %3128 = vrot.lane.b32.xlu1 %v2793_v50, %s4467_s29 }
 0x913   : > { %3576 = vrot.lane.b32.xlu2 %v2793_v50, %s4474_s9 }
 0x919   : > { %3312 = vrot.lane.b32.xlu0 %v3296_v33, %s4471_s18 }
 0x91a   : > { %3130 = vrot.lane.b32.xlu1 %v6708_v32, %s4467_s29 }
 0x91b   : > { %3352 = vrot.lane.b32.xlu2 %v2793_v50, %s4470_s11  ;;  %v3039_v50 = vmul.f32 %v6674_v37, %v7906_v52 }
 0x91d   : > { %v3060_v41 = vpack.c.bf16 %v3039_v50, %v3038_v11  ;;  %v2925_v50 = vmul.f32 %v6759_v49, %v7900_v16  ;;  %v3633_v11 = vunpack.c.l.b16 %v3062_v38 }
 0x91f   : > { %v3631_v33 = vunpack.c.h.b16 %v3060_v41  ;;  %v3630_v62 = vunpack.c.l.b16 %v3060_v41  ;;  %v6778_v47 = vpack.c.bf16 %v2925_v50, %v2924_v24 }
 0x921   : > { %3220 = vrot.lane.b32.xlu0 %v3204_v55, %s4472_s19  ;;  %v6765_v55 = vunpack.c.h.bf16 %v6753_v59  ;;  %v3651_v34 = vpack.c.b16 %v3633_v11, %v3630_v62  ;;  %v3280_v41 = vunpack.c.l.b16 %v6778_v47 }
 0x922   : > { %3574 = vrot.lane.b32.xlu1 %v6672_v8, %s4474_s9 }
 0x923   : > { %3310 = vrot.lane.b32.xlu2 %v3295_v43, %s4471_s18  ;;  %v3520_v43 = vpack.c.b16 %v3502_v12, %v3499_v17  ;;  %v2928_v36 = vmul.f32 %v6765_v55, %v7900_v16  ;;  %v2888_v61 = vmul.f32 %v6765_v55, %v7902_v40  ;;  %v6802_v12 = vunpack.c.h.bf16 %v6708_v32 }
 0x924   : > { %v2968_v24 = vmul.f32 %v6765_v55, %v7904_v4 }
 0x925   : > { %v6780_v56 = vpack.c.bf16 %v2928_v36, %v2927_v9  ;;  %v2906_v17 = vpack.c.bf16 %v2888_v61, %v2887_v58  ;;  %v3043_v50 = vmul.f32 %v7910_v39, %v6802_v12  ;;  %v3061_v36 = vpack.c.bf16 %v3040_v6, %v3040_v6 }
 0x926   : > { %v3005_v61 = vmul.f32 %v6759_v49, %v7907_v51 }
 0x927   : > { %v3283_v38 = vunpack.c.l.b16 %v6780_v56  ;;  %v3192_v53 = vunpack.c.h.b16 %v2906_v17  ;;  %v3191_v58 = vunpack.c.l.b16 %v2906_v17 }
 0x929   : > { %3444 = vrot.lane.b32.xlu0 %v3428_v30, %s4468_s8  ;;  %v2885_v30 = vmul.f32 %v6759_v49, %v7902_v40 }
 0x92a   : > { %3350 = vrot.lane.b32.xlu1 %v6672_v8, %s4470_s11  ;;  %v3652_v8 = vpack.c.b16 %v3634_v19, %v3631_v33  ;;  %v3298_v33 = vpack.c.b16 %v3283_v38, %v3280_v41  ;;  %v6832_v41 = vunpack.c.l.b16 %v3061_v36 }
 0x92b   : > { %3218 = vrot.lane.b32.xlu2 %v3203_v29, %s4472_s19  ;;  %v6799_v29 = vpop.permute.xlu2 %2790  ;;  %v2904_v19 = vpack.c.bf16 %v2885_v30, %v2884_v26  ;;  %v6827_v26 = vsel %vm971_vm12, %v6743_v44, 0  ;;  %v3004_v30 = vmul.f32 %v7908_v63, %v6756_v14 }
 0x92c   : > { %v6934_v1 = vunpack.c.l.bf16 %v6827_v26  ;;  %v6937_v22 = vunpack.c.h.bf16 %v6827_v26 }
 0x92d   : > { %v3188_v38 = vunpack.c.l.b16 %v2904_v19 }
 0x931   : > { %3668 = vrot.lane.b32.xlu0 %v3652_v8, %s4477_s17  ;;  %v2964_v8 = vmul.f32 %v7903_v2, %v6756_v14 }
 0x932   : > { %3536 = vrot.lane.b32.xlu1 %v3520_v43, %s7909_s12  ;;  %v2965_v43 = vmul.f32 %v6759_v49, %v7904_v4 }
 0x933   : > { %3442 = vrot.lane.b32.xlu2 %v3427_v54, %s4468_s8  ;;  %v3189_v54 = vunpack.c.h.b16 %v2904_v19  ;;  %v3047_v19 = vmul.f32 %v7905_v3, %v6762_v48 }
 0x934   : > { %v2984_v11 = vpack.c.bf16 %v2965_v43, %v2964_v8  ;;  %v3007_v8 = vmul.f32 %v7908_v63, %v6762_v48  ;;  %v3008_v43 = vmul.f32 %v6765_v55, %v7907_v51 }
 0x935   : > { %v3207_v62 = vpack.c.b16 %v3192_v53, %v3189_v54  ;;  %v3206_v54 = vpack.c.b16 %v3191_v58, %v3188_v38  ;;  %v3048_v38 = vmul.f32 %v6765_v55, %v7906_v52 }
 0x936   : > { %v3413_v6 = vunpack.c.h.b16 %v2984_v11 }
 0x939   : > { %3534 = vrot.lane.b32.xlu0 %v3519_v18, %s7909_s12  ;;  %v2986_v18 = vpack.c.bf16 %v2968_v24, %v2967_v35  ;;  %v3024_v35 = vpack.c.bf16 %v3005_v61, %v3004_v30  ;;  %v3026_v24 = vpack.c.bf16 %v3008_v43, %v3007_v8  ;;  %v2789_v30 = vpop.permute.xlu1 %2788 }
 0x93a   : > { %3356 = vrot.lane.b32.xlu1 %v6748_v5, %s4470_s11 }
 0x93b   : > { %3666 = vrot.lane.b32.xlu2 %v3651_v34, %s4477_s17  ;;  %v3063_v34 = vpack.c.bf16 %v3043_v50, %v3043_v50  ;;  %v3416_v44 = vunpack.c.h.b16 %v2986_v18  ;;  %v3412_v50 = vunpack.c.l.b16 %v2984_v11  ;;  %v3415_v36 = vunpack.c.l.b16 %v2986_v18 }
 0x93c   : > { %v3505_v58 = vunpack.c.h.b16 %v3024_v35  ;;  %v3508_v61 = vunpack.c.h.b16 %v3026_v24 }
 0x93d   : > { %v3431_v53 = vpack.c.b16 %v3416_v44, %v3413_v6  ;;  %v3430_v18 = vpack.c.b16 %v3415_v36, %v3412_v50  ;;  %v3066_v44 = vpack.c.bf16 %v3048_v38, %v3047_v19  ;;  %v3281_v50 = vunpack.c.h.b16 %v6778_v47 }
 0x93e   : > { %v3523_v8 = vpack.c.b16 %v3508_v61, %v3505_v58  ;;  %v3284_v19 = vunpack.c.h.b16 %v6780_v56  ;;  %v3504_v58 = vunpack.c.l.b16 %v3024_v35  ;;  %v3507_v61 = vunpack.c.l.b16 %v3026_v24 }
 0x93f   : > { %v3639_v56 = vunpack.c.l.b16 %v3066_v44  ;;  %v2992_v24 = vmul.f32 %v7908_v63, %v6614_v25 }
 0x941   : > { %3134 = vrot.lane.b32.xlu0 %v6753_v59, %s4467_s29 }
 0x942   : > { %3316 = vrot.lane.b32.xlu1 %v3298_v33, %s4471_s18  ;;  %v6836_v33 = vunpack.c.l.b16 %v3063_v34  ;;  %v3045_v34 = vmul.f32 %v6759_v49, %v7906_v52 }
 0x943   : > { %3132 = vrot.lane.b32.xlu2 %v6748_v5, %s4467_s29  ;;  %v6821_v9 = vpop.permute.xlu2 %3346 }
 0x944   : > { %7911 = vst [vmem:[#allocation31_spill] sm:$0xff] %v6821_v9 }
 0x949   : > { %3582 = vrot.lane.b32.xlu0 %v6753_v59, %s4474_s9 }
 0x94a   : > { %3226 = vrot.lane.b32.xlu1 %v3207_v62, %s4472_s19  ;;  %v3044_v62 = vmul.f32 %v7905_v3, %v6756_v14 }
 0x94b   : > { %3136 = vrot.lane.b32.xlu2 %v6827_v26, %s4467_s29 }
 0x94c   : > { %v3064_v6 = vpack.c.bf16 %v3045_v34, %v3044_v62  ;;  %v2810_v62 = vsel %vm971_vm12, 0, %v2789_v30  ;;  %v3299_v34 = vpack.c.b16 %v3284_v19, %v3281_v50 }
 0x94d   : > { %v6846_v17 = vpop.permute.xlu2 %3304 }
 0x94e   : > { %7912 = vst [vmem:[#allocation32_spill] sm:$0xff] %v6846_v17  ;;  %v3636_v47 = vunpack.c.l.b16 %v3064_v6 }
 0x951   : > { %3224 = vrot.lane.b32.xlu0 %v3206_v54, %s4472_s19  ;;  %v3637_v54 = vunpack.c.h.b16 %v3064_v6  ;;  %v2993_v6 = vmul.f32 %v6616_v28, %v7907_v51 }
 0x952   : > { %3450 = vrot.lane.b32.xlu1 %v3431_v53, %s4468_s8  ;;  %v3640_v53 = vunpack.c.h.b16 %v3066_v44  ;;  %v2996_v44 = vmul.f32 %v6620_v60, %v7907_v51 }
 0x953   : > { %3580 = vrot.lane.b32.xlu2 %v6748_v5, %s4474_s9 }
 0x954   : > { %v3655_v36 = vpack.c.b16 %v3640_v53, %v3637_v54  ;;  %v2795_v54 = vsel %vm971_vm12, %v2789_v30, %v6799_v29  ;;  %v3654_v53 = vpack.c.b16 %v3639_v56, %v3636_v47  ;;  %v2995_v30 = vmul.f32 %v7908_v63, %v6618_v10 }
 0x955   : > { %v6860_v11 = vpop.permute.xlu2 %3214  ;;  %v6913_v47 = vsel %vm971_vm12, %v6799_v29, 0  ;;  %v3016_v56 = vpack.c.bf16 %v2993_v6, %v2992_v24 }
 0x956   : > { %7913 = vst [vmem:[#allocation33_spill] sm:$0xff] %v6860_v11 }
 0x957   : > { %v3493_v6 = vunpack.c.h.b16 %v3016_v56 }
 0x959   : > { %3448 = vrot.lane.b32.xlu0 %v3430_v18, %s4468_s8 }
 0x95a   : > { %3542 = vrot.lane.b32.xlu1 %v3523_v8, %s7909_s12  ;;  %v3522_v8 = vpack.c.b16 %v3507_v61, %v3504_v58  ;;  %v6907_v58 = vunpack.c.h.bf16 %v2810_v62  ;;  %v6909_v61 = vunpack.c.h.bf16 %v2795_v54 }
 0x95b   : > { %v6864_v43 = vpop.permute.xlu0 %3120  ;;  %3358 = vrot.lane.b32.xlu2 %v6753_v59, %s4470_s11 }
 0x95c   : > { %v6866_v0 = vpop.permute.xlu1 %3122  ;;  %v2933_v27 = vmul.f32 %v7899_v42, %v6907_v58  ;;  %v2934_v29 = vmul.f32 %v6909_v61, %v7900_v16 }
 0x95d   : > { %v6870_v5 = vpop.permute.xlu2 %3438 }
 0x95e   : > { %7914 = vst [vmem:[#allocation43_spill] sm:$0xff] %v6870_v5 }
 0x961   : > { %3674 = vrot.lane.b32.xlu0 %v3655_v36, %s4477_s17  ;;  %v6903_v36 = vunpack.c.l.bf16 %v2810_v62 }
 0x962   : > { %3138 = vrot.lane.b32.xlu1 %v2810_v62, %s4467_s29 }
 0x963   : > { %v6877_v38 = vpop.permute.xlu0 %3124  ;;  %3318 = vrot.lane.b32.xlu2 %v3299_v34, %s4471_s18  ;;  %v6905_v34 = vunpack.c.l.bf16 %v2795_v54  ;;  %v2930_v46 = vmul.f32 %v7899_v42, %v6903_v36 }
 0x964   : > { %7915 = vst [vmem:[#allocation41_spill] sm:$0xff] %v6877_v38  ;;  %v6879_v18 = vpop.permute.xlu1 %3570 }
 0x965   : > { %7916 = vst [vmem:[#allocation46_spill] sm:$0xff] %v6879_v18  ;;  %v6882_v59 = vpop.permute.xlu2 %3660  ;;  %v2931_v7 = vmul.f32 %v6905_v34, %v7900_v16 }
 0x966   : > { %7917 = vst [vmem:[#allocation42_spill] sm:$0xff] %v6882_v59  ;;  %v7925_v59 = vld [vmem:[#allocation25_spill] sm:$0xff] }
 0x967   : > { %v2948_v15 = vpack.c.bf16 %v2931_v7, %v2930_v46  ;;  %v2969_v5 = vmul.f32 %v7925_v59, %v6937_v22 }
 0x969   : > { %3540 = vrot.lane.b32.xlu0 %v3522_v8, %s7909_s12  ;;  %v3018_v8 = vpack.c.bf16 %v2996_v44, %v2995_v30  ;;  %v3286_v9 = vunpack.c.l.b16 %v2948_v15 }
 0x96a   : > { %3588 = vrot.lane.b32.xlu1 %v2795_v54, %s4474_s9 }
 0x96b   : > { %v6888_v50 = vpop.permute.xlu0 %3568  ;;  %3672 = vrot.lane.b32.xlu2 %v3654_v53, %s4477_s17  ;;  %v3496_v30 = vunpack.c.h.b16 %v3018_v8 }
 0x96c   : > { %7918 = vst [vmem:[#allocation64_spill] sm:$0xff] %v6888_v50  ;;  %v6890_v35 = vpop.permute.xlu1 %3344 }
 0x96d   : > { %7919 = vst [vmem:[#allocation62_spill] sm:$0xff] %v6890_v35  ;;  %v6901_v19 = vpop.permute.xlu2 %3576  ;;  %v2950_v35 = vpack.c.bf16 %v2934_v29, %v2933_v27  ;;  %v3517_v42 = vpack.c.b16 %v3496_v30, %v3493_v6  ;;  %v3287_v27 = vunpack.c.h.b16 %v2948_v15  ;;  %v2987_v6 = vpack.c.bf16 %v2969_v5, %v2969_v5 }
 0x96e   : > { %7920 = vst [vmem:[#allocation54_spill] sm:$0xff] %v6901_v19  ;;  %v2891_v5 = vmul.f32 %v6905_v34, %v7902_v40 }
 0x96f   : > { %v3289_v13 = vunpack.c.l.b16 %v2950_v35  ;;  %v3290_v7 = vunpack.c.h.b16 %v2950_v35 }
 0x971   : > { %3142 = vrot.lane.b32.xlu0 %v6913_v47, %s4467_s29  ;;  %v3302_v30 = vpack.c.b16 %v3290_v7, %v3287_v27 }
 0x972   : > { %3362 = vrot.lane.b32.xlu1 %v2810_v62, %s4470_s11 }
 0x973   : > { %v6918_v53 = vpop.permute.xlu0 %3306  ;;  %3140 = vrot.lane.b32.xlu2 %v2795_v54, %s4467_s29  ;;  %s4154_s29 = sshll.u32 %s4540_s28, 7  ;;  %s3900_s28 = scalar_lea.sflag [#allocation4], %s4605_s22 }
 0x974   : > { %7921 = vst [vmem:[#allocation55_spill] sm:$0xff] %v6918_v53  ;;  %v6928_v24 = vpop.permute.xlu1 %3212 }
 0x975   : > { %7922 = vst [vmem:[#allocation56_spill] sm:$0xff] %v6928_v24  ;;  %v6931_v44 = vpop.permute.xlu2 %3352 }
 0x976   : > { %7923 = vst [vmem:[#allocation57_spill] sm:$0xff] %v6931_v44  ;;  %v2966_v44 = vmul.f32 %v7925_v59, %v6934_v1 }
 0x978   : > { %v2985_v29 = vpack.c.bf16 %v2966_v44, %v2966_v44 }
 0x979   : > { %3586 = vrot.lane.b32.xlu0 %v2810_v62, %s4474_s9  ;;  %v3301_v62 = vpack.c.b16 %v3289_v13, %v3286_v9  ;;  %v2890_v9 = vmul.f32 %v7901_v20, %v6903_v36 }
 0x97a   : > { %3530 = vrot.lane.b32.xlu1 %v3517_v42, %s7909_s12  ;;  %v3492_v42 = vunpack.c.l.b16 %v3016_v56  ;;  %v3414_v19 = vunpack.c.l.b16 %v2985_v29  ;;  %v2893_v56 = vmul.f32 %v7901_v20, %v6907_v58 }
 0x97b   : > { %v6941_v16 = vpop.permute.xlu0 %3662  ;;  %3364 = vrot.lane.b32.xlu2 %v2795_v54, %s4470_s11  ;;  %v7928_v54 = vld [vmem:[#allocation44_spill] sm:$0xff] }
 0x97c   : > { %7924 = vst [vmem:[#allocation16_spill] sm:$0xff] %v6941_v16  ;;  %v6947_v50 = vpop.permute.xlu1 %3436  ;;  %v3495_v16 = vunpack.c.l.b16 %v3018_v8  ;;  %v2926_v15 = vmul.f32 %v7928_v54, %v6934_v1  ;;  %v2929_v35 = vmul.f32 %v7928_v54, %v6937_v22  ;;  %v2894_v8 = vmul.f32 %v6909_v61, %v7902_v40 }
 0x97d   : > { %7926 = vst [vmem:[#allocation15_spill] sm:$0xff] %v6947_v50  ;;  %v6950_v46 = vpop.permute.xlu2 %3310  ;;  %v3417_v50 = vunpack.c.l.b16 %v2987_v6  ;;  %v2908_v6 = vpack.c.bf16 %v2891_v5, %v2890_v9  ;;  %v2920_v24 = vmul.f32 %v7928_v54, %v6797_v31  ;;  %v2923_v20 = vmul.f32 %v7928_v54, %v6802_v12 }
 0x97e   : > { %7927 = vst [vmem:[#allocation17_spill] sm:$0xff] %v6950_v46  ;;  %v3516_v27 = vpack.c.b16 %v3495_v16, %v3492_v42  ;;  %v2945_v7 = vpack.c.bf16 %v2926_v15, %v2926_v15  ;;  %v2960_v16 = vmul.f32 %v7925_v59, %v6797_v31  ;;  %v6994_v9 = vunpack.c.h.bf16 %v6642_v57 }
 0x97f   : > { %v3432_v29 = vpack.c.b16 %v3417_v50, %v3414_v19  ;;  %v2963_v50 = vmul.f32 %v7925_v59, %v6802_v12  ;;  %v3194_v42 = vunpack.c.l.b16 %v2908_v6 }
 0x980   : > { %v3282_v40 = vunpack.c.l.b16 %v2945_v7  ;;  %v2917_v38 = vmul.f32 %v7928_v54, %v6994_v9 }
 0x981   : > { %3322 = vrot.lane.b32.xlu0 %v3301_v62, %s4471_s18  ;;  %v2947_v62 = vpack.c.bf16 %v2929_v35, %v2929_v35  ;;  %v6991_v35 = vunpack.c.l.bf16 %v6642_v57  ;;  %v2983_v17 = vpack.c.bf16 %v2963_v50, %v2963_v50  ;;  %v2974_v50 = vmul.f32 %v6909_v61, %v7904_v4 }
 0x982   : > { %3324 = vrot.lane.b32.xlu1 %v3302_v30, %s4471_s18  ;;  %v2910_v30 = vpack.c.bf16 %v2894_v8, %v2893_v56  ;;  %v3195_v56 = vunpack.c.h.b16 %v2908_v6 }
 0x983   : > { %v6954_v18 = vpop.permute.xlu0 %3126  ;;  %3590 = vrot.lane.b32.xlu2 %v6913_v47, %s4474_s9 }
 0x984   : > { %v6960_v13 = vpop.permute.xlu1 %3128  ;;  %v3197_v15 = vunpack.c.l.b16 %v2910_v30  ;;  %v3198_v8 = vunpack.c.h.b16 %v2910_v30  ;;  %v3411_v30 = vunpack.c.l.b16 %v2983_v17  ;;  %v2939_v17 = vpack.c.bf16 %v2917_v38, %v2917_v38 }
 0x985   : > { %v6972_v44 = vpop.permute.xlu2 %3218  ;;  %v3054_v38 = vmul.f32 %v6909_v61, %v7906_v52 }
 0x986   : > { %7929 = vst [vmem:[#allocation13_spill] sm:$0xff] %v6972_v44  ;;  %v3285_v44 = vunpack.c.l.b16 %v2947_v62  ;;  %v2943_v62 = vpack.c.bf16 %v2923_v20, %v2923_v20  ;;  %v3209_v53 = vpack.c.b16 %v3197_v15, %v3194_v42  ;;  %v3210_v46 = vpack.c.b16 %v3198_v8, %v3195_v56 }
 0x988   : > { %v3300_v7 = vpack.c.b16 %v3285_v44, %v3282_v40  ;;  %v2971_v40 = vmul.f32 %v6905_v34, %v7904_v4  ;;  %v3051_v4 = vmul.f32 %v6905_v34, %v7906_v52 }
 0x989   : > { %3528 = vrot.lane.b32.xlu0 %v3516_v27, %s7909_s12  ;;  %v2941_v27 = vpack.c.bf16 %v2920_v24, %v2920_v24  ;;  %v3279_v24 = vunpack.c.l.b16 %v2943_v62  ;;  %v3273_v62 = vunpack.c.l.b16 %v2939_v17 }
 0x98a   : > { %3452 = vrot.lane.b32.xlu1 %v3432_v29, %s4468_s8  ;;  %v2981_v29 = vpack.c.bf16 %v2960_v16, %v2960_v16  ;;  %v2973_v16 = vmul.f32 %v7903_v2, %v6907_v58 }
 0x98b   : > { %v6980_v11 = vpop.permute.xlu0 %3312  ;;  %3584 = vrot.lane.b32.xlu2 %v6827_v26, %s4474_s9  ;;  %v3276_v6 = vunpack.c.l.b16 %v2941_v27 }
 0x98c   : > { %7930 = vst [vmem:[#allocation75_spill] sm:$0xff] %v6980_v11  ;;  %v6986_v19 = vpop.permute.xlu1 %3130  ;;  %v2914_v11 = vmul.f32 %v7928_v54, %v6991_v35  ;;  %v3408_v44 = vunpack.c.l.b16 %v2981_v29 }
 0x98d   : > { %v6996_v5 = vpop.permute.xlu2 %3442  ;;  %v3297_v56 = vpack.c.b16 %v3279_v24, %v3276_v6 }
 0x98e   : > { %7931 = vst [vmem:[#allocation14_spill] sm:$0xff] %v6996_v5  ;;  %v2937_v15 = vpack.c.bf16 %v2914_v11, %v2914_v11  ;;  %v3429_v8 = vpack.c.b16 %v3411_v30, %v3408_v44  ;;  %v3053_v11 = vmul.f32 %v7905_v3, %v6907_v58  ;;  %v2954_v30 = vmul.f32 %v7925_v59, %v6991_v35 }
 0x990   : > { %v3070_v52 = vpack.c.bf16 %v3054_v38, %v3053_v11 }
 0x991   : > { %3320 = vrot.lane.b32.xlu0 %v3300_v7, %s4471_s18  ;;  %v3270_v7 = vunpack.c.l.b16 %v2937_v15 }
 0x992   : > { %3230 = vrot.lane.b32.xlu1 %v3209_v53, %s4472_s19  ;;  %v2970_v53 = vmul.f32 %v7903_v2, %v6903_v36  ;;  %v3050_v2 = vmul.f32 %v7905_v3, %v6903_v36 }
 0x993   : > { %v7004_v5 = vpop.permute.xlu0 %3220  ;;  %3232 = vrot.lane.b32.xlu2 %v3210_v46, %s4472_s19  ;;  %v2990_v46 = vpack.c.bf16 %v2974_v50, %v2973_v16  ;;  %v3294_v50 = vpack.c.b16 %v3273_v62, %v3270_v7  ;;  %v3013_v7 = vmul.f32 %v7908_v63, %v6907_v58  ;;  %v3014_v62 = vmul.f32 %v6909_v61, %v7907_v51 }
 0x994   : > { %7932 = vst [vmem:[#allocation80_spill] sm:$0xff] %v7004_v5  ;;  %v7006_v20 = vpop.permute.xlu1 %3574  ;;  %v2988_v27 = vpack.c.bf16 %v2971_v40, %v2970_v53  ;;  %v2957_v53 = vmul.f32 %v7925_v59, %v6994_v9  ;;  %v3068_v15 = vpack.c.bf16 %v3051_v4, %v3050_v2 }
 0x995   : > { %7933 = vst [vmem:[#allocation59_spill] sm:$0xff] %v7006_v20  ;;  %v7017_v42 = vpop.permute.xlu2 %3666  ;;  %v3421_v44 = vunpack.c.l.b16 %v2990_v46  ;;  %v3422_v3 = vunpack.c.h.b16 %v2990_v46  ;;  %v3646_v46 = vunpack.c.h.b16 %v3070_v52 }
 0x996   : > { %7934 = vst [vmem:[#allocation9_spill] sm:$0xff] %v7017_v42  ;;  %v3418_v24 = vunpack.c.l.b16 %v2988_v27  ;;  %v3419_v16 = vunpack.c.h.b16 %v2988_v27  ;;  %v3010_v42 = vmul.f32 %v7908_v63, %v6903_v36  ;;  %v3643_v27 = vunpack.c.h.b16 %v3068_v15 }
 0x998   : > { %v3433_v17 = vpack.c.b16 %v3421_v44, %v3418_v24  ;;  %v3658_v24 = vpack.c.b16 %v3646_v46, %v3643_v27  ;;  %v7075_v46 = vunpack.c.l.bf16 %v6913_v47 }
 0x999   : > { %3314 = vrot.lane.b32.xlu0 %v3297_v56, %s4471_s18  ;;  %v2977_v56 = vpack.c.bf16 %v2954_v30, %v2954_v30  ;;  %v3030_v30 = vpack.c.bf16 %v3014_v62, %v3013_v7  ;;  %v3642_v62 = vunpack.c.l.b16 %v3068_v15 }
 0x99a   : > { %3446 = vrot.lane.b32.xlu1 %v3429_v8, %s4468_s8  ;;  %v2979_v8 = vpack.c.bf16 %v2957_v53, %v2957_v53  ;;  %v2932_v15 = vmul.f32 %v7928_v54, %v7075_v46 }
 0x99b   : > { %v7021_v29 = vpop.permute.xlu0 %3444  ;;  %3578 = vrot.lane.b32.xlu2 %v6708_v32, %s4474_s9  ;;  %v3402_v4 = vunpack.c.l.b16 %v2977_v56  ;;  %v7942_v56 = vld [vmem:[#allocation66_spill] sm:$0xff] }
 0x99c   : > { %7935 = vst [vmem:[#allocation11_spill] sm:$0xff] %v7021_v29  ;;  %v7031_v6 = vpop.permute.xlu1 %3350  ;;  %v3011_v29 = vmul.f32 %v6905_v34, %v7907_v51  ;;  %v3405_v11 = vunpack.c.l.b16 %v2979_v8  ;;  %v3513_v51 = vunpack.c.l.b16 %v3030_v30  ;;  %v2886_v8 = vmul.f32 %v7942_v56, %v6934_v1 }
 0x99d   : > { %7936 = vst [vmem:[#allocation49_spill] sm:$0xff] %v7031_v6  ;;  %v7039_v40 = vpop.permute.xlu2 %3132  ;;  %v3434_v6 = vpack.c.b16 %v3422_v3, %v3419_v16  ;;  %v7940_v3 = vld [vmem:[#allocation76_spill] sm:$0xff]  ;;  %v2889_v27 = vmul.f32 %v7942_v56, %v6937_v22 }
 0x99e   : > { %v3028_v44 = vpack.c.bf16 %v3011_v29, %v3010_v42  ;;  %v3426_v53 = vpack.c.b16 %v3405_v11, %v3402_v4  ;;  %v3514_v29 = vunpack.c.h.b16 %v3030_v30  ;;  %v3645_v4 = vunpack.c.l.b16 %v3070_v52 }
 0x99f   : > { %v7080_v11 = vunpack.c.h.bf16 %v6913_v47 }
 0x9a0   : > { %v3510_v16 = vunpack.c.l.b16 %v3028_v44  ;;  %v3511_v42 = vunpack.c.h.b16 %v3028_v44 }
 0x9a1   : > { %3308 = vrot.lane.b32.xlu0 %v3294_v50, %s4471_s18  ;;  %v3006_v50 = vmul.f32 %v7940_v3, %v6934_v1  ;;  %v2935_v52 = vmul.f32 %v7928_v54, %v7080_v11  ;;  %v3049_v54 = vmul.f32 %v7910_v39, %v6937_v22 }
 0x9a2   : > { %3454 = vrot.lane.b32.xlu1 %v3433_v17, %s4468_s8  ;;  %v3526_v30 = vpack.c.b16 %v3514_v29, %v3511_v42  ;;  %v2975_v42 = vmul.f32 %v7925_v59, %v7080_v11 }
 0x9a3   : > { %v7047_v20 = vpop.permute.xlu0 %3668  ;;  %3456 = vrot.lane.b32.xlu2 %v3434_v6, %s4468_s8  ;;  %v3009_v6 = vmul.f32 %v7940_v3, %v6937_v22 }
 0x9a4   : > { %7937 = vst [vmem:[#allocation50_spill] sm:$0xff] %v7047_v20  ;;  %v7053_v2 = vpop.permute.xlu1 %3536 }
 0x9a5   : > { %7938 = vst [vmem:[#allocation81_spill] sm:$0xff] %v7053_v2  ;;  %v7056_v38 = vpop.permute.xlu2 %3136  ;;  %v3027_v44 = vpack.c.bf16 %v3009_v6, %v3009_v6  ;;  %v2907_v2 = vpack.c.bf16 %v2889_v27, %v2889_v27  ;;  %v2972_v6 = vmul.f32 %v7925_v59, %v7075_v46  ;;  %v3067_v59 = vpack.c.bf16 %v3049_v54, %v3049_v54 }
 0x9a9   : > { %3680 = vrot.lane.b32.xlu0 %v3658_v24, %s4477_s17  ;;  %v3525_v24 = vpack.c.b16 %v3513_v51, %v3510_v16 }
 0x9aa   : > { %3440 = vrot.lane.b32.xlu1 %v3426_v53, %s4468_s8  ;;  %v3025_v53 = vpack.c.bf16 %v3006_v50, %v3006_v50  ;;  %v3193_v50 = vunpack.c.l.b16 %v2907_v2  ;;  %v2991_v2 = vpack.c.bf16 %v2975_v42, %v2975_v42  ;;  %v2883_v42 = vmul.f32 %v7942_v56, %v6802_v12 }
 0x9ab   : > { %v7060_v63 = vpop.permute.xlu0 %3534  ;;  %3572 = vrot.lane.b32.xlu2 %v6642_v57, %s4474_s9 }
 0x9ac   : > { %7939 = vst [vmem:[#allocation82_spill] sm:$0xff] %v7060_v63  ;;  %v7066_v17 = vpop.permute.xlu1 %3356  ;;  %v2905_v63 = vpack.c.bf16 %v2886_v8, %v2886_v8  ;;  %v3506_v5 = vunpack.c.l.b16 %v3025_v53  ;;  %v3046_v8 = vmul.f32 %v7910_v39, %v6934_v1 }
 0x9ad   : > { %7941 = vst [vmem:[#allocation10_spill] sm:$0xff] %v7066_v17  ;;  %v7077_v7 = vpop.permute.xlu2 %3580  ;;  %v3657_v17 = vpack.c.b16 %v3645_v4, %v3642_v62  ;;  %v2949_v62 = vpack.c.bf16 %v2932_v15, %v2932_v15  ;;  %v2951_v4 = vpack.c.bf16 %v2935_v52, %v2935_v52  ;;  %v3003_v15 = vmul.f32 %v7940_v3, %v6802_v12 }
 0x9ae   : > { %7943 = vst [vmem:[#allocation22_spill] sm:$0xff] %v7077_v7  ;;  %v3509_v7 = vunpack.c.l.b16 %v3027_v44  ;;  %v3190_v51 = vunpack.c.l.b16 %v2905_v63  ;;  %v2989_v63 = vpack.c.bf16 %v2972_v6, %v2972_v6  ;;  %v2880_v6 = vmul.f32 %v7942_v56, %v6797_v31 }
 0x9af   : > { %v3288_v44 = vunpack.c.l.b16 %v2949_v62 }
 0x9b0   : > { %v3524_v27 = vpack.c.b16 %v3509_v7, %v3506_v5  ;;  %v3420_v22 = vunpack.c.l.b16 %v2989_v63  ;;  %v3423_v5 = vunpack.c.l.b16 %v2991_v2  ;;  %v3000_v7 = vmul.f32 %v7940_v3, %v6797_v31 }
 0x9b1   : > { %3546 = vrot.lane.b32.xlu0 %v3525_v24, %s7909_s12  ;;  %v3065_v24 = vpack.c.bf16 %v3046_v8, %v3046_v8  ;;  %v2892_v2 = vmul.f32 %v7942_v56, %v7075_v46  ;;  %v2895_v31 = vmul.f32 %v7942_v56, %v7080_v11 }
 0x9b2   : > { %3548 = vrot.lane.b32.xlu1 %v3526_v30, %s7909_s12  ;;  %v3291_v30 = vunpack.c.l.b16 %v2951_v4  ;;  %v3021_v54 = vpack.c.bf16 %v3000_v7, %v3000_v7  ;;  %v2901_v4 = vpack.c.bf16 %v2880_v6, %v2880_v6 }
 0x9b3   : > { %v7084_v20 = vpop.permute.xlu0 %3134  ;;  %3678 = vrot.lane.b32.xlu2 %v3657_v17, %s4477_s17  ;;  %v3208_v17 = vpack.c.b16 %v3193_v50, %v3190_v51  ;;  %v3638_v51 = vunpack.c.l.b16 %v3065_v24  ;;  %v3641_v50 = vunpack.c.l.b16 %v3067_v59  ;;  %v2911_v6 = vpack.c.bf16 %v2895_v31, %v2895_v31 }
 0x9b4   : > { %v7090_v16 = vpop.permute.xlu1 %3316  ;;  %v3303_v8 = vpack.c.b16 %v3291_v30, %v3288_v44  ;;  %v3500_v24 = vunpack.c.l.b16 %v3021_v54  ;;  %v3052_v44 = vmul.f32 %v7910_v39, %v7075_v46  ;;  %v3055_v30 = vmul.f32 %v7910_v39, %v7080_v11 }
 0x9b5   : > { %v7097_v29 = vpop.permute.xlu2 %3358  ;;  %v3656_v62 = vpack.c.b16 %v3641_v50, %v3638_v51  ;;  %v3015_v51 = vmul.f32 %v7940_v3, %v7080_v11  ;;  %v2909_v50 = vpack.c.bf16 %v2892_v2, %v2892_v2  ;;  %v2994_v31 = vmul.f32 %v7940_v3, %v6991_v35 }
 0x9b6   : > { %7944 = vst [vmem:[#allocation53_spill] sm:$0xff] %v7097_v29 }
 0x9b9   : > { %3544 = vrot.lane.b32.xlu0 %v3524_v27, %s7909_s12  ;;  %v3023_v27 = vpack.c.bf16 %v3003_v15, %v3003_v15  ;;  %v3012_v15 = vmul.f32 %v7940_v3, %v7075_v46  ;;  %v3199_v46 = vunpack.c.l.b16 %v2911_v6  ;;  %v2877_v6 = vmul.f32 %v7942_v56, %v6994_v9 }
 0x9ba   : > { %3228 = vrot.lane.b32.xlu1 %v3208_v17, %s4472_s19  ;;  %v2903_v17 = vpack.c.bf16 %v2883_v42, %v2883_v42 }
 0x9bb   : > { %v7105_v53 = vpop.permute.xlu0 %3582  ;;  %3366 = vrot.lane.b32.xlu2 %v6913_v47, %s4470_s11  ;;  %v3435_v47 = vpack.c.b16 %v3423_v5, %v3420_v22  ;;  %v3503_v59 = vunpack.c.l.b16 %v3023_v27  ;;  %v3184_v5 = vunpack.c.l.b16 %v2901_v4  ;;  %v3029_v27 = vpack.c.bf16 %v3012_v15, %v3012_v15 }
 0x9bc   : > { %v7107_v1 = vpop.permute.xlu1 %3226  ;;  %v3187_v7 = vunpack.c.l.b16 %v2903_v17  ;;  %v3196_v17 = vunpack.c.l.b16 %v2909_v50  ;;  %v2874_v50 = vmul.f32 %v7942_v56, %v6991_v35 }
 0x9bd   : > { %v7115_v52 = vpop.permute.xlu2 %3318  ;;  %v3521_v42 = vpack.c.b16 %v3503_v59, %v3500_v24 }
 0x9be   : > { %v3205_v54 = vpack.c.b16 %v3187_v7, %v3184_v5  ;;  %v3017_v7 = vpack.c.bf16 %v2994_v31, %v2994_v31  ;;  %v2897_v56 = vpack.c.bf16 %v2874_v50, %v2874_v50  ;;  %v7945_v31 = vld [vmem:[#allocation20_spill] sm:$0xff] }
 0x9c1   : > { %3326 = vrot.lane.b32.xlu0 %v3303_v8, %s4471_s18  ;;  %v3069_v8 = vpack.c.bf16 %v3052_v44, %v3052_v44  ;;  %v2997_v44 = vmul.f32 %v7940_v3, %v6994_v9  ;;  %v3034_v3 = vmul.f32 %v7910_v39, %v6991_v35  ;;  %v2852_v35 = vmul.f32 %v6903_v36, %v7945_v31  ;;  %s3912_s18 = scalar_lea.hbm %s7511_s7, %s4154_s29 }
 0x9c2   : > { %3458 = vrot.lane.b32.xlu1 %v3435_v47, %s4468_s8  ;;  %v3071_v47 = vpack.c.bf16 %v3055_v30, %v3055_v30  ;;  %v3211_v30 = vpack.c.b16 %v3199_v46, %v3196_v17  ;;  %v2899_v46 = vpack.c.bf16 %v2877_v6, %v2877_v6  ;;  %s3915_s9 = sshll.u32 %s3912_s18, 4  ;;  %s3916_s9 = int_to_ptr.hbm [resolvable:$true] %s3915_s9 }
 0x9c3   : > { %v7123_v63 = vpop.permute.xlu0 %3224  ;;  %3676 = vrot.lane.b32.xlu2 %v3656_v62, %s4477_s17  ;;  %v3031_v62 = vpack.c.bf16 %v3015_v51, %v3015_v51  ;;  %v3644_v11 = vunpack.c.l.b16 %v3069_v8  ;;  %v3019_v51 = vpack.c.bf16 %v2997_v44, %v2997_v44  ;;  %v3037_v8 = vmul.f32 %v7910_v39, %v6994_v9 }
 0x9c4   : > { %v7129_v12 = vpop.permute.xlu1 %3450  ;;  %v3647_v2 = vunpack.c.l.b16 %v3071_v47  ;;  %v2854_v9 = vmul.f32 %v6907_v58, %v7945_v31  ;;  %v7947_v44 = vpack.c.b16 %v6836_v33, %v6832_v41 }
 0x9c5   : > { %v7136_v22 = vpop.permute.xlu2 %3672  ;;  %v3515_v59 = vunpack.c.l.b16 %v3031_v62  ;;  %v3494_v62 = vunpack.c.l.b16 %v3017_v7  ;;  %v3497_v17 = vunpack.c.l.b16 %v3019_v51  ;;  %v2850_v51 = vmul.f32 %v6762_v48, %v7945_v31 }
 0x9c6   : > { %v3659_v5 = vpack.c.b16 %v3647_v2, %v3644_v11  ;;  %v3057_v11 = vpack.c.bf16 %v3034_v3, %v3034_v3  ;;  %v3059_v2 = vpack.c.bf16 %v3037_v8, %v3037_v8 }
 0x9c7   : > { %v3518_v36 = vpack.c.b16 %v3497_v17, %v3494_v62 }
 0x9c8   : > { %v3626_v7 = vunpack.c.l.b16 %v3057_v11 }
 0x9c9   : > { %3360 = vrot.lane.b32.xlu0 %v6827_v26, %s4470_s11  ;;  %v3512_v26 = vunpack.c.l.b16 %v3029_v27 }
 0x9ca   : > { %3538 = vrot.lane.b32.xlu1 %v3521_v42, %s7909_s12 }
 0x9cb   : > { %v7145_v4 = vpop.permute.xlu0 %3448  ;;  %3222 = vrot.lane.b32.xlu2 %v3205_v54, %s4472_s19  ;;  %v3527_v15 = vpack.c.b16 %v3515_v59, %v3512_v26  ;;  %v7946_v26 = vld [vmem:[#allocation19_spill] sm:$0xff] }
 0x9cc   : > { %v7147_v29 = vpop.permute.xlu1 %3542  ;;  %v2853_v39 = vmul.f32 %v6905_v34, %v7946_v26  ;;  %v2855_v59 = vmul.f32 %v6909_v61, %v7946_v26  ;;  %v3178_v34 = vunpack.c.l.b16 %v2897_v56  ;;  %v3629_v61 = vunpack.c.l.b16 %v3059_v2 }
 0x9cd   : > { %v7152_v24 = vpop.permute.xlu2 %3140  ;;  %v2849_v41 = vmul.f32 %v6759_v49, %v7946_v26  ;;  %v2851_v50 = vmul.f32 %v6765_v55, %v7946_v26  ;;  %v2844_v49 = vmul.f32 %v6679_v45, %v7945_v31  ;;  %v2845_v3 = vmul.f32 %v6674_v37, %v7946_v26 }
 0x9ce   : > { %v2847_v55 = vmul.f32 %v6676_v21, %v7946_v26  ;;  %v3144_v37 = vsel %vm1399_vm15, %v6864_v43, %v6866_v0  ;;  %v2846_v45 = vmul.f32 %v6682_v23, %v7945_v31  ;;  %v2840_v21 = vmul.f32 %v6614_v25, %v7945_v31 }
 0x9cf   : > { %v2861_v17 = vpack.c.bf16 %v2851_v50, %v2850_v51  ;;  %v2858_v56 = vpack.c.bf16 %v2845_v3, %v2844_v49  ;;  %v2841_v2 = vmul.f32 %v6616_v28, %v7946_v26  ;;  %v2843_v43 = vmul.f32 %v6620_v60, %v7946_v26  ;;  %v7949_v3 = vld [vmem:[#allocation38_spill] sm:$0xff] }
 0x9d0   : > { %v2859_v11 = vpack.c.bf16 %v2847_v55, %v2846_v45  ;;  %v3149_v60 = vsel %vm1399_vm15, %v7084_v20, %v7056_v38  ;;  %v7951_v45 = vld [vmem:[#allocation17_spill] sm:$0xff] }
 0x9d1   : > { %3234 = vrot.lane.b32.xlu0 %v3211_v30, %s4472_s19  ;;  %v3148_v30 = vsel %vm1399_vm15, %v7039_v40, %v7084_v20  ;;  %v7199_v40 = vpack.c.bf16 %v2853_v39, %v2852_v35  ;;  %v2842_v35 = vmul.f32 %v6618_v10, %v7945_v31  ;;  %v2856_v10 = vpack.c.bf16 %v2841_v2, %v2840_v21 }
 0x9d2   : > { %3682 = vrot.lane.b32.xlu1 %v3659_v5, %s4477_s17  ;;  %v3181_v5 = vunpack.c.l.b16 %v2899_v46 }
 0x9d3   : > { %v7162_v42 = vpop.permute.xlu0 %3674  ;;  %3550 = vrot.lane.b32.xlu2 %v3527_v15, %s7909_s12  ;;  %v2848_v15 = vmul.f32 %v6756_v14, %v7945_v31  ;;  %v3146_v14 = vsel %vm1399_vm15, %v6954_v18, %v6960_v13  ;;  %v2857_v26 = vpack.c.bf16 %v2843_v43, %v2842_v35  ;;  %v3093_v20 = vunpack.c.h.b16 %v7199_v40 }
 0x9d4   : > { %v3139_v47 = vpop.permute.xlu1 %3138  ;;  %v3202_v48 = vpack.c.b16 %v3181_v5, %v3178_v34  ;;  %v3147_v34 = vsel %vm1399_vm15, %v6960_v13, %v6986_v19  ;;  %v3080_v5 = vunpack.c.l.b16 %v2856_v10  ;;  %v3091_v13 = vunpack.c.h.b16 %v2861_v17 }
 0x9d5   : > { %v3150_v54 = vsel %vm1399_vm15, %v3139_v47, %v7152_v24  ;;  %v7171_v27 = vpop.permute.xlu2 %3364  ;;  %v3650_v47 = vpack.c.b16 %v3629_v61, %v3626_v7  ;;  %v2860_v62 = vpack.c.bf16 %v2849_v41, %v2848_v15  ;;  %v3082_v7 = vunpack.c.l.b16 %v2857_v26  ;;  %v7948_v41 = vld [vmem:[#allocation41_spill] sm:$0xff] }
 0x9d6   : > { %3700 = vmatpush.bf16.msrb.mxu0 %v3150_v54  ;;  %v3092_v54 = vunpack.c.l.b16 %v7199_v40  ;;  %v3145_v51 = vsel %vm1399_vm15, %v6866_v0, %v7948_v41  ;;  %v3087_v0 = vunpack.c.h.b16 %v2859_v11  ;;  %v7960_v41 = vld [vmem:[#allocation22_spill] sm:$0xff] }
 0x9d7   : > { %v3096_v15 = vpack.c.b16 %v3082_v7, %v3080_v5 }
 0x9d9   : > { %3670 = vrot.lane.b32.xlu0 %v7947_v44, %s4477_s17  ;;  %v3084_v44 = vunpack.c.l.b16 %v2858_v56 }
 0x9da   : > { %3354 = vrot.lane.b32.xlu1 %v6708_v32, %s4470_s11  ;;  %3701 = vmatpush.bf16.msrb.mxu0 %v3148_v30  ;;  %v2863_v32 = vpack.c.bf16 %v2855_v59, %v2854_v9  ;;  %v3088_v9 = vunpack.c.l.b16 %v2860_v62  ;;  %v3090_v59 = vunpack.c.l.b16 %v2861_v17 }
 0x9db   : > { %v7190_v58 = vpop.permute.xlu0 %3540  ;;  %3532 = vrot.lane.b32.xlu2 %v3518_v36, %s7909_s12 }
 0x9dc   : > { %v7196_v33 = vpop.permute.xlu1 %3588  ;;  %v3094_v18 = vunpack.c.l.b16 %v2863_v32  ;;  %v3100_v31 = vpack.c.b16 %v3090_v59, %v3088_v9  ;;  %v3095_v38 = vunpack.c.h.b16 %v2863_v32  ;;  %v3240_v59 = vsel %vm1492_vm5, %v7123_v63, %v7107_v1 }
 0x9dd   : > { %v3591_v6 = vpop.permute.xlu2 %3590 }
 0x9de   : > { %3702 = vmatpush.bf16.msrb.mxu0 %v3146_v14  ;;  %v7214_v8 = vsel %vm1853_vm7, %v7196_v33, %v3591_v6  ;;  %v3102_v25 = vpack.c.b16 %v3094_v18, %v3092_v54  ;;  %v3103_v14 = vpack.c.b16 %v3095_v38, %v3093_v20  ;;  %v3089_v6 = vunpack.c.h.b16 %v2860_v62 }
 0x9df   : > { %v3081_v18 = vunpack.c.h.b16 %v2856_v10  ;;  %v3083_v62 = vunpack.c.h.b16 %v2857_v26 }
 0x9e0   : > { %v3101_v32 = vpack.c.b16 %v3091_v13, %v3089_v6 }
 0x9e1   : > { %3216 = vrot.lane.b32.xlu0 %v3202_v48, %s4472_s19  ;;  %v3085_v48 = vunpack.c.h.b16 %v2858_v56  ;;  %s3913_s19 = sshll.u32 %s6540_s10, 4  ;;  %s3914_s19 = int_to_ptr.vmem [resolvable:$true] %s3913_s19 }
 0x9e2   : > { %3664 = vrot.lane.b32.xlu1 %v3650_v47, %s4477_s17  ;;  %3703 = vmatpush.bf16.msrb.mxu0 %v3144_v37  ;;  %v3332_v47 = vsel %vm1585_vm4, %v7090_v16, %v7115_v52  ;;  %v7950_v37 = vld [vmem:[#allocation75_spill] sm:$0xff]  ;;  %v7953_v16 = vld [vmem:[#allocation32_spill] sm:$0xff]  ;;  %s4406_s17 = sshra.s32 %s3916_s9, 4  ;;  %s4407_s17 = int_to_ptr.hbm [resolvable:$true] %s4406_s17 }
 0x9e3   : > { %v3143_v46 = vpop.permute.xlu0 %3142  ;;  %3348 = vrot.lane.b32.xlu2 %v6642_v57, %s4470_s11  ;;  %v3099_v54 = vpack.c.b16 %v3087_v0, %v3085_v48  ;;  %v3330_v21 = vsel %vm1585_vm4, %v7951_v45, %v7950_v37  ;;  %v7964_v48 = vld [vmem:[#allocation14_spill] sm:$0xff]  ;;  %v7968_v45 = vld [vmem:[#allocation15_spill] sm:$0xff]  ;;  %s4408_s16 = scalar_lea.hbm %s4407_s17, 128  ;;  %p4413_p0 = scmp.lt.s32.totalorder %s4407_s17, %s7511_s7 }
 0x9e4   : > { %v3151_v23 = vsel %vm1399_vm15, %v7152_v24, %v3143_v46  ;;  %v7236_v39 = vpop.permute.xlu1 %3362  ;;  %v3086_v24 = vunpack.c.l.b16 %v2859_v11  ;;  %v3097_v46 = vpack.c.b16 %v3083_v62, %v3081_v18  ;;  %v7952_v11 = vld [vmem:[#allocation55_spill] sm:$0xff]  ;;  %v3688_v18 = vsel %vm1946_vm11, %v7136_v22, %v7162_v42  ;;  %p4409_p6 = scmp.ne.s32.totalorder %s4407_s17, %s4408_s16  ;;  %p4414_p1 = scmp.lt.s32.totalorder %s4412_s20, %s4408_s16 }
 0x9e5   : > { %3795 = vmatpush.bf16.msra.mxu3 %v3151_v23  ;;  %v7240_v28 = vpop.permute.xlu2 %3584  ;;  %v3328_v2 = vsel %vm1585_vm4, %v7953_v16, %v7952_v11  ;;  %v7954_v23 = vld [vmem:[#allocation73_spill] sm:$0xff]  ;;  %v7967_v62 = vld [vmem:[#allocation43_spill] sm:$0xff]  ;;  %v3374_v22 = vsel %vm1626_vm3, %v7236_v39, %v7171_v27 }
 0x9e6   : > { %3704 = vmatpush.bf16.msrb.mxu0 %v3102_v25  ;;  %v3098_v36 = vpack.c.b16 %v3086_v24, %v3084_v44  ;;  %p4410_p9 = pnand %p4409_p6, %p4569_p11  ;;  %p4415_p3 = por %p4414_p1, %p4413_p0 }
 0x9e8   : > { %p4411_p13 = pneg %p4410_p9 }
 0x9e9   : > { %3796 = vmatpush.bf16.msra.mxu3 %v3149_v60  ;;  %v7956_v60 = vld [vmem:[#allocation13_spill] sm:$0xff] }
 0x9ea   : > { %3705 = vmatpush.bf16.msrb.mxu0 %v3100_v31  ;;  %v7955_v31 = vld [vmem:[#allocation80_spill] sm:$0xff]  ;;  %p4416_p4 = pnand %p4415_p3, %p4411_p13 }
 0x9eb   : > { %v3587_v30 = vpop.permute.xlu0 %3586  ;;  %v3238_v24 = vsel %vm1492_vm5, %v7956_v60, %v7955_v31 }
 0x9ec   : > { %v7245_v57 = vpop.permute.xlu1 %3530  ;;  %v3598_v7 = vsel %vm1853_vm7, %v3587_v30, %v7196_v33  ;;  %v3464_v33 = vsel %vm1719_vm2, %v7145_v4, %v7129_v12  ;;  %v7961_v30 = vld [vmem:[#allocation54_spill] sm:$0xff] }
 0x9ed   : > { %3797 = vmatpush.bf16.msra.mxu3 %v3147_v34  ;;  %v7250_v61 = vpop.permute.xlu2 %3232  ;;  %v7958_v34 = vld [vmem:[#allocation56_spill] sm:$0xff]  ;;  %v7965_v4 = vld [vmem:[#allocation46_spill] sm:$0xff] }
 0x9ee   : > { %3706 = vmatpush.bf16.msrb.mxu0 %v3098_v36  ;;  %v7957_v36 = vld [vmem:[#allocation33_spill] sm:$0xff] }
 0x9ef   : > { %v3236_v5 = vsel %vm1492_vm5, %v7958_v34, %v7957_v36 }
 0x9f1   : > { %3798 = vmatpush.bf16.msra.mxu3 %v3145_v51  ;;  %v3596_v51 = vsel %vm1853_vm7, %v7960_v41, %v7105_v53 }
 0x9f2   : > { %3707 = vmatpush.bf16.msrb.mxu0 %v3096_v15  ;;  %v7959_v15 = vld [vmem:[#allocation21_spill] sm:$0xff] }
 0x9f3   : > { %v3323_v50 = vpop.permute.xlu0 %3322 }
 0x9f4   : > { %v7256_v19 = vpop.permute.xlu1 %3324 }
 0x9f5   : > { %v3334_v49 = vsel %vm1585_vm4, %v3323_v50, %v7256_v19  ;;  %3708 = vmatmul.bf16.vlgmr.msrb.gmra.mxu0 %v7949_v3  ;;  %3799 = vmatpush.bf16.msra.mxu3 %v3103_v14  ;;  %v7261_v40 = vpop.permute.xlu2 %3578  ;;  %v7962_v14 = vld [vmem:[#allocation59_spill] sm:$0xff] }
 0x9f6   : > { %3719 = vmatpush.bf16.msrb.mxu1 %v3334_v49  ;;  %v3594_v6 = vsel %vm1853_vm7, %v7962_v14, %v7961_v30  ;;  %v7977_v14 = vld [vmem:[#allocation57_spill] sm:$0xff] }
 0x9f9   : > { %3800 = vmatpush.bf16.msra.mxu3 %v3101_v32  ;;  %v7963_v32 = vld [vmem:[#allocation11_spill] sm:$0xff] }
 0x9fa   : > { %3720 = vmatpush.bf16.msrb.mxu1 %v3332_v47  ;;  %v3462_v0 = vsel %vm1719_vm2, %v7964_v48, %v7963_v32  ;;  %v7966_v47 = vld [vmem:[#allocation64_spill] sm:$0xff]  ;;  %v7979_v48 = vld [vmem:[#allocation81_spill] sm:$0xff] }
 0x9fb   : > { %v7266_v55 = vpop.permute.xlu0 %3528 }
 0x9fc   : > { %v7268_v17 = vpop.permute.xlu1 %3452 }
 0x9fd   : > { %3801 = vmatpush.bf16.msra.mxu3 %v3099_v54  ;;  %v7273_v56 = vpop.permute.xlu2 %3456  ;;  %v3592_v54 = vsel %vm1853_vm7, %v7966_v47, %v7965_v4  ;;  %v7981_v47 = vld [vmem:[#allocation31_spill] sm:$0xff] }
 0x9fe   : > { %3721 = vmatpush.bf16.msrb.mxu1 %v3330_v21  ;;  %v3460_v21 = vsel %vm1719_vm2, %v7968_v45, %v7967_v62  ;;  %v3552_v45 = vsel %vm1812_vm8, %v7266_v55, %v7245_v57 }
 0xa01   : > { %3802 = vmatpush.bf16.msra.mxu3 %v3097_v46 }
 0xa02   : > { %3722 = vmatpush.bf16.msrb.mxu1 %v3328_v2 }
 0xa03   : > { %v7278_v35 = vpop.permute.xlu0 %3320 }
 0xa04   : > { %v3231_v43 = vpop.permute.xlu1 %3230  ;;  %3803 = vmatmul.bf16.vlgmr.msra.gmra.mxu3 %v7949_v3 }
 0xa05   : > { %3713 = vmatmul.bf16.gmra.mxu0 %v7954_v23  ;;  %v3242_v25 = vsel %vm1492_vm5, %v3231_v43, %v7250_v61  ;;  %v7284_v9 = vpop.permute.xlu2 %3572  ;;  %v7969_v43 = vld [vmem:[#allocation50_spill] sm:$0xff] }
 0xa06   : > { %3723 = vmatpush.bf16.msrb.mxu1 %v3242_v25  ;;  %v3593_v55 = vsel %vm1853_vm7, %v7965_v4, %v7284_v9 }
 0xa0a   : > { %3724 = vmatpush.bf16.msrb.mxu1 %v3240_v59  ;;  %v7971_v59 = vld [vmem:[#allocation52_spill] sm:$0xff] }
 0xa0b   : > { %v7289_v44 = vpop.permute.xlu0 %3314 }
 0xa0c   : > { %v7291_v10 = vpop.permute.xlu1 %3446  ;;  %v3331_v9 = vsel %vm1585_vm4, %v7950_v37, %v7289_v44 }
 0xa0d   : > { %v3679_v26 = vpop.permute.xlu2 %3678 }
 0xa0e   : > { %3725 = vmatpush.bf16.msrb.mxu1 %v3238_v24  ;;  %v7972_v24 = vld [vmem:[#allocation16_spill] sm:$0xff] }
 0xa12   : > { %3726 = vmatpush.bf16.msrb.mxu1 %v3236_v5  ;;  %v7974_v5 = vld [vmem:[#allocation53_spill] sm:$0xff] }
 0xa13   : > { %v7301_v63 = vpop.permute.xlu0 %3308 }
 0xa14   : > { %v3455_v20 = vpop.permute.xlu1 %3454  ;;  %3808 = vmatmul.bf16.gmra.mxu3 %v7954_v23  ;;  %v7970_v23 = vld [vmem:[#allocation9_spill] sm:$0xff] }
 0xa15   : > { %v3466_v38 = vsel %vm1719_vm2, %v3455_v20, %v7273_v56  ;;  %3727 = vmatmul.bf16.vlgmr.msrb.gmra.mxu1 %v7959_v15  ;;  %v7310_v50 = vpop.permute.xlu2 %3366  ;;  %v3686_v25 = vsel %vm1946_vm11, %v7970_v23, %v7969_v43 }
 0xa16   : > { %3757 = vmatpush.bf16.msra.mxu1 %v3598_v7  ;;  %3738 = vmatpush.bf16.msra.mxu0 %v3466_v38  ;;  %v7975_v7 = vld [vmem:[#allocation10_spill] sm:$0xff]  ;;  %v3556_v38 = vsel %vm1812_vm8, %v7190_v58, %v7147_v29 }
 0xa17   : > { %v3372_v20 = vsel %vm1626_vm3, %v7975_v7, %v7974_v5 }
 0xa1a   : > { %3758 = vmatpush.bf16.msra.mxu1 %v3596_v51  ;;  %3739 = vmatpush.bf16.msra.mxu0 %v3464_v33  ;;  %v7976_v51 = vld [vmem:[#allocation27_spill] sm:$0xff] }
 0xa1b   : > { %v7318_v13 = vpop.permute.xlu0 %3680 }
 0xa1c   : > { %v3690_v49 = vsel %vm1946_vm11, %v3679_v26, %v7318_v13  ;;  %v7322_v3 = vpop.permute.xlu1 %3440  ;;  %v7973_v26 = vld [vmem:[#allocation42_spill] sm:$0xff] }
 0xa1d   : > { %3780 = vmatpush.bf16.msra.mxu2 %v3690_v49  ;;  %v7336_v46 = vpop.permute.xlu2 %3676  ;;  %v3684_v34 = vsel %vm1946_vm11, %v7973_v26, %v7972_v24 }
 0xa1e   : > { %3759 = vmatpush.bf16.msra.mxu1 %v3594_v6  ;;  %3740 = vmatpush.bf16.msra.mxu0 %v3462_v0  ;;  %v7978_v6 = vld [vmem:[#allocation49_spill] sm:$0xff]  ;;  %v7980_v0 = vld [vmem:[#allocation82_spill] sm:$0xff] }
 0xa1f   : > { %v3370_v49 = vsel %vm1626_vm3, %v7978_v6, %v7977_v14  ;;  %v3554_v58 = vsel %vm1812_vm8, %v7980_v0, %v7979_v48  ;;  %v7988_v6 = vld [vmem:[#allocation24_spill] sm:$0xff] }
 0xa21   : > { %3781 = vmatpush.bf16.msra.mxu2 %v3688_v18 }
 0xa22   : > { %3760 = vmatpush.bf16.msra.mxu1 %v3592_v54  ;;  %3741 = vmatpush.bf16.msra.mxu0 %v3460_v21  ;;  %v7982_v54 = vld [vmem:[#allocation62_spill] sm:$0xff]  ;;  %v3595_v21 = vsel %vm1853_vm7, %v7961_v30, %v7261_v40 }
 0xa23   : > { %v3547_v16 = vpop.permute.xlu0 %3546  ;;  %v3368_v18 = vsel %vm1626_vm3, %v7982_v54, %v7981_v47  ;;  %v7989_v54 = vld [vmem:[#allocation65_spill] sm:$0xff] }
 0xa24   : > { %v3549_v2 = vpop.permute.xlu1 %3548 }
 0xa25   : > { %3732 = vmatmul.bf16.gmra.mxu1 %v7971_v59  ;;  %v3558_v60 = vsel %vm1812_vm8, %v3547_v16, %v3549_v2  ;;  %3782 = vmatpush.bf16.msra.mxu2 %v3686_v25  ;;  %v7358_v33 = vpop.permute.xlu2 %3222  ;;  %v7983_v25 = vld [vmem:[#allocation74_spill] sm:$0xff] }
 0xa26   : > { %3742 = vmatpush.bf16.msra.mxu0 %v3374_v22  ;;  %3761 = vmatpush.bf16.msra.mxu1 %v3558_v60  ;;  %v7984_v22 = vld [vmem:[#allocation69_spill] sm:$0xff] }
 0xa29   : > { %3783 = vmatpush.bf16.msra.mxu2 %v3684_v34  ;;  %v7985_v34 = vld [vmem:[#allocation63_spill] sm:$0xff] }
 0xa2a   : > { %3743 = vmatpush.bf16.msra.mxu0 %v3372_v20  ;;  %3762 = vmatpush.bf16.msra.mxu1 %v3556_v38 }
 0xa2b   : > { %v3545_v39 = vpop.permute.xlu0 %3544 }
 0xa2c   : > { %v3229_v41 = vpop.permute.xlu1 %3228  ;;  %4123 = vmatmul.msk.bf16.vlgmr.msra.gmra.mxu2 %vm385_vm0, %v7976_v51 }
 0xa2d   : > { %3852 = vmatpush.bf16.msrb.mxu2 %v7214_v8  ;;  %v3597_v8 = vsel %vm1853_vm7, %v7105_v53, %v7240_v28  ;;  %v3551_v40 = vpop.permute.xlu2 %3550 }
 0xa2e   : > { %3744 = vmatpush.bf16.msra.mxu0 %v3370_v49  ;;  %3763 = vmatpush.bf16.msra.mxu1 %v3554_v58  ;;  %v3559_v30 = vsel %vm1812_vm8, %v3549_v2, %v3551_v40 }
 0xa31   : > { %3853 = vmatpush.bf16.msrb.mxu2 %v3597_v8 }
 0xa32   : > { %3745 = vmatpush.bf16.msra.mxu0 %v3368_v18  ;;  %3764 = vmatpush.bf16.msra.mxu1 %v3552_v45 }
 0xa33   : > { %v3327_v16 = vpop.permute.xlu0 %3326 }
 0xa34   : > { %v3335_v53 = vsel %vm1585_vm4, %v7256_v19, %v3327_v16  ;;  %v3459_v28 = vpop.permute.xlu1 %3458  ;;  %v3333_v19 = vsel %vm1585_vm4, %v7115_v52, %v7278_v35  ;;  %v3463_v52 = vsel %vm1719_vm2, %v7963_v32, %v7291_v10  ;;  %v3461_v35 = vsel %vm1719_vm2, %v7967_v62, %v7322_v3  ;;  %v7987_v3 = vld [vmem:[#allocation71_spill] sm:$0xff] }
 0xa35   : > { %3854 = vmatpush.bf16.msrb.mxu2 %v3595_v21  ;;  %v3467_v23 = vsel %vm1719_vm2, %v7273_v56, %v3459_v28  ;;  %3746 = vmatmul.bf16.vlgmr.msra.gmra.mxu0 %v7983_v25  ;;  %v3465_v56 = vsel %vm1719_vm2, %v7129_v12, %v7268_v17  ;;  %v3557_v12 = vsel %vm1812_vm8, %v7147_v29, %v3545_v39  ;;  %v3533_v44 = vpop.permute.xlu2 %3532 }
 0xa36   : > { %3765 = vmatmul.bf16.vlgmr.msra.gmra.mxu1 %v7984_v22  ;;  %3814 = vmatpush.bf16.msrb.mxu0 %v3335_v53  ;;  %v3329_v17 = vsel %vm1585_vm4, %v7952_v11, %v7301_v63  ;;  %v7986_v11 = vld [vmem:[#allocation51_spill] sm:$0xff]  ;;  %v3375_v63 = vsel %vm1626_vm3, %v7171_v27, %v7310_v50  ;;  %v3553_v62 = vsel %vm1812_vm8, %v7245_v57, %v3533_v44 }
 0xa37   : > { %3833 = vmatpush.bf16.msrb.mxu1 %v3467_v23  ;;  %v3689_v27 = vsel %vm1946_vm11, %v7162_v42, %v7336_v46 }
 0xa39   : > { %3855 = vmatpush.bf16.msrb.mxu2 %v3593_v55 }
 0xa3a   : > { %3815 = vmatpush.bf16.msrb.mxu0 %v3333_v19 }
 0xa3b   : > { %3834 = vmatpush.bf16.msrb.mxu1 %v3465_v56  ;;  %v3361_v60 = vpop.permute.xlu0 %3360 }
 0xa3c   : > { %v3539_v26 = vpop.permute.xlu1 %3538  ;;  %4124 = vmatmul.msk.bf16.gmra.mxu2 %vm385_vm0, %v7985_v34 }
 0xa3d   : > { %3856 = vmatpush.bf16.msrb.mxu2 %v3559_v30  ;;  %v3555_v37 = vsel %vm1812_vm8, %v7979_v48, %v3539_v26  ;;  %v3349_v7 = vpop.permute.xlu2 %3348 }
 0xa3e   : > { %3816 = vmatpush.bf16.msrb.mxu0 %v3331_v9  ;;  %v3369_v42 = vsel %vm1626_vm3, %v7981_v47, %v3349_v7 }
 0xa3f   : > { %3835 = vmatpush.bf16.msrb.mxu1 %v3463_v52  ;;  %v7991_v52 = vld [vmem:[#allocation28_spill] sm:$0xff] }
 0xa41   : > { %3857 = vmatpush.bf16.msrb.mxu2 %v3557_v12 }
 0xa42   : > { %3817 = vmatpush.bf16.msrb.mxu0 %v3329_v17 }
 0xa43   : > { %3836 = vmatpush.bf16.msrb.mxu1 %v3461_v35  ;;  %v3235_v10 = vpop.permute.xlu0 %3234 }
 0xa44   : > { %v3683_v32 = vpop.permute.xlu1 %3682  ;;  %v3243_v29 = vsel %vm1492_vm5, %v7250_v61, %v3235_v10  ;;  %v3241_v61 = vsel %vm1492_vm5, %v7107_v1, %v3229_v41  ;;  %v3239_v1 = vsel %vm1492_vm5, %v7955_v31, %v7358_v33 }
 0xa45   : > { %3858 = vmatpush.bf16.msrb.mxu2 %v3555_v37  ;;  %v3691_v4 = vsel %vm1946_vm11, %v7318_v13, %v3683_v32  ;;  %3751 = vmatmul.bf16.gmra.mxu0 %v7986_v11  ;;  %v3373_v13 = vsel %vm1626_vm3, %v7974_v5, %v3361_v60 }
 0xa46   : > { %3770 = vmatmul.bf16.gmra.mxu1 %v7987_v3  ;;  %3818 = vmatpush.bf16.msrb.mxu0 %v3243_v29 }
 0xa47   : > { %3837 = vmatpush.bf16.msrb.mxu1 %v3375_v63  ;;  %3875 = vmatpush.bf16.msrb.mxu3 %v3691_v4 }
 0xa49   : > { %3859 = vmatpush.bf16.msrb.mxu2 %v3553_v62 }
 0xa4a   : > { %3819 = vmatpush.bf16.msrb.mxu0 %v3241_v61 }
 0xa4b   : > { %3838 = vmatpush.bf16.msrb.mxu1 %v3373_v13  ;;  %3876 = vmatpush.bf16.msrb.mxu3 %v3689_v27  ;;  %v3671_v50 = vpop.permute.xlu0 %3670 }
 0xa4c   : > { %v3355_v2 = vpop.permute.xlu1 %3354  ;;  %v3687_v57 = vsel %vm1946_vm11, %v7969_v43, %v3671_v50  ;;  %3860 = vmatmul.bf16.vlgmr.msrb.gmra.mxu2 %v7984_v22  ;;  %v7990_v22 = vld [vmem:[#allocation30_spill] sm:$0xff] }
 0xa4d   : > { %v3371_v5 = vsel %vm1626_vm3, %v7977_v14, %v3355_v2 }
 0xa4e   : > { %3820 = vmatpush.bf16.msrb.mxu0 %v3239_v1 }
 0xa4f   : > { %3839 = vmatpush.bf16.msrb.mxu1 %v3371_v5  ;;  %3877 = vmatpush.bf16.msrb.mxu3 %v3687_v57 }
 0xa53   : > { %3840 = vmatpush.bf16.msrb.mxu1 %v3369_v42  ;;  %v3217_v46 = vpop.permute.xlu0 %3216 }
 0xa54   : > { %v3665_v20 = vpop.permute.xlu1 %3664  ;;  %v3237_v43 = vsel %vm1492_vm5, %v7957_v36, %v3217_v46 }
 0xa55   : > { %3821 = vmatpush.bf16.msrb.mxu0 %v3237_v43  ;;  %v3685_v31 = vsel %vm1946_vm11, %v7972_v24, %v3665_v20 }
 0xa56   : > { %3841 = vmatmul.bf16.vlgmr.msrb.gmra.mxu1 %v7983_v25  ;;  %3878 = vmatpush.bf16.msrb.mxu3 %v3685_v31 }
 0xa58   : > { %3822 = vmatmul.bf16.vlgmr.msrb.gmra.mxu0 %v7959_v15 }
 0xa59   : > { %4125 = vmatmul.msk.bf16.vlgmr.msrb.gmra.mxu3 %vm385_vm0, %v7976_v51 }
 0xa5c   : > { %3865 = vmatmul.bf16.gmra.mxu2 %v7987_v3 }
 0xa66   : > { %3846 = vmatmul.bf16.gmra.mxu1 %v7986_v11 }
 0xa68   : > { %3827 = vmatmul.bf16.gmra.mxu0 %v7971_v59 }
 0xa69   : > { %4126 = vmatmul.msk.bf16.gmra.mxu3 %vm385_vm0, %v7985_v34 }
 0xa72   : > { %v3709_v36 = vpop.f32.mrf.mxu0 }
 0xa73   : > { %v3710_v51 = vadd.f32 %v3709_v36, %v7988_v6 }
 0xa7a   : > { %v3711_v24 = vpop.f32.mrf.mxu0 }
 0xa7b   : > { %v3712_v18 = vadd.f32 %v3711_v24, %v7989_v54 }
 0xa82   : > { %v3714_v41 = vpop.f32.mrf.mxu0 }
 0xa83   : > { %v3715_v55 = vadd.f32 %v3714_v41, %v7990_v22 }
 0xa87   : > { %v3804_v59 = vpop.f32.mrf.mxu3 }
 0xa88   : > { %v3805_v62 = vadd.f32 %v3804_v59, %v7988_v6 }
 0xa8a   : > { %v3716_v15 = vpop.f32.mrf.mxu0 }
 0xa8b   : > { %v3717_v12 = vadd.f32 %v3716_v15, %v7991_v52 }
 0xa8f   : > { %v3806_v40 = vpop.f32.mrf.mxu3 }
 0xa90   : > { %v3807_v1 = vadd.f32 %v3806_v40, %v7989_v54 }
 0xa92   : > { %v3728_v38 = vpop.f32.mrf.mxu1 }
 0xa93   : > { %v3729_v48 = vadd.f32 %v3728_v38, %v3710_v51 }
 0xa97   : > { %v3809_v35 = vpop.f32.mrf.mxu3 }
 0xa98   : > { %v3810_v36 = vadd.f32 %v3809_v35, %v7990_v22 }
 0xa9a   : > { %v3730_v39 = vpop.f32.mrf.mxu1 }
 0xa9b   : > { %v3731_v16 = vadd.f32 %v3730_v39, %v3712_v18 }
 0xa9f   : > { %v3811_v61 = vpop.f32.mrf.mxu3 }
 0xaa0   : > { %v3812_v51 = vadd.f32 %v3811_v61, %v7991_v52 }
 0xaa2   : > { %v3733_v33 = vpop.f32.mrf.mxu1 }
 0xaa3   : > { %v3734_v30 = vadd.f32 %v3733_v33, %v3715_v55 }
 0xaaa   : > { %v3735_v14 = vpop.f32.mrf.mxu1 }
 0xaab   : > { %v3736_v37 = vadd.f32 %v3735_v14, %v3717_v12 }
 0xaaf   : > { %v3785_v49 = vpop.f32.mrf.mxu2 }
 0xab2   : > { %v3747_v0 = vpop.f32.mrf.mxu0 }
 0xab3   : > { %v3766_v58 = vpop.f32.mrf.mxu1  ;;  %v3748_v8 = vadd.f32 %v3747_v0, %v3729_v48 }
 0xab5   : > { %v3767_v47 = vadd.f32 %v3766_v58, %v3748_v8 }
 0xab7   : > { %v3786_v45 = vadd.f32 %v3785_v49, %v3767_v47  ;;  %v3787_v21 = vpop.f32.mrf.mxu2 }
 0xab9   : > { %4127 = vst [vmem:[%s6540_s10 + $0x40] sm:$0xff] %v3786_v45 }
 0xaba   : > { %v3749_v53 = vpop.f32.mrf.mxu0 }
 0xabb   : > { %v3768_v28 = vpop.f32.mrf.mxu1  ;;  %v3750_v23 = vadd.f32 %v3749_v53, %v3731_v16 }
 0xabd   : > { %v3769_v25 = vadd.f32 %v3768_v28, %v3750_v23 }
 0xabf   : > { %v3788_v19 = vadd.f32 %v3787_v21, %v3769_v25  ;;  %v3790_v56 = vpop.f32.mrf.mxu2 }
 0xac1   : > { %4129 = vst [vmem:[%s6540_s10 + $0x50] sm:$0xff] %v3788_v19 }
 0xac2   : > { %v3752_v60 = vpop.f32.mrf.mxu0 }
 0xac3   : > { %v3771_v26 = vpop.f32.mrf.mxu1  ;;  %v3753_v34 = vadd.f32 %v3752_v60, %v3734_v30 }
 0xac5   : > { %v3772_v9 = vadd.f32 %v3771_v26, %v3753_v34 }
 0xac7   : > { %v3791_v17 = vadd.f32 %v3790_v56, %v3772_v9  ;;  %v3792_v44 = vpop.f32.mrf.mxu2 }
 0xac9   : > { %4131 = vst [vmem:[%s6540_s10 + $0x60] sm:$0xff] %v3791_v17 }
 0xaca   : > { %v3754_v10 = vpop.f32.mrf.mxu0 }
 0xacb   : > { %v3773_v32 = vpop.f32.mrf.mxu1  ;;  %v3755_v29 = vadd.f32 %v3754_v10, %v3736_v37 }
 0xacd   : > { %v3774_v4 = vadd.f32 %v3773_v32, %v3755_v29 }
 0xacf   : > { %v3793_v11 = vadd.f32 %v3792_v44, %v3774_v4  ;;  %v3861_v3 = vpop.f32.mrf.mxu2 }
 0xad1   : > { %4133 = vst [vmem:[%s6540_s10 + $0x70] sm:$0xff] %v3793_v11 }
 0xad3   : > { %v3842_v63 = vpop.f32.mrf.mxu1 }
 0xad5   : > { %v3823_v13 = vpop.f32.mrf.mxu0 }
 0xad6   : > { %v3824_v27 = vadd.f32 %v3823_v13, %v3805_v62 }
 0xad7   : > { %v3863_v46 = vpop.f32.mrf.mxu2 }
 0xad8   : > { %v3843_v50 = vadd.f32 %v3842_v63, %v3824_v27 }
 0xada   : > { %v3862_v2 = vadd.f32 %v3861_v3, %v3843_v50 }
 0xadb   : > { %v3844_v57 = vpop.f32.mrf.mxu1 }
 0xadc   : > { %v3880_v5 = vpop.f32.mrf.mxu3 }
 0xadd   : > { %v3881_v7 = vadd.f32 %v3880_v5, %v3862_v2  ;;  %v3825_v42 = vpop.f32.mrf.mxu0 }
 0xade   : > { %v3826_v20 = vadd.f32 %v3825_v42, %v3807_v1 }
 0xadf   : > { %4128 = vst [vmem:[%s6540_s10 + $0x48] sm:$0xff] %v3881_v7  ;;  %v3866_v15 = vpop.f32.mrf.mxu2 }
 0xae0   : > { %v3845_v43 = vadd.f32 %v3844_v57, %v3826_v20 }
 0xae2   : > { %v3864_v31 = vadd.f32 %v3863_v46, %v3845_v43 }
 0xae3   : > { %v3847_v41 = vpop.f32.mrf.mxu1 }
 0xae4   : > { %v3882_v38 = vpop.f32.mrf.mxu3 }
 0xae5   : > { %v3883_v24 = vadd.f32 %v3882_v38, %v3864_v31  ;;  %v3828_v39 = vpop.f32.mrf.mxu0 }
 0xae6   : > { %v3829_v33 = vadd.f32 %v3828_v39, %v3810_v36 }
 0xae7   : > { %4130 = vst [vmem:[%s6540_s10 + $0x58] sm:$0xff] %v3883_v24  ;;  %v3868_v47 = vpop.f32.mrf.mxu2 }
 0xae8   : > { %v3848_v14 = vadd.f32 %v3847_v41, %v3829_v33 }
 0xaea   : > { %v3867_v6 = vadd.f32 %v3866_v15, %v3848_v14 }
 0xaeb   : > { %v3849_v8 = vpop.f32.mrf.mxu1 }
 0xaec   : > { %v3885_v49 = vpop.f32.mrf.mxu3 }
 0xaed   : > { %v3886_v48 = vadd.f32 %v3885_v49, %v3867_v6  ;;  %v3830_v0 = vpop.f32.mrf.mxu0 }
 0xaee   : > { %v3831_v58 = vadd.f32 %v3830_v0, %v3812_v51 }
 0xaef   : > { %4132 = vst [vmem:[%s6540_s10 + $0x68] sm:$0xff] %v3886_v48 }
 0xaf0   : > { %v3850_v59 = vadd.f32 %v3849_v8, %v3831_v58 }
 0xaf2   : > { %v3869_v54 = vadd.f32 %v3868_v47, %v3850_v59 }
 0xaf4   : > { %v3887_v18 = vpop.f32.mrf.mxu3 }
 0xaf5   : > { %v3888_v45 = vadd.f32 %v3887_v18, %v3869_v54 }
 0xaf7   : > { %4134 = vst [vmem:[%s6540_s10 + $0x78] sm:$0xff] %v3888_v45 }
 0xaf8   : > { %4419 = shalt.err (!%p4416_p4)
}
 0xaf9   : > { %s4478_s22 = smov 256   ;;  %s7992_s10 = smov 16  }
 0xafa   : > { %4157 = dma.vmem_to_hbm [thread:$0]  (%p4569_p11), %s3914_s19, 2048, %s3916_s9, %s3900_s28, %s4478_s22, %s4478_s22, %s7992_s10  }
 0xafb PF: > { %s3930_s29 = sand.u32 1, %s4446_s24   ;;  %p7993_p7 = scmp.ge.s32.totalorder %s4458_s27, 2 }
 0xafc   : > { %s3931_s8 = scalar_lea.sflag [#allocation4], %s3930_s29 }
 0xafd   : > { %p4164_p5 = pnand %p7993_p7, %p4573_p12 }
 0xaff   : > { %p4165_p8 = pneg %p4164_p5 }
 0xb01   : > { %4441 = dma.done.wait (%p4165_p8), %s3931_s8, 2048  }
 0xb02   : > { %4443 = vsyncadd (%p4165_p8), %s3931_s8, 4294965248  ;;  %s7994_s11 = sld [smem:[#allocation8_spill]]  ;;  %p20_p10 = scmp.ge.s32.totalorder %s4544_s30, 4  }
 0xb03   : > { %s7995_s24 = smov %s4450_s25  ;;  %s7996_s25 = smov %s4454_s26 }
 0xb04   : > { %s7998_s27 = smov %s4544_s30  ;;  %22 = sbr.rel (!%p20_p10) target bundleno = 5 (0x5), region = 95 }
 0xb08   : > { %s7997_s26 = smov %s7994_s11 }
 0xb09   :  { %3937 = vsyncpa [#allocation3], 1 }
 0xb0a   :  { %3939 = vsyncpa [#allocation3 + $0x1], 1 }
 0xb0b   :  { %3940 = vsyncpa [#allocation4], 1 }
 0xb0c   :  { %3942 = vsyncpa [#allocation4 + $0x1], 1 }

</bundles_post_ra>
